<compile_context>
chip_gen: v5e
topology: v5e:2x2
jax: 0.10.0
libtpu: 0.0.40
codegen_flags: <defaults>
</compile_context>

<pallas_src>
import jax
import jax.numpy as jnp
from jax import lax
from jax.experimental import pallas as pl
from jax.experimental.pallas import tpu as pltpu


S = 4  # every conv in the Discriminator uses stride 4


def _ceil(a, b):
    return -(-a // b)


# ----------------------------------------------------------------------------
# Static network plan (mirrors the PyTorch __init__ loop)
# ----------------------------------------------------------------------------
def build_plan(n_label_ch, ns, seq_length, batch):
    N = batch
    stages = [dict(C_in=1 + n_label_ch, C_out=ns, K=25, pad=1, bn=True)]
    mult, x = 1, seq_length
    while x >= 256:
        stages.append(dict(C_in=ns * mult, C_out=ns * mult * 2, K=25, pad=1,
                           bn=True))
        mult *= 2
        x //= 4
    stages.append(dict(C_in=ns * mult, C_out=1, K=8, pad=0, bn=False))

    L = seq_length
    for st in stages:
        st["L_in"] = L
        st["L_out"] = (L + 2 * st["pad"] - st["K"]) // S + 1
        st["Kf"] = (st["K"] - 1) // S + 1                 # x4-folded taps
        # per-sample folded rows: cover the padded input AND every tap offset
        st["R"] = max(_ceil(L + 2 * st["pad"], S), st["L_out"] + st["Kf"] - 1)
        st["L_store"] = S * st["R"]                        # per-sample time rows
        st["C_inp"] = _ceil(st["C_in"], 8) * 8             # lane-pad input chans
        st["C_outp"] = st["C_out"] if st["bn"] else 128    # lane-dense final out
        L = st["L_out"]
    return dict(N=N, stages=stages)


# ----------------------------------------------------------------------------
# The single fused Pallas kernel
# ----------------------------------------------------------------------------
def _make_kernel(plan):
    stages = plan["stages"]
    N = plan["N"]
    n_bn = len(stages) - 1  # fused stage-0 + middle blocks (all Conv+BN+ReLU)

    def conv_acc(src_ref, w_ref, n, st):
        """Per-sample strided conv from the x4-folded layout: Kf matmuls of
        contraction depth 4*C_inp, bf16 operands, f32 accumulation.  Only
        valid output rows are computed (no junk rows, no selection matmul)."""
        L_out, Kf, R = st["L_out"], st["Kf"], st["R"]
        acc = jnp.zeros((L_out, st["C_outp"]), jnp.float32)
        for j in range(Kf):                                   # static -> unrolled
            xj = src_ref[pl.ds(n * R + j, L_out), :]          # (L_out, 4*C_inp) bf16
            acc = acc + jnp.dot(xj, w_ref[j],
                                preferred_element_type=jnp.float32)
        return acc

    def fold(tbuf_ref, fbuf_ref, st):
        """Time-major (N*L_store, C) f32 -> x4-folded (N*R, 4*C) bf16.
        4 strided sublane reads + 4 lane-block stores; done once per stage so
        every conv tap afterwards is a unit-stride, full-lane-width read."""
        C, rows = st["C_inp"], N * st["R"]
        for m in range(S):
            fbuf_ref[:, m * C:(m + 1) * C] = (
                tbuf_ref[pl.ds(m, rows, stride=S), :].astype(fbuf_ref.dtype))

    def kernel(*refs):
        it = iter(refs)
        x0_ref = next(it)                                       # folded, bf16
        prm = [tuple(next(it) for _ in range(4)) for _ in range(n_bn)]
        w_end_ref = next(it)
        b_end_ref = next(it)
        o_ref = next(it)
        tbufs = [next(it) for _ in range(n_bn)]   # time-major f32 handoff bufs
        fbufs = [next(it) for _ in range(n_bn)]   # x4-folded bf16 MXU feeds

        # ---- fused stage-0 (cv_sample+cv_labels+concat) and middle blocks ----
        src = x0_ref
        for s in range(n_bn):
            st, nxt = stages[s], stages[s + 1]
            w_ref, b_ref, g_ref, bt_ref = prm[s]
            if s > 0:
                fold(tbufs[s - 1], fbufs[s - 1], st)
                src = fbufs[s - 1]

            # zero the next stage's buffer once (left pad / right fill rows)
            tbufs[s][...] = jnp.zeros_like(tbufs[s])

            # conv (+bias) per sample; single-pass BN stats (sum, sum-of-sq)
            ys, s1, s2 = [], 0.0, 0.0
            for n in range(N):
                y = conv_acc(src, w_ref, n, st) + b_ref[...]    # f32 (L_out, C)
                ys.append(y)
                s1 = s1 + jnp.sum(y, axis=0, keepdims=True)
                s2 = s2 + jnp.sum(y * y, axis=0, keepdims=True)
            inv_cnt = 1.0 / float(N * st["L_out"])
            mean = s1 * inv_cnt
            var = jnp.maximum(s2 * inv_cnt - mean * mean, 0.0)  # biased var
            scale = g_ref[...] * lax.rsqrt(var + 1e-5)
            shift = bt_ref[...] - mean * scale

            for n in range(N):
                y = jnp.maximum(ys[n] * scale + shift, 0.0)     # BN + ReLU (f32)
                row = n * nxt["L_store"] + nxt["pad"]
                tbufs[s][pl.ds(row, st["L_out"]), pl.ds(0, st["C_out"])] = y

        # ---- end stage: Conv1d(C, 1, 8, 4, 0) + Sigmoid (128-lane-dense) ----
        st = stages[-1]
        fold(tbufs[n_bn - 1], fbufs[n_bn - 1], st)
        for n in range(N):
            z = conv_acc(fbufs[n_bn - 1], w_end_ref, n, st) + b_end_ref[...]
            o_ref[pl.ds(n * st["L_out"], st["L_out"]), :] = jax.nn.sigmoid(z)

    return kernel


def _run_fused(plan, operands):
    stages = plan["stages"]
    N = plan["N"]
    n_bn = len(stages) - 1
    end = stages[-1]
    vmem = pl.BlockSpec(memory_space=pltpu.MemorySpace.VMEM)
    scratch = (
        # time-major f32 handoff buffer for each consuming stage s+1
        [pltpu.VMEM((N * stages[s + 1]["L_store"], stages[s + 1]["C_inp"]),
                    jnp.float32) for s in range(n_bn)]
        # x4-folded bf16 MXU-feed buffer for each consuming stage s+1
        + [pltpu.VMEM((N * stages[s + 1]["R"], S * stages[s + 1]["C_inp"]),
                      jnp.bfloat16) for s in range(n_bn)])
    return pl.pallas_call(
        _make_kernel(plan),
        out_shape=jax.ShapeDtypeStruct((N * end["L_out"], end["C_outp"]),
                                       jnp.float32),
        in_specs=[vmem] * len(operands),
        out_specs=vmem,
        scratch_shapes=scratch,
    )(*operands)


# ----------------------------------------------------------------------------
# Parameters (deterministic init) + forward wrapper
# ----------------------------------------------------------------------------
def init_discriminator_params(key, num_labels, ns=32, seq_length=256):
    ksz = 25
    mns = ns

    def conv_init(key, c_out, c_in, k):
        kw, kb = jax.random.split(key)
        W = 0.1 * jax.random.normal(kw, (c_out, c_in, k), jnp.float32)
        b = 0.1 * jax.random.normal(kb, (c_out,), jnp.float32)
        return W, b

    def bn_init(key, c):
        kg, kb = jax.random.split(key)
        gamma = 1.0 + 0.1 * jax.random.normal(kg, (c,), jnp.float32)
        beta = 0.1 * jax.random.normal(kb, (c,), jnp.float32)
        return gamma, beta

    keys = jax.random.split(key, 16)
    params = {}
    params["cv_sample"] = conv_init(keys[0], mns // 2, 1, ksz)
    params["bn_sample"] = bn_init(keys[1], mns // 2)
    params["cv_labels"] = conv_init(keys[2], mns // 2, sum(num_labels), ksz)
    params["bn_labels"] = bn_init(keys[3], mns // 2)

    middle = []
    mult, x, kidx = 1, seq_length, 4
    while x >= 256:
        cw = conv_init(keys[kidx], mns * mult * 2, mns * mult, ksz)
        bw = bn_init(keys[kidx + 1], mns * mult * 2)
        middle.append((cw, bw))
        kidx += 2
        mult *= 2
        x //= 4
    params["middle"] = middle
    params["end"] = conv_init(keys[kidx], 1, mns * mult, 8)
    return params


@jax.jit
def discriminator_forward(params, sample, labels):
    N, _, L = sample.shape
    n_label_ch = labels.shape[1]
    ns = params["cv_sample"][0].shape[0] * 2
    plan = build_plan(n_label_ch, ns, L, N)
    stages = plan["stages"]
    st0, end = stages[0], stages[-1]

    # ---- stage-0 input: concat channels, lane-pad C 5->8, zero time-pad,
    #      x4-fold (pure reshape) -- done host/XLA-side, passed as bf16.
    xin = jnp.concatenate([sample, labels], axis=1)            # (N, C_in0, L)
    xin = jnp.transpose(xin, (0, 2, 1))                        # (N, L, C_in0)
    xin = jnp.pad(xin, ((0, 0),
                        (st0["pad"], st0["L_store"] - L - st0["pad"]),
                        (0, st0["C_inp"] - st0["C_in"])))
    x0f = xin.reshape(N * st0["R"], S * st0["C_inp"]).astype(jnp.bfloat16)
    operands = [x0f]

    def fold_weight(W, st):
        # (C_out, C_in, K) torch layout -> (Kf, 4*C_inp, C_outp), bf16
        C_out, C_in, K = W.shape
        Wt = jnp.transpose(W, (2, 1, 0))                       # (K, C_in, C_out)
        Wt = jnp.pad(Wt, ((0, S * st["Kf"] - K),
                          (0, st["C_inp"] - C_in),
                          (0, st["C_outp"] - C_out)))
        return Wt.reshape(st["Kf"], S * st["C_inp"],
                          st["C_outp"]).astype(jnp.bfloat16)

    # ---- stage 0: block-diagonal fusion of cv_sample & cv_labels (+ concat)
    Ws, bs_ = params["cv_sample"]
    gs, bts = params["bn_sample"]
    Wl, bl_ = params["cv_labels"]
    gl, btl = params["bn_labels"]
    half = Ws.shape[0]
    W0 = jnp.zeros((st0["C_out"], st0["C_in"], st0["K"]), jnp.float32)
    W0 = W0.at[:half, :1, :].set(Ws)
    W0 = W0.at[half:, 1:, :].set(Wl)
    operands += [fold_weight(W0, st0),
                 jnp.concatenate([bs_, bl_]).reshape(1, -1),
                 jnp.concatenate([gs, gl]).reshape(1, -1),
                 jnp.concatenate([bts, btl]).reshape(1, -1)]

    # ---- middle Conv+BN+ReLU stages
    for st, ((Wm, bm), (gm, btm)) in zip(stages[1:-1], params["middle"]):
        operands += [fold_weight(Wm, st),
                     bm.reshape(1, -1), gm.reshape(1, -1), btm.reshape(1, -1)]

    # ---- end Conv + Sigmoid (output channel padded to a 128-lane slab)
    We, be = params["end"]
    b_end = jnp.zeros((1, end["C_outp"]), jnp.float32).at[0, :1].set(be)
    operands += [fold_weight(We, end), b_end]

    out = _run_fused(plan, operands)                 # (N*L_out_end, 128)
    out = out[:, 0].reshape(N, end["L_out"])
    return out[:, None, :]                           # (N, 1, L_out_end)


# ----------------------------------------------------------------------------
# Pure-JAX reference (correctness check)
# ----------------------------------------------------------------------------
def _ref_forward(params, sample, labels):
    def conv1d(x, W, b, stride, pad):
        y = lax.conv_general_dilated(
            x, W, window_strides=(stride,), padding=[(pad, pad)],
            dimension_numbers=("NCH", "OIH", "NCH"))
        return y + b[None, :, None]

    def bn_relu(x, g, bt):
        m = jnp.mean(x, axis=(0, 2), keepdims=True)
        v = jnp.mean(jnp.square(x - m), axis=(0, 2), keepdims=True)
        y = (x - m) * lax.rsqrt(v + 1e-5) * g[None, :, None] + bt[None, :, None]
        return jnp.maximum(y, 0.0)

    Ws, bs_ = params["cv_sample"]
    gs, bts = params["bn_sample"]
    Wl, bl_ = params["cv_labels"]
    gl, btl = params["bn_labels"]
    x = bn_relu(conv1d(sample, Ws, bs_, 4, 1), gs, bts)
    y = bn_relu(conv1d(labels, Wl, bl_, 4, 1), gl, btl)
    x = jnp.concatenate([x, y], axis=1)
    for (Wm, bm), (gm, btm) in params["middle"]:
        x = bn_relu(conv1d(x, Wm, bm, 4, 1), gm, btm)
    We, be = params["end"]
    return jax.nn.sigmoid(conv1d(x, We, be, 4, 0))


# ----------------------------------------------------------------------------
if __name__ == "__main__":
    key = jax.random.PRNGKey(0)
    k_param, k_sample, k_labels = jax.random.split(key, 3)

    # Small-but-consistent shapes: seq_length=256 -> exactly one middle block.
    num_labels = [2, 2]            # sum(num_labels) = 4 label channels
    ns = 32
    seq_length = 256
    batch = 2

    params = init_discriminator_params(k_param, num_labels, ns=ns,
                                       seq_length=seq_length)
    sample = jax.random.normal(k_sample, (batch, 1, seq_length), jnp.float32)
    labels = jax.random.normal(k_labels, (batch, sum(num_labels), seq_length),
                               jnp.float32)

    out = discriminator_forward(params, sample, labels)
    out = jax.block_until_ready(out)

    assert out.shape == (batch, 1, 1), out.shape
    assert bool(jnp.all(jnp.isfinite(out)))
    assert bool(jnp.all((out > 0.0) & (out < 1.0)))       # sigmoid range

    ref = _ref_forward(params, sample, labels)
    # bf16 MXU operands (per perf review) with f32 accumulation -> slightly
    # looser matching than the previous all-f32 path.
    assert bool(jnp.allclose(out, ref, atol=2e-2, rtol=2e-2)), (out, ref)

    print("KERNEL_OK")
</pallas_src>

<mosaic_0001>
module attributes {stable_mosaic.version = 11 : i64} {
  func.func @kernel(%arg0: memref<130x32xbf16, #tpu.memory_space<vmem>>, %arg1: memref<7x32x32xbf16, #tpu.memory_space<vmem>>, %arg2: memref<1x32xf32, #tpu.memory_space<vmem>>, %arg3: memref<1x32xf32, #tpu.memory_space<vmem>>, %arg4: memref<1x32xf32, #tpu.memory_space<vmem>>, %arg5: memref<7x128x64xbf16, #tpu.memory_space<vmem>>, %arg6: memref<1x64xf32, #tpu.memory_space<vmem>>, %arg7: memref<1x64xf32, #tpu.memory_space<vmem>>, %arg8: memref<1x64xf32, #tpu.memory_space<vmem>>, %arg9: memref<2x256x128xbf16, #tpu.memory_space<vmem>>, %arg10: memref<1x128xf32, #tpu.memory_space<vmem>>, %arg11: memref<2x128xf32, #tpu.memory_space<vmem>>, %arg12: memref<128x32xf32, #tpu.memory_space<vmem>>, %arg13: memref<24x64xf32, #tpu.memory_space<vmem>>, %arg14: memref<32x128xbf16, #tpu.memory_space<vmem>>, %arg15: memref<6x256xbf16, #tpu.memory_space<vmem>>) attributes {dimension_semantics = [], scalar_prefetch = 0 : i64, scratch_operands = 4 : i64, tpu.core_type = #tpu.core_type<tc>} {
    %cst = arith.constant 0.000000e+00 : f32
    %0 = vector.broadcast %cst : f32 to vector<128x32xf32>
    %c0 = arith.constant 0 : index
    %c0_0 = arith.constant 0 : index
    %1 = vector.load %arg12[%c0, %c0_0] : memref<128x32xf32, #tpu.memory_space<vmem>>, vector<128x32xf32>
    tpu.vector_store %arg12[%c0, %c0_0], %0 {strides = array<i32>} : memref<128x32xf32, #tpu.memory_space<vmem>>, vector<128x32xf32>,
    %cst_1 = arith.constant 0.000000e+00 : f32
    %2 = vector.broadcast %cst_1 : f32 to vector<59x32xf32>
    %c0_2 = arith.constant 0 : index
    %c0_3 = arith.constant 0 : index
    %3 = vector.load %arg0[%c0_2, %c0_3] : memref<130x32xbf16, #tpu.memory_space<vmem>>, vector<59x32xbf16>
    %c0_4 = arith.constant 0 : index
    %c0_5 = arith.constant 0 : index
    %c0_6 = arith.constant 0 : index
    %4 = vector.load %arg1[%c0_4, %c0_5, %c0_6] : memref<7x32x32xbf16, #tpu.memory_space<vmem>>, vector<1x32x32xbf16>
    %5 = vector.shape_cast %4 : vector<1x32x32xbf16> to vector<32x32xbf16>
    %cst_7 = arith.constant dense<0.000000e+00> : vector<59x32xf32>
    %6 = tpu.matmul %3, %5, %cst_7 {dimension_numbers = #tpu.dot_dimension_numbers<[1], [0], [0], [1], [0, 0, 1, 1], [], []>} : vector<59x32xbf16>, vector<32x32xbf16>, vector<59x32xf32> -> vector<59x32xf32>
    %7 = arith.addf %2, %6 : vector<59x32xf32>
    %c1 = arith.constant 1 : index
    %c0_8 = arith.constant 0 : index
    %8 = vector.load %arg0[%c1, %c0_8] : memref<130x32xbf16, #tpu.memory_space<vmem>>, vector<59x32xbf16>
    %c1_9 = arith.constant 1 : index
    %c0_10 = arith.constant 0 : index
    %c0_11 = arith.constant 0 : index
    %9 = vector.load %arg1[%c1_9, %c0_10, %c0_11] : memref<7x32x32xbf16, #tpu.memory_space<vmem>>, vector<1x32x32xbf16>
    %10 = vector.shape_cast %9 : vector<1x32x32xbf16> to vector<32x32xbf16>
    %cst_12 = arith.constant dense<0.000000e+00> : vector<59x32xf32>
    %11 = tpu.matmul %8, %10, %cst_12 {dimension_numbers = #tpu.dot_dimension_numbers<[1], [0], [0], [1], [0, 0, 1, 1], [], []>} : vector<59x32xbf16>, vector<32x32xbf16>, vector<59x32xf32> -> vector<59x32xf32>
    %12 = arith.addf %7, %11 : vector<59x32xf32>
    %c2 = arith.constant 2 : index
    %c0_13 = arith.constant 0 : index
    %13 = vector.load %arg0[%c2, %c0_13] : memref<130x32xbf16, #tpu.memory_space<vmem>>, vector<59x32xbf16>
    %c2_14 = arith.constant 2 : index
    %c0_15 = arith.constant 0 : index
    %c0_16 = arith.constant 0 : index
    %14 = vector.load %arg1[%c2_14, %c0_15, %c0_16] : memref<7x32x32xbf16, #tpu.memory_space<vmem>>, vector<1x32x32xbf16>
    %15 = vector.shape_cast %14 : vector<1x32x32xbf16> to vector<32x32xbf16>
    %cst_17 = arith.constant dense<0.000000e+00> : vector<59x32xf32>
    %16 = tpu.matmul %13, %15, %cst_17 {dimension_numbers = #tpu.dot_dimension_numbers<[1], [0], [0], [1], [0, 0, 1, 1], [], []>} : vector<59x32xbf16>, vector<32x32xbf16>, vector<59x32xf32> -> vector<59x32xf32>
    %17 = arith.addf %12, %16 : vector<59x32xf32>
    %c3 = arith.constant 3 : index
    %c0_18 = arith.constant 0 : index
    %18 = vector.load %arg0[%c3, %c0_18] : memref<130x32xbf16, #tpu.memory_space<vmem>>, vector<59x32xbf16>
    %c3_19 = arith.constant 3 : index
    %c0_20 = arith.constant 0 : index
    %c0_21 = arith.constant 0 : index
    %19 = vector.load %arg1[%c3_19, %c0_20, %c0_21] : memref<7x32x32xbf16, #tpu.memory_space<vmem>>, vector<1x32x32xbf16>
    %20 = vector.shape_cast %19 : vector<1x32x32xbf16> to vector<32x32xbf16>
    %cst_22 = arith.constant dense<0.000000e+00> : vector<59x32xf32>
    %21 = tpu.matmul %18, %20, %cst_22 {dimension_numbers = #tpu.dot_dimension_numbers<[1], [0], [0], [1], [0, 0, 1, 1], [], []>} : vector<59x32xbf16>, vector<32x32xbf16>, vector<59x32xf32> -> vector<59x32xf32>
    %22 = arith.addf %17, %21 : vector<59x32xf32>
    %c4 = arith.constant 4 : index
    %c0_23 = arith.constant 0 : index
    %23 = vector.load %arg0[%c4, %c0_23] : memref<130x32xbf16, #tpu.memory_space<vmem>>, vector<59x32xbf16>
    %c4_24 = arith.constant 4 : index
    %c0_25 = arith.constant 0 : index
    %c0_26 = arith.constant 0 : index
    %24 = vector.load %arg1[%c4_24, %c0_25, %c0_26] : memref<7x32x32xbf16, #tpu.memory_space<vmem>>, vector<1x32x32xbf16>
    %25 = vector.shape_cast %24 : vector<1x32x32xbf16> to vector<32x32xbf16>
    %cst_27 = arith.constant dense<0.000000e+00> : vector<59x32xf32>
    %26 = tpu.matmul %23, %25, %cst_27 {dimension_numbers = #tpu.dot_dimension_numbers<[1], [0], [0], [1], [0, 0, 1, 1], [], []>} : vector<59x32xbf16>, vector<32x32xbf16>, vector<59x32xf32> -> vector<59x32xf32>
    %27 = arith.addf %22, %26 : vector<59x32xf32>
    %c5 = arith.constant 5 : index
    %c0_28 = arith.constant 0 : index
    %28 = vector.load %arg0[%c5, %c0_28] : memref<130x32xbf16, #tpu.memory_space<vmem>>, vector<59x32xbf16>
    %c5_29 = arith.constant 5 : index
    %c0_30 = arith.constant 0 : index
    %c0_31 = arith.constant 0 : index
    %29 = vector.load %arg1[%c5_29, %c0_30, %c0_31] : memref<7x32x32xbf16, #tpu.memory_space<vmem>>, vector<1x32x32xbf16>
    %30 = vector.shape_cast %29 : vector<1x32x32xbf16> to vector<32x32xbf16>
    %cst_32 = arith.constant dense<0.000000e+00> : vector<59x32xf32>
    %31 = tpu.matmul %28, %30, %cst_32 {dimension_numbers = #tpu.dot_dimension_numbers<[1], [0], [0], [1], [0, 0, 1, 1], [], []>} : vector<59x32xbf16>, vector<32x32xbf16>, vector<59x32xf32> -> vector<59x32xf32>
    %32 = arith.addf %27, %31 : vector<59x32xf32>
    %c6 = arith.constant 6 : index
    %c0_33 = arith.constant 0 : index
    %33 = vector.load %arg0[%c6, %c0_33] : memref<130x32xbf16, #tpu.memory_space<vmem>>, vector<59x32xbf16>
    %c6_34 = arith.constant 6 : index
    %c0_35 = arith.constant 0 : index
    %c0_36 = arith.constant 0 : index
    %34 = vector.load %arg1[%c6_34, %c0_35, %c0_36] : memref<7x32x32xbf16, #tpu.memory_space<vmem>>, vector<1x32x32xbf16>
    %35 = vector.shape_cast %34 : vector<1x32x32xbf16> to vector<32x32xbf16>
    %cst_37 = arith.constant dense<0.000000e+00> : vector<59x32xf32>
    %36 = tpu.matmul %33, %35, %cst_37 {dimension_numbers = #tpu.dot_dimension_numbers<[1], [0], [0], [1], [0, 0, 1, 1], [], []>} : vector<59x32xbf16>, vector<32x32xbf16>, vector<59x32xf32> -> vector<59x32xf32>
    %37 = arith.addf %32, %36 : vector<59x32xf32>
    %c0_38 = arith.constant 0 : index
    %c0_39 = arith.constant 0 : index
    %38 = vector.load %arg2[%c0_38, %c0_39] : memref<1x32xf32, #tpu.memory_space<vmem>>, vector<1x32xf32>
    %39 = vector.broadcast %38 : vector<1x32xf32> to vector<59x32xf32>
    %40 = arith.addf %37, %39 : vector<59x32xf32>
    %cst_40 = arith.constant dense<0.000000e+00> : vector<32xf32>
    %41 = vector.multi_reduction <add>, %40, %cst_40 [0] : vector<59x32xf32> to vector<32xf32>
    %42 = vector.shape_cast %41 : vector<32xf32> to vector<1x32xf32>
    %cst_41 = arith.constant 0.000000e+00 : f32
    %43 = vector.broadcast %cst_41 : f32 to vector<1x32xf32>
    %44 = arith.addf %43, %42 : vector<1x32xf32>
    %45 = arith.mulf %40, %40 : vector<59x32xf32>
    %cst_42 = arith.constant dense<0.000000e+00> : vector<32xf32>
    %46 = vector.multi_reduction <add>, %45, %cst_42 [0] : vector<59x32xf32> to vector<32xf32>
    %47 = vector.shape_cast %46 : vector<32xf32> to vector<1x32xf32>
    %cst_43 = arith.constant 0.000000e+00 : f32
    %48 = vector.broadcast %cst_43 : f32 to vector<1x32xf32>
    %49 = arith.addf %48, %47 : vector<1x32xf32>
    %cst_44 = arith.constant 0.000000e+00 : f32
    %50 = vector.broadcast %cst_44 : f32 to vector<59x32xf32>
    %c65 = arith.constant 65 : index
    %c0_45 = arith.constant 0 : index
    %51 = vector.load %arg0[%c65, %c0_45] : memref<130x32xbf16, #tpu.memory_space<vmem>>, vector<59x32xbf16>
    %c0_46 = arith.constant 0 : index
    %c0_47 = arith.constant 0 : index
    %c0_48 = arith.constant 0 : index
    %52 = vector.load %arg1[%c0_46, %c0_47, %c0_48] : memref<7x32x32xbf16, #tpu.memory_space<vmem>>, vector<1x32x32xbf16>
    %53 = vector.shape_cast %52 : vector<1x32x32xbf16> to vector<32x32xbf16>
    %cst_49 = arith.constant dense<0.000000e+00> : vector<59x32xf32>
    %54 = tpu.matmul %51, %53, %cst_49 {dimension_numbers = #tpu.dot_dimension_numbers<[1], [0], [0], [1], [0, 0, 1, 1], [], []>} : vector<59x32xbf16>, vector<32x32xbf16>, vector<59x32xf32> -> vector<59x32xf32>
    %55 = arith.addf %50, %54 : vector<59x32xf32>
    %c66 = arith.constant 66 : index
    %c0_50 = arith.constant 0 : index
    %56 = vector.load %arg0[%c66, %c0_50] : memref<130x32xbf16, #tpu.memory_space<vmem>>, vector<59x32xbf16>
    %c1_51 = arith.constant 1 : index
    %c0_52 = arith.constant 0 : index
    %c0_53 = arith.constant 0 : index
    %57 = vector.load %arg1[%c1_51, %c0_52, %c0_53] : memref<7x32x32xbf16, #tpu.memory_space<vmem>>, vector<1x32x32xbf16>
    %58 = vector.shape_cast %57 : vector<1x32x32xbf16> to vector<32x32xbf16>
    %cst_54 = arith.constant dense<0.000000e+00> : vector<59x32xf32>
    %59 = tpu.matmul %56, %58, %cst_54 {dimension_numbers = #tpu.dot_dimension_numbers<[1], [0], [0], [1], [0, 0, 1, 1], [], []>} : vector<59x32xbf16>, vector<32x32xbf16>, vector<59x32xf32> -> vector<59x32xf32>
    %60 = arith.addf %55, %59 : vector<59x32xf32>
    %c67 = arith.constant 67 : index
    %c0_55 = arith.constant 0 : index
    %61 = vector.load %arg0[%c67, %c0_55] : memref<130x32xbf16, #tpu.memory_space<vmem>>, vector<59x32xbf16>
    %c2_56 = arith.constant 2 : index
    %c0_57 = arith.constant 0 : index
    %c0_58 = arith.constant 0 : index
    %62 = vector.load %arg1[%c2_56, %c0_57, %c0_58] : memref<7x32x32xbf16, #tpu.memory_space<vmem>>, vector<1x32x32xbf16>
    %63 = vector.shape_cast %62 : vector<1x32x32xbf16> to vector<32x32xbf16>
    %cst_59 = arith.constant dense<0.000000e+00> : vector<59x32xf32>
    %64 = tpu.matmul %61, %63, %cst_59 {dimension_numbers = #tpu.dot_dimension_numbers<[1], [0], [0], [1], [0, 0, 1, 1], [], []>} : vector<59x32xbf16>, vector<32x32xbf16>, vector<59x32xf32> -> vector<59x32xf32>
    %65 = arith.addf %60, %64 : vector<59x32xf32>
    %c68 = arith.constant 68 : index
    %c0_60 = arith.constant 0 : index
    %66 = vector.load %arg0[%c68, %c0_60] : memref<130x32xbf16, #tpu.memory_space<vmem>>, vector<59x32xbf16>
    %c3_61 = arith.constant 3 : index
    %c0_62 = arith.constant 0 : index
    %c0_63 = arith.constant 0 : index
    %67 = vector.load %arg1[%c3_61, %c0_62, %c0_63] : memref<7x32x32xbf16, #tpu.memory_space<vmem>>, vector<1x32x32xbf16>
    %68 = vector.shape_cast %67 : vector<1x32x32xbf16> to vector<32x32xbf16>
    %cst_64 = arith.constant dense<0.000000e+00> : vector<59x32xf32>
    %69 = tpu.matmul %66, %68, %cst_64 {dimension_numbers = #tpu.dot_dimension_numbers<[1], [0], [0], [1], [0, 0, 1, 1], [], []>} : vector<59x32xbf16>, vector<32x32xbf16>, vector<59x32xf32> -> vector<59x32xf32>
    %70 = arith.addf %65, %69 : vector<59x32xf32>
    %c69 = arith.constant 69 : index
    %c0_65 = arith.constant 0 : index
    %71 = vector.load %arg0[%c69, %c0_65] : memref<130x32xbf16, #tpu.memory_space<vmem>>, vector<59x32xbf16>
    %c4_66 = arith.constant 4 : index
    %c0_67 = arith.constant 0 : index
    %c0_68 = arith.constant 0 : index
    %72 = vector.load %arg1[%c4_66, %c0_67, %c0_68] : memref<7x32x32xbf16, #tpu.memory_space<vmem>>, vector<1x32x32xbf16>
    %73 = vector.shape_cast %72 : vector<1x32x32xbf16> to vector<32x32xbf16>
    %cst_69 = arith.constant dense<0.000000e+00> : vector<59x32xf32>
    %74 = tpu.matmul %71, %73, %cst_69 {dimension_numbers = #tpu.dot_dimension_numbers<[1], [0], [0], [1], [0, 0, 1, 1], [], []>} : vector<59x32xbf16>, vector<32x32xbf16>, vector<59x32xf32> -> vector<59x32xf32>
    %75 = arith.addf %70, %74 : vector<59x32xf32>
    %c70 = arith.constant 70 : index
    %c0_70 = arith.constant 0 : index
    %76 = vector.load %arg0[%c70, %c0_70] : memref<130x32xbf16, #tpu.memory_space<vmem>>, vector<59x32xbf16>
    %c5_71 = arith.constant 5 : index
    %c0_72 = arith.constant 0 : index
    %c0_73 = arith.constant 0 : index
    %77 = vector.load %arg1[%c5_71, %c0_72, %c0_73] : memref<7x32x32xbf16, #tpu.memory_space<vmem>>, vector<1x32x32xbf16>
    %78 = vector.shape_cast %77 : vector<1x32x32xbf16> to vector<32x32xbf16>
    %cst_74 = arith.constant dense<0.000000e+00> : vector<59x32xf32>
    %79 = tpu.matmul %76, %78, %cst_74 {dimension_numbers = #tpu.dot_dimension_numbers<[1], [0], [0], [1], [0, 0, 1, 1], [], []>} : vector<59x32xbf16>, vector<32x32xbf16>, vector<59x32xf32> -> vector<59x32xf32>
    %80 = arith.addf %75, %79 : vector<59x32xf32>
    %c71 = arith.constant 71 : index
    %c0_75 = arith.constant 0 : index
    %81 = vector.load %arg0[%c71, %c0_75] : memref<130x32xbf16, #tpu.memory_space<vmem>>, vector<59x32xbf16>
    %c6_76 = arith.constant 6 : index
    %c0_77 = arith.constant 0 : index
    %c0_78 = arith.constant 0 : index
    %82 = vector.load %arg1[%c6_76, %c0_77, %c0_78] : memref<7x32x32xbf16, #tpu.memory_space<vmem>>, vector<1x32x32xbf16>
    %83 = vector.shape_cast %82 : vector<1x32x32xbf16> to vector<32x32xbf16>
    %cst_79 = arith.constant dense<0.000000e+00> : vector<59x32xf32>
    %84 = tpu.matmul %81, %83, %cst_79 {dimension_numbers = #tpu.dot_dimension_numbers<[1], [0], [0], [1], [0, 0, 1, 1], [], []>} : vector<59x32xbf16>, vector<32x32xbf16>, vector<59x32xf32> -> vector<59x32xf32>
    %85 = arith.addf %80, %84 : vector<59x32xf32>
    %c0_80 = arith.constant 0 : index
    %c0_81 = arith.constant 0 : index
    %86 = vector.load %arg2[%c0_80, %c0_81] : memref<1x32xf32, #tpu.memory_space<vmem>>, vector<1x32xf32>
    %87 = vector.broadcast %86 : vector<1x32xf32> to vector<59x32xf32>
    %88 = arith.addf %85, %87 : vector<59x32xf32>
    %cst_82 = arith.constant dense<0.000000e+00> : vector<32xf32>
    %89 = vector.multi_reduction <add>, %88, %cst_82 [0] : vector<59x32xf32> to vector<32xf32>
    %90 = vector.shape_cast %89 : vector<32xf32> to vector<1x32xf32>
    %91 = arith.addf %44, %90 : vector<1x32xf32>
    %92 = arith.mulf %88, %88 : vector<59x32xf32>
    %cst_83 = arith.constant dense<0.000000e+00> : vector<32xf32>
    %93 = vector.multi_reduction <add>, %92, %cst_83 [0] : vector<59x32xf32> to vector<32xf32>
    %94 = vector.shape_cast %93 : vector<32xf32> to vector<1x32xf32>
    %95 = arith.addf %49, %94 : vector<1x32xf32>
    %cst_84 = arith.constant 0.00847457629 : f32
    %96 = vector.broadcast %cst_84 : f32 to vector<1x32xf32>
    %97 = arith.mulf %91, %96 : vector<1x32xf32>
    %cst_85 = arith.constant 0.00847457629 : f32
    %98 = vector.broadcast %cst_85 : f32 to vector<1x32xf32>
    %99 = arith.mulf %95, %98 : vector<1x32xf32>
    %100 = arith.mulf %97, %97 : vector<1x32xf32>
    %101 = arith.subf %99, %100 : vector<1x32xf32>
    %cst_86 = arith.constant 0.000000e+00 : f32
    %102 = vector.broadcast %cst_86 : f32 to vector<1x32xf32>
    %103 = arith.maximumf %101, %102 : vector<1x32xf32>
    %c0_87 = arith.constant 0 : index
    %c0_88 = arith.constant 0 : index
    %104 = vector.load %arg3[%c0_87, %c0_88] : memref<1x32xf32, #tpu.memory_space<vmem>>, vector<1x32xf32>
    %cst_89 = arith.constant 9.99999974E-6 : f32
    %105 = vector.broadcast %cst_89 : f32 to vector<1x32xf32>
    %106 = arith.addf %103, %105 : vector<1x32xf32>
    %107 = math.rsqrt %106 : vector<1x32xf32>
    %108 = arith.mulf %104, %107 : vector<1x32xf32>
    %c0_90 = arith.constant 0 : index
    %c0_91 = arith.constant 0 : index
    %109 = vector.load %arg4[%c0_90, %c0_91] : memref<1x32xf32, #tpu.memory_space<vmem>>, vector<1x32xf32>
    %110 = arith.mulf %97, %108 : vector<1x32xf32>
    %111 = arith.subf %109, %110 : vector<1x32xf32>
    %112 = vector.broadcast %108 : vector<1x32xf32> to vector<59x32xf32>
    %113 = arith.mulf %40, %112 : vector<59x32xf32>
    %114 = vector.broadcast %111 : vector<1x32xf32> to vector<59x32xf32>
    %115 = arith.addf %113, %114 : vector<59x32xf32>
    %cst_92 = arith.constant 0.000000e+00 : f32
    %116 = vector.broadcast %cst_92 : f32 to vector<59x32xf32>
    %117 = arith.maximumf %115, %116 : vector<59x32xf32>
    %c1_93 = arith.constant 1 : index
    %c0_94 = arith.constant 0 : index
    %118 = vector.load %arg12[%c1_93, %c0_94] : memref<128x32xf32, #tpu.memory_space<vmem>>, vector<59x32xf32>
    tpu.vector_store %arg12[%c1_93, %c0_94], %117 {strides = array<i32>} : memref<128x32xf32, #tpu.memory_space<vmem>>, vector<59x32xf32>,
    %119 = vector.broadcast %108 : vector<1x32xf32> to vector<59x32xf32>
    %120 = arith.mulf %88, %119 : vector<59x32xf32>
    %121 = vector.broadcast %111 : vector<1x32xf32> to vector<59x32xf32>
    %122 = arith.addf %120, %121 : vector<59x32xf32>
    %cst_95 = arith.constant 0.000000e+00 : f32
    %123 = vector.broadcast %cst_95 : f32 to vector<59x32xf32>
    %124 = arith.maximumf %122, %123 : vector<59x32xf32>
    %c65_96 = arith.constant 65 : index
    %c0_97 = arith.constant 0 : index
    %125 = vector.load %arg12[%c65_96, %c0_97] : memref<128x32xf32, #tpu.memory_space<vmem>>, vector<59x32xf32>
    tpu.vector_store %arg12[%c65_96, %c0_97], %124 {strides = array<i32>} : memref<128x32xf32, #tpu.memory_space<vmem>>, vector<59x32xf32>,
    %c0_98 = arith.constant 0 : index
    %c0_99 = arith.constant 0 : index
    %126 = tpu.strided_load %arg12[%c0_98, %c0_99] {strides = array<i32: 4, 1>} : memref<128x32xf32, #tpu.memory_space<vmem>>, vector<32x32xf32>
    %127 = arith.truncf %126 : vector<32x32xf32> to vector<32x32xbf16>
    %c0_100 = arith.constant 0 : index
    %c0_101 = arith.constant 0 : index
    %128 = vector.load %arg14[%c0_100, %c0_101] : memref<32x128xbf16, #tpu.memory_space<vmem>>, vector<32x32xbf16>
    tpu.vector_store %arg14[%c0_100, %c0_101], %127 {strides = array<i32>} : memref<32x128xbf16, #tpu.memory_space<vmem>>, vector<32x32xbf16>,
    %c1_102 = arith.constant 1 : index
    %c0_103 = arith.constant 0 : index
    %129 = tpu.strided_load %arg12[%c1_102, %c0_103] {strides = array<i32: 4, 1>} : memref<128x32xf32, #tpu.memory_space<vmem>>, vector<32x32xf32>
    %130 = arith.truncf %129 : vector<32x32xf32> to vector<32x32xbf16>
    %c0_104 = arith.constant 0 : index
    %c32 = arith.constant 32 : index
    %131 = vector.load %arg14[%c0_104, %c32] : memref<32x128xbf16, #tpu.memory_space<vmem>>, vector<32x32xbf16>
    tpu.vector_store %arg14[%c0_104, %c32], %130 {strides = array<i32>} : memref<32x128xbf16, #tpu.memory_space<vmem>>, vector<32x32xbf16>,
    %c2_105 = arith.constant 2 : index
    %c0_106 = arith.constant 0 : index
    %132 = tpu.strided_load %arg12[%c2_105, %c0_106] {strides = array<i32: 4, 1>} : memref<128x32xf32, #tpu.memory_space<vmem>>, vector<32x32xf32>
    %133 = arith.truncf %132 : vector<32x32xf32> to vector<32x32xbf16>
    %c0_107 = arith.constant 0 : index
    %c64 = arith.constant 64 : index
    %134 = vector.load %arg14[%c0_107, %c64] : memref<32x128xbf16, #tpu.memory_space<vmem>>, vector<32x32xbf16>
    tpu.vector_store %arg14[%c0_107, %c64], %133 {strides = array<i32>} : memref<32x128xbf16, #tpu.memory_space<vmem>>, vector<32x32xbf16>,
    %c3_108 = arith.constant 3 : index
    %c0_109 = arith.constant 0 : index
    %135 = tpu.strided_load %arg12[%c3_108, %c0_109] {strides = array<i32: 4, 1>} : memref<128x32xf32, #tpu.memory_space<vmem>>, vector<32x32xf32>
    %136 = arith.truncf %135 : vector<32x32xf32> to vector<32x32xbf16>
    %c0_110 = arith.constant 0 : index
    %c96 = arith.constant 96 : index
    %137 = vector.load %arg14[%c0_110, %c96] : memref<32x128xbf16, #tpu.memory_space<vmem>>, vector<32x32xbf16>
    tpu.vector_store %arg14[%c0_110, %c96], %136 {strides = array<i32>} : memref<32x128xbf16, #tpu.memory_space<vmem>>, vector<32x32xbf16>,
    %cst_111 = arith.constant 0.000000e+00 : f32
    %138 = vector.broadcast %cst_111 : f32 to vector<24x64xf32>
    %c0_112 = arith.constant 0 : index
    %c0_113 = arith.constant 0 : index
    %139 = vector.load %arg13[%c0_112, %c0_113] : memref<24x64xf32, #tpu.memory_space<vmem>>, vector<24x64xf32>
    tpu.vector_store %arg13[%c0_112, %c0_113], %138 {strides = array<i32>} : memref<24x64xf32, #tpu.memory_space<vmem>>, vector<24x64xf32>,
    %cst_114 = arith.constant 0.000000e+00 : f32
    %140 = vector.broadcast %cst_114 : f32 to vector<10x64xf32>
    %c0_115 = arith.constant 0 : index
    %c0_116 = arith.constant 0 : index
    %141 = vector.load %arg14[%c0_115, %c0_116] : memref<32x128xbf16, #tpu.memory_space<vmem>>, vector<10x128xbf16>
    %c0_117 = arith.constant 0 : index
    %c0_118 = arith.constant 0 : index
    %c0_119 = arith.constant 0 : index
    %142 = vector.load %arg5[%c0_117, %c0_118, %c0_119] : memref<7x128x64xbf16, #tpu.memory_space<vmem>>, vector<1x128x64xbf16>
    %143 = vector.shape_cast %142 : vector<1x128x64xbf16> to vector<128x64xbf16>
    %cst_120 = arith.constant dense<0.000000e+00> : vector<10x64xf32>
    %144 = tpu.matmul %141, %143, %cst_120 {dimension_numbers = #tpu.dot_dimension_numbers<[1], [0], [0], [1], [0, 0, 1, 1], [], []>} : vector<10x128xbf16>, vector<128x64xbf16>, vector<10x64xf32> -> vector<10x64xf32>
    %145 = arith.addf %140, %144 : vector<10x64xf32>
    %c1_121 = arith.constant 1 : index
    %c0_122 = arith.constant 0 : index
    %146 = vector.load %arg14[%c1_121, %c0_122] : memref<32x128xbf16, #tpu.memory_space<vmem>>, vector<10x128xbf16>
    %c1_123 = arith.constant 1 : index
    %c0_124 = arith.constant 0 : index
    %c0_125 = arith.constant 0 : index
    %147 = vector.load %arg5[%c1_123, %c0_124, %c0_125] : memref<7x128x64xbf16, #tpu.memory_space<vmem>>, vector<1x128x64xbf16>
    %148 = vector.shape_cast %147 : vector<1x128x64xbf16> to vector<128x64xbf16>
    %cst_126 = arith.constant dense<0.000000e+00> : vector<10x64xf32>
    %149 = tpu.matmul %146, %148, %cst_126 {dimension_numbers = #tpu.dot_dimension_numbers<[1], [0], [0], [1], [0, 0, 1, 1], [], []>} : vector<10x128xbf16>, vector<128x64xbf16>, vector<10x64xf32> -> vector<10x64xf32>
    %150 = arith.addf %145, %149 : vector<10x64xf32>
    %c2_127 = arith.constant 2 : index
    %c0_128 = arith.constant 0 : index
    %151 = vector.load %arg14[%c2_127, %c0_128] : memref<32x128xbf16, #tpu.memory_space<vmem>>, vector<10x128xbf16>
    %c2_129 = arith.constant 2 : index
    %c0_130 = arith.constant 0 : index
    %c0_131 = arith.constant 0 : index
    %152 = vector.load %arg5[%c2_129, %c0_130, %c0_131] : memref<7x128x64xbf16, #tpu.memory_space<vmem>>, vector<1x128x64xbf16>
    %153 = vector.shape_cast %152 : vector<1x128x64xbf16> to vector<128x64xbf16>
    %cst_132 = arith.constant dense<0.000000e+00> : vector<10x64xf32>
    %154 = tpu.matmul %151, %153, %cst_132 {dimension_numbers = #tpu.dot_dimension_numbers<[1], [0], [0], [1], [0, 0, 1, 1], [], []>} : vector<10x128xbf16>, vector<128x64xbf16>, vector<10x64xf32> -> vector<10x64xf32>
    %155 = arith.addf %150, %154 : vector<10x64xf32>
    %c3_133 = arith.constant 3 : index
    %c0_134 = arith.constant 0 : index
    %156 = vector.load %arg14[%c3_133, %c0_134] : memref<32x128xbf16, #tpu.memory_space<vmem>>, vector<10x128xbf16>
    %c3_135 = arith.constant 3 : index
    %c0_136 = arith.constant 0 : index
    %c0_137 = arith.constant 0 : index
    %157 = vector.load %arg5[%c3_135, %c0_136, %c0_137] : memref<7x128x64xbf16, #tpu.memory_space<vmem>>, vector<1x128x64xbf16>
    %158 = vector.shape_cast %157 : vector<1x128x64xbf16> to vector<128x64xbf16>
    %cst_138 = arith.constant dense<0.000000e+00> : vector<10x64xf32>
    %159 = tpu.matmul %156, %158, %cst_138 {dimension_numbers = #tpu.dot_dimension_numbers<[1], [0], [0], [1], [0, 0, 1, 1], [], []>} : vector<10x128xbf16>, vector<128x64xbf16>, vector<10x64xf32> -> vector<10x64xf32>
    %160 = arith.addf %155, %159 : vector<10x64xf32>
    %c4_139 = arith.constant 4 : index
    %c0_140 = arith.constant 0 : index
    %161 = vector.load %arg14[%c4_139, %c0_140] : memref<32x128xbf16, #tpu.memory_space<vmem>>, vector<10x128xbf16>
    %c4_141 = arith.constant 4 : index
    %c0_142 = arith.constant 0 : index
    %c0_143 = arith.constant 0 : index
    %162 = vector.load %arg5[%c4_141, %c0_142, %c0_143] : memref<7x128x64xbf16, #tpu.memory_space<vmem>>, vector<1x128x64xbf16>
    %163 = vector.shape_cast %162 : vector<1x128x64xbf16> to vector<128x64xbf16>
    %cst_144 = arith.constant dense<0.000000e+00> : vector<10x64xf32>
    %164 = tpu.matmul %161, %163, %cst_144 {dimension_numbers = #tpu.dot_dimension_numbers<[1], [0], [0], [1], [0, 0, 1, 1], [], []>} : vector<10x128xbf16>, vector<128x64xbf16>, vector<10x64xf32> -> vector<10x64xf32>
    %165 = arith.addf %160, %164 : vector<10x64xf32>
    %c5_145 = arith.constant 5 : index
    %c0_146 = arith.constant 0 : index
    %166 = vector.load %arg14[%c5_145, %c0_146] : memref<32x128xbf16, #tpu.memory_space<vmem>>, vector<10x128xbf16>
    %c5_147 = arith.constant 5 : index
    %c0_148 = arith.constant 0 : index
    %c0_149 = arith.constant 0 : index
    %167 = vector.load %arg5[%c5_147, %c0_148, %c0_149] : memref<7x128x64xbf16, #tpu.memory_space<vmem>>, vector<1x128x64xbf16>
    %168 = vector.shape_cast %167 : vector<1x128x64xbf16> to vector<128x64xbf16>
    %cst_150 = arith.constant dense<0.000000e+00> : vector<10x64xf32>
    %169 = tpu.matmul %166, %168, %cst_150 {dimension_numbers = #tpu.dot_dimension_numbers<[1], [0], [0], [1], [0, 0, 1, 1], [], []>} : vector<10x128xbf16>, vector<128x64xbf16>, vector<10x64xf32> -> vector<10x64xf32>
    %170 = arith.addf %165, %169 : vector<10x64xf32>
    %c6_151 = arith.constant 6 : index
    %c0_152 = arith.constant 0 : index
    %171 = vector.load %arg14[%c6_151, %c0_152] : memref<32x128xbf16, #tpu.memory_space<vmem>>, vector<10x128xbf16>
    %c6_153 = arith.constant 6 : index
    %c0_154 = arith.constant 0 : index
    %c0_155 = arith.constant 0 : index
    %172 = vector.load %arg5[%c6_153, %c0_154, %c0_155] : memref<7x128x64xbf16, #tpu.memory_space<vmem>>, vector<1x128x64xbf16>
    %173 = vector.shape_cast %172 : vector<1x128x64xbf16> to vector<128x64xbf16>
    %cst_156 = arith.constant dense<0.000000e+00> : vector<10x64xf32>
    %174 = tpu.matmul %171, %173, %cst_156 {dimension_numbers = #tpu.dot_dimension_numbers<[1], [0], [0], [1], [0, 0, 1, 1], [], []>} : vector<10x128xbf16>, vector<128x64xbf16>, vector<10x64xf32> -> vector<10x64xf32>
    %175 = arith.addf %170, %174 : vector<10x64xf32>
    %c0_157 = arith.constant 0 : index
    %c0_158 = arith.constant 0 : index
    %176 = vector.load %arg6[%c0_157, %c0_158] : memref<1x64xf32, #tpu.memory_space<vmem>>, vector<1x64xf32>
    %177 = vector.broadcast %176 : vector<1x64xf32> to vector<10x64xf32>
    %178 = arith.addf %175, %177 : vector<10x64xf32>
    %cst_159 = arith.constant dense<0.000000e+00> : vector<64xf32>
    %179 = vector.multi_reduction <add>, %178, %cst_159 [0] : vector<10x64xf32> to vector<64xf32>
    %180 = vector.shape_cast %179 : vector<64xf32> to vector<1x64xf32>
    %cst_160 = arith.constant 0.000000e+00 : f32
    %181 = vector.broadcast %cst_160 : f32 to vector<1x64xf32>
    %182 = arith.addf %181, %180 : vector<1x64xf32>
    %183 = arith.mulf %178, %178 : vector<10x64xf32>
    %cst_161 = arith.constant dense<0.000000e+00> : vector<64xf32>
    %184 = vector.multi_reduction <add>, %183, %cst_161 [0] : vector<10x64xf32> to vector<64xf32>
    %185 = vector.shape_cast %184 : vector<64xf32> to vector<1x64xf32>
    %cst_162 = arith.constant 0.000000e+00 : f32
    %186 = vector.broadcast %cst_162 : f32 to vector<1x64xf32>
    %187 = arith.addf %186, %185 : vector<1x64xf32>
    %cst_163 = arith.constant 0.000000e+00 : f32
    %188 = vector.broadcast %cst_163 : f32 to vector<10x64xf32>
    %c16 = arith.constant 16 : index
    %c0_164 = arith.constant 0 : index
    %189 = vector.load %arg14[%c16, %c0_164] : memref<32x128xbf16, #tpu.memory_space<vmem>>, vector<10x128xbf16>
    %c0_165 = arith.constant 0 : index
    %c0_166 = arith.constant 0 : index
    %c0_167 = arith.constant 0 : index
    %190 = vector.load %arg5[%c0_165, %c0_166, %c0_167] : memref<7x128x64xbf16, #tpu.memory_space<vmem>>, vector<1x128x64xbf16>
    %191 = vector.shape_cast %190 : vector<1x128x64xbf16> to vector<128x64xbf16>
    %cst_168 = arith.constant dense<0.000000e+00> : vector<10x64xf32>
    %192 = tpu.matmul %189, %191, %cst_168 {dimension_numbers = #tpu.dot_dimension_numbers<[1], [0], [0], [1], [0, 0, 1, 1], [], []>} : vector<10x128xbf16>, vector<128x64xbf16>, vector<10x64xf32> -> vector<10x64xf32>
    %193 = arith.addf %188, %192 : vector<10x64xf32>
    %c17 = arith.constant 17 : index
    %c0_169 = arith.constant 0 : index
    %194 = vector.load %arg14[%c17, %c0_169] : memref<32x128xbf16, #tpu.memory_space<vmem>>, vector<10x128xbf16>
    %c1_170 = arith.constant 1 : index
    %c0_171 = arith.constant 0 : index
    %c0_172 = arith.constant 0 : index
    %195 = vector.load %arg5[%c1_170, %c0_171, %c0_172] : memref<7x128x64xbf16, #tpu.memory_space<vmem>>, vector<1x128x64xbf16>
    %196 = vector.shape_cast %195 : vector<1x128x64xbf16> to vector<128x64xbf16>
    %cst_173 = arith.constant dense<0.000000e+00> : vector<10x64xf32>
    %197 = tpu.matmul %194, %196, %cst_173 {dimension_numbers = #tpu.dot_dimension_numbers<[1], [0], [0], [1], [0, 0, 1, 1], [], []>} : vector<10x128xbf16>, vector<128x64xbf16>, vector<10x64xf32> -> vector<10x64xf32>
    %198 = arith.addf %193, %197 : vector<10x64xf32>
    %c18 = arith.constant 18 : index
    %c0_174 = arith.constant 0 : index
    %199 = vector.load %arg14[%c18, %c0_174] : memref<32x128xbf16, #tpu.memory_space<vmem>>, vector<10x128xbf16>
    %c2_175 = arith.constant 2 : index
    %c0_176 = arith.constant 0 : index
    %c0_177 = arith.constant 0 : index
    %200 = vector.load %arg5[%c2_175, %c0_176, %c0_177] : memref<7x128x64xbf16, #tpu.memory_space<vmem>>, vector<1x128x64xbf16>
    %201 = vector.shape_cast %200 : vector<1x128x64xbf16> to vector<128x64xbf16>
    %cst_178 = arith.constant dense<0.000000e+00> : vector<10x64xf32>
    %202 = tpu.matmul %199, %201, %cst_178 {dimension_numbers = #tpu.dot_dimension_numbers<[1], [0], [0], [1], [0, 0, 1, 1], [], []>} : vector<10x128xbf16>, vector<128x64xbf16>, vector<10x64xf32> -> vector<10x64xf32>
    %203 = arith.addf %198, %202 : vector<10x64xf32>
    %c19 = arith.constant 19 : index
    %c0_179 = arith.constant 0 : index
    %204 = vector.load %arg14[%c19, %c0_179] : memref<32x128xbf16, #tpu.memory_space<vmem>>, vector<10x128xbf16>
    %c3_180 = arith.constant 3 : index
    %c0_181 = arith.constant 0 : index
    %c0_182 = arith.constant 0 : index
    %205 = vector.load %arg5[%c3_180, %c0_181, %c0_182] : memref<7x128x64xbf16, #tpu.memory_space<vmem>>, vector<1x128x64xbf16>
    %206 = vector.shape_cast %205 : vector<1x128x64xbf16> to vector<128x64xbf16>
    %cst_183 = arith.constant dense<0.000000e+00> : vector<10x64xf32>
    %207 = tpu.matmul %204, %206, %cst_183 {dimension_numbers = #tpu.dot_dimension_numbers<[1], [0], [0], [1], [0, 0, 1, 1], [], []>} : vector<10x128xbf16>, vector<128x64xbf16>, vector<10x64xf32> -> vector<10x64xf32>
    %208 = arith.addf %203, %207 : vector<10x64xf32>
    %c20 = arith.constant 20 : index
    %c0_184 = arith.constant 0 : index
    %209 = vector.load %arg14[%c20, %c0_184] : memref<32x128xbf16, #tpu.memory_space<vmem>>, vector<10x128xbf16>
    %c4_185 = arith.constant 4 : index
    %c0_186 = arith.constant 0 : index
    %c0_187 = arith.constant 0 : index
    %210 = vector.load %arg5[%c4_185, %c0_186, %c0_187] : memref<7x128x64xbf16, #tpu.memory_space<vmem>>, vector<1x128x64xbf16>
    %211 = vector.shape_cast %210 : vector<1x128x64xbf16> to vector<128x64xbf16>
    %cst_188 = arith.constant dense<0.000000e+00> : vector<10x64xf32>
    %212 = tpu.matmul %209, %211, %cst_188 {dimension_numbers = #tpu.dot_dimension_numbers<[1], [0], [0], [1], [0, 0, 1, 1], [], []>} : vector<10x128xbf16>, vector<128x64xbf16>, vector<10x64xf32> -> vector<10x64xf32>
    %213 = arith.addf %208, %212 : vector<10x64xf32>
    %c21 = arith.constant 21 : index
    %c0_189 = arith.constant 0 : index
    %214 = vector.load %arg14[%c21, %c0_189] : memref<32x128xbf16, #tpu.memory_space<vmem>>, vector<10x128xbf16>
    %c5_190 = arith.constant 5 : index
    %c0_191 = arith.constant 0 : index
    %c0_192 = arith.constant 0 : index
    %215 = vector.load %arg5[%c5_190, %c0_191, %c0_192] : memref<7x128x64xbf16, #tpu.memory_space<vmem>>, vector<1x128x64xbf16>
    %216 = vector.shape_cast %215 : vector<1x128x64xbf16> to vector<128x64xbf16>
    %cst_193 = arith.constant dense<0.000000e+00> : vector<10x64xf32>
    %217 = tpu.matmul %214, %216, %cst_193 {dimension_numbers = #tpu.dot_dimension_numbers<[1], [0], [0], [1], [0, 0, 1, 1], [], []>} : vector<10x128xbf16>, vector<128x64xbf16>, vector<10x64xf32> -> vector<10x64xf32>
    %218 = arith.addf %213, %217 : vector<10x64xf32>
    %c22 = arith.constant 22 : index
    %c0_194 = arith.constant 0 : index
    %219 = vector.load %arg14[%c22, %c0_194] : memref<32x128xbf16, #tpu.memory_space<vmem>>, vector<10x128xbf16>
    %c6_195 = arith.constant 6 : index
    %c0_196 = arith.constant 0 : index
    %c0_197 = arith.constant 0 : index
    %220 = vector.load %arg5[%c6_195, %c0_196, %c0_197] : memref<7x128x64xbf16, #tpu.memory_space<vmem>>, vector<1x128x64xbf16>
    %221 = vector.shape_cast %220 : vector<1x128x64xbf16> to vector<128x64xbf16>
    %cst_198 = arith.constant dense<0.000000e+00> : vector<10x64xf32>
    %222 = tpu.matmul %219, %221, %cst_198 {dimension_numbers = #tpu.dot_dimension_numbers<[1], [0], [0], [1], [0, 0, 1, 1], [], []>} : vector<10x128xbf16>, vector<128x64xbf16>, vector<10x64xf32> -> vector<10x64xf32>
    %223 = arith.addf %218, %222 : vector<10x64xf32>
    %c0_199 = arith.constant 0 : index
    %c0_200 = arith.constant 0 : index
    %224 = vector.load %arg6[%c0_199, %c0_200] : memref<1x64xf32, #tpu.memory_space<vmem>>, vector<1x64xf32>
    %225 = vector.broadcast %224 : vector<1x64xf32> to vector<10x64xf32>
    %226 = arith.addf %223, %225 : vector<10x64xf32>
    %cst_201 = arith.constant dense<0.000000e+00> : vector<64xf32>
    %227 = vector.multi_reduction <add>, %226, %cst_201 [0] : vector<10x64xf32> to vector<64xf32>
    %228 = vector.shape_cast %227 : vector<64xf32> to vector<1x64xf32>
    %229 = arith.addf %182, %228 : vector<1x64xf32>
    %230 = arith.mulf %226, %226 : vector<10x64xf32>
    %cst_202 = arith.constant dense<0.000000e+00> : vector<64xf32>
    %231 = vector.multi_reduction <add>, %230, %cst_202 [0] : vector<10x64xf32> to vector<64xf32>
    %232 = vector.shape_cast %231 : vector<64xf32> to vector<1x64xf32>
    %233 = arith.addf %187, %232 : vector<1x64xf32>
    %cst_203 = arith.constant 5.000000e-02 : f32
    %234 = vector.broadcast %cst_203 : f32 to vector<1x64xf32>
    %235 = arith.mulf %229, %234 : vector<1x64xf32>
    %cst_204 = arith.constant 5.000000e-02 : f32
    %236 = vector.broadcast %cst_204 : f32 to vector<1x64xf32>
    %237 = arith.mulf %233, %236 : vector<1x64xf32>
    %238 = arith.mulf %235, %235 : vector<1x64xf32>
    %239 = arith.subf %237, %238 : vector<1x64xf32>
    %cst_205 = arith.constant 0.000000e+00 : f32
    %240 = vector.broadcast %cst_205 : f32 to vector<1x64xf32>
    %241 = arith.maximumf %239, %240 : vector<1x64xf32>
    %c0_206 = arith.constant 0 : index
    %c0_207 = arith.constant 0 : index
    %242 = vector.load %arg7[%c0_206, %c0_207] : memref<1x64xf32, #tpu.memory_space<vmem>>, vector<1x64xf32>
    %cst_208 = arith.constant 9.99999974E-6 : f32
    %243 = vector.broadcast %cst_208 : f32 to vector<1x64xf32>
    %244 = arith.addf %241, %243 : vector<1x64xf32>
    %245 = math.rsqrt %244 : vector<1x64xf32>
    %246 = arith.mulf %242, %245 : vector<1x64xf32>
    %c0_209 = arith.constant 0 : index
    %c0_210 = arith.constant 0 : index
    %247 = vector.load %arg8[%c0_209, %c0_210] : memref<1x64xf32, #tpu.memory_space<vmem>>, vector<1x64xf32>
    %248 = arith.mulf %235, %246 : vector<1x64xf32>
    %249 = arith.subf %247, %248 : vector<1x64xf32>
    %250 = vector.broadcast %246 : vector<1x64xf32> to vector<10x64xf32>
    %251 = arith.mulf %178, %250 : vector<10x64xf32>
    %252 = vector.broadcast %249 : vector<1x64xf32> to vector<10x64xf32>
    %253 = arith.addf %251, %252 : vector<10x64xf32>
    %cst_211 = arith.constant 0.000000e+00 : f32
    %254 = vector.broadcast %cst_211 : f32 to vector<10x64xf32>
    %255 = arith.maximumf %253, %254 : vector<10x64xf32>
    %c0_212 = arith.constant 0 : index
    %c0_213 = arith.constant 0 : index
    %256 = vector.load %arg13[%c0_212, %c0_213] : memref<24x64xf32, #tpu.memory_space<vmem>>, vector<10x64xf32>
    tpu.vector_store %arg13[%c0_212, %c0_213], %255 {strides = array<i32>} : memref<24x64xf32, #tpu.memory_space<vmem>>, vector<10x64xf32>,
    %257 = vector.broadcast %246 : vector<1x64xf32> to vector<10x64xf32>
    %258 = arith.mulf %226, %257 : vector<10x64xf32>
    %259 = vector.broadcast %249 : vector<1x64xf32> to vector<10x64xf32>
    %260 = arith.addf %258, %259 : vector<10x64xf32>
    %cst_214 = arith.constant 0.000000e+00 : f32
    %261 = vector.broadcast %cst_214 : f32 to vector<10x64xf32>
    %262 = arith.maximumf %260, %261 : vector<10x64xf32>
    %c12 = arith.constant 12 : index
    %c0_215 = arith.constant 0 : index
    %263 = vector.load %arg13[%c12, %c0_215] : memref<24x64xf32, #tpu.memory_space<vmem>>, vector<10x64xf32>
    tpu.vector_store %arg13[%c12, %c0_215], %262 {strides = array<i32>} : memref<24x64xf32, #tpu.memory_space<vmem>>, vector<10x64xf32>,
    %c0_216 = arith.constant 0 : index
    %c0_217 = arith.constant 0 : index
    %264 = tpu.strided_load %arg13[%c0_216, %c0_217] {strides = array<i32: 4, 1>} : memref<24x64xf32, #tpu.memory_space<vmem>>, vector<6x64xf32>
    %265 = arith.truncf %264 : vector<6x64xf32> to vector<6x64xbf16>
    %c0_218 = arith.constant 0 : index
    %c0_219 = arith.constant 0 : index
    %266 = vector.load %arg15[%c0_218, %c0_219] : memref<6x256xbf16, #tpu.memory_space<vmem>>, vector<6x64xbf16>
    tpu.vector_store %arg15[%c0_218, %c0_219], %265 {strides = array<i32>} : memref<6x256xbf16, #tpu.memory_space<vmem>>, vector<6x64xbf16>,
    %c1_220 = arith.constant 1 : index
    %c0_221 = arith.constant 0 : index
    %267 = tpu.strided_load %arg13[%c1_220, %c0_221] {strides = array<i32: 4, 1>} : memref<24x64xf32, #tpu.memory_space<vmem>>, vector<6x64xf32>
    %268 = arith.truncf %267 : vector<6x64xf32> to vector<6x64xbf16>
    %c0_222 = arith.constant 0 : index
    %c64_223 = arith.constant 64 : index
    %269 = vector.load %arg15[%c0_222, %c64_223] : memref<6x256xbf16, #tpu.memory_space<vmem>>, vector<6x64xbf16>
    tpu.vector_store %arg15[%c0_222, %c64_223], %268 {strides = array<i32>} : memref<6x256xbf16, #tpu.memory_space<vmem>>, vector<6x64xbf16>,
    %c2_224 = arith.constant 2 : index
    %c0_225 = arith.constant 0 : index
    %270 = tpu.strided_load %arg13[%c2_224, %c0_225] {strides = array<i32: 4, 1>} : memref<24x64xf32, #tpu.memory_space<vmem>>, vector<6x64xf32>
    %271 = arith.truncf %270 : vector<6x64xf32> to vector<6x64xbf16>
    %c0_226 = arith.constant 0 : index
    %c128 = arith.constant 128 : index
    %272 = vector.load %arg15[%c0_226, %c128] : memref<6x256xbf16, #tpu.memory_space<vmem>>, vector<6x64xbf16>
    tpu.vector_store %arg15[%c0_226, %c128], %271 {strides = array<i32>} : memref<6x256xbf16, #tpu.memory_space<vmem>>, vector<6x64xbf16>,
    %c3_227 = arith.constant 3 : index
    %c0_228 = arith.constant 0 : index
    %273 = tpu.strided_load %arg13[%c3_227, %c0_228] {strides = array<i32: 4, 1>} : memref<24x64xf32, #tpu.memory_space<vmem>>, vector<6x64xf32>
    %274 = arith.truncf %273 : vector<6x64xf32> to vector<6x64xbf16>
    %c0_229 = arith.constant 0 : index
    %c192 = arith.constant 192 : index
    %275 = vector.load %arg15[%c0_229, %c192] : memref<6x256xbf16, #tpu.memory_space<vmem>>, vector<6x64xbf16>
    tpu.vector_store %arg15[%c0_229, %c192], %274 {strides = array<i32>} : memref<6x256xbf16, #tpu.memory_space<vmem>>, vector<6x64xbf16>,
    %cst_230 = arith.constant 0.000000e+00 : f32
    %276 = vector.broadcast %cst_230 : f32 to vector<1x128xf32>
    %c0_231 = arith.constant 0 : index
    %c0_232 = arith.constant 0 : index
    %277 = vector.load %arg15[%c0_231, %c0_232] : memref<6x256xbf16, #tpu.memory_space<vmem>>, vector<1x256xbf16>
    %c0_233 = arith.constant 0 : index
    %c0_234 = arith.constant 0 : index
    %c0_235 = arith.constant 0 : index
    %278 = vector.load %arg9[%c0_233, %c0_234, %c0_235] : memref<2x256x128xbf16, #tpu.memory_space<vmem>>, vector<1x256x128xbf16>
    %279 = vector.shape_cast %278 : vector<1x256x128xbf16> to vector<256x128xbf16>
    %cst_236 = arith.constant dense<0.000000e+00> : vector<1x128xf32>
    %280 = tpu.matmul %277, %279, %cst_236 {dimension_numbers = #tpu.dot_dimension_numbers<[1], [0], [0], [1], [0, 0, 1, 1], [], []>} : vector<1x256xbf16>, vector<256x128xbf16>, vector<1x128xf32> -> vector<1x128xf32>
    %281 = arith.addf %276, %280 : vector<1x128xf32>
    %c1_237 = arith.constant 1 : index
    %c0_238 = arith.constant 0 : index
    %282 = vector.load %arg15[%c1_237, %c0_238] : memref<6x256xbf16, #tpu.memory_space<vmem>>, vector<1x256xbf16>
    %c1_239 = arith.constant 1 : index
    %c0_240 = arith.constant 0 : index
    %c0_241 = arith.constant 0 : index
    %283 = vector.load %arg9[%c1_239, %c0_240, %c0_241] : memref<2x256x128xbf16, #tpu.memory_space<vmem>>, vector<1x256x128xbf16>
    %284 = vector.shape_cast %283 : vector<1x256x128xbf16> to vector<256x128xbf16>
    %cst_242 = arith.constant dense<0.000000e+00> : vector<1x128xf32>
    %285 = tpu.matmul %282, %284, %cst_242 {dimension_numbers = #tpu.dot_dimension_numbers<[1], [0], [0], [1], [0, 0, 1, 1], [], []>} : vector<1x256xbf16>, vector<256x128xbf16>, vector<1x128xf32> -> vector<1x128xf32>
    %286 = arith.addf %281, %285 : vector<1x128xf32>
    %c0_243 = arith.constant 0 : index
    %c0_244 = arith.constant 0 : index
    %287 = vector.load %arg10[%c0_243, %c0_244] : memref<1x128xf32, #tpu.memory_space<vmem>>, vector<1x128xf32>
    %288 = arith.addf %286, %287 : vector<1x128xf32>
    %289 = arith.negf %288 : vector<1x128xf32>
    %290 = math.exp %289 : vector<1x128xf32>
    %cst_245 = arith.constant 1.000000e+00 : f32
    %291 = vector.broadcast %cst_245 : f32 to vector<1x128xf32>
    %292 = arith.addf %291, %290 : vector<1x128xf32>
    %293 = arith.divf %291, %292 : vector<1x128xf32>
    %c0_246 = arith.constant 0 : index
    %c0_247 = arith.constant 0 : index
    %294 = vector.load %arg11[%c0_246, %c0_247] : memref<2x128xf32, #tpu.memory_space<vmem>>, vector<1x128xf32>
    tpu.vector_store %arg11[%c0_246, %c0_247], %293 {strides = array<i32>} : memref<2x128xf32, #tpu.memory_space<vmem>>, vector<1x128xf32>,
    %cst_248 = arith.constant 0.000000e+00 : f32
    %295 = vector.broadcast %cst_248 : f32 to vector<1x128xf32>
    %c3_249 = arith.constant 3 : index
    %c0_250 = arith.constant 0 : index
    %296 = vector.load %arg15[%c3_249, %c0_250] : memref<6x256xbf16, #tpu.memory_space<vmem>>, vector<1x256xbf16>
    %c0_251 = arith.constant 0 : index
    %c0_252 = arith.constant 0 : index
    %c0_253 = arith.constant 0 : index
    %297 = vector.load %arg9[%c0_251, %c0_252, %c0_253] : memref<2x256x128xbf16, #tpu.memory_space<vmem>>, vector<1x256x128xbf16>
    %298 = vector.shape_cast %297 : vector<1x256x128xbf16> to vector<256x128xbf16>
    %cst_254 = arith.constant dense<0.000000e+00> : vector<1x128xf32>
    %299 = tpu.matmul %296, %298, %cst_254 {dimension_numbers = #tpu.dot_dimension_numbers<[1], [0], [0], [1], [0, 0, 1, 1], [], []>} : vector<1x256xbf16>, vector<256x128xbf16>, vector<1x128xf32> -> vector<1x128xf32>
    %300 = arith.addf %295, %299 : vector<1x128xf32>
    %c4_255 = arith.constant 4 : index
    %c0_256 = arith.constant 0 : index
    %301 = vector.load %arg15[%c4_255, %c0_256] : memref<6x256xbf16, #tpu.memory_space<vmem>>, vector<1x256xbf16>
    %c1_257 = arith.constant 1 : index
    %c0_258 = arith.constant 0 : index
    %c0_259 = arith.constant 0 : index
    %302 = vector.load %arg9[%c1_257, %c0_258, %c0_259] : memref<2x256x128xbf16, #tpu.memory_space<vmem>>, vector<1x256x128xbf16>
    %303 = vector.shape_cast %302 : vector<1x256x128xbf16> to vector<256x128xbf16>
    %cst_260 = arith.constant dense<0.000000e+00> : vector<1x128xf32>
    %304 = tpu.matmul %301, %303, %cst_260 {dimension_numbers = #tpu.dot_dimension_numbers<[1], [0], [0], [1], [0, 0, 1, 1], [], []>} : vector<1x256xbf16>, vector<256x128xbf16>, vector<1x128xf32> -> vector<1x128xf32>
    %305 = arith.addf %300, %304 : vector<1x128xf32>
    %c0_261 = arith.constant 0 : index
    %c0_262 = arith.constant 0 : index
    %306 = vector.load %arg10[%c0_261, %c0_262] : memref<1x128xf32, #tpu.memory_space<vmem>>, vector<1x128xf32>
    %307 = arith.addf %305, %306 : vector<1x128xf32>
    %308 = arith.negf %307 : vector<1x128xf32>
    %309 = math.exp %308 : vector<1x128xf32>
    %cst_263 = arith.constant 1.000000e+00 : f32
    %310 = vector.broadcast %cst_263 : f32 to vector<1x128xf32>
    %311 = arith.addf %310, %309 : vector<1x128xf32>
    %312 = arith.divf %310, %311 : vector<1x128xf32>
    %c1_264 = arith.constant 1 : index
    %c0_265 = arith.constant 0 : index
    %313 = vector.load %arg11[%c1_264, %c0_265] : memref<2x128xf32, #tpu.memory_space<vmem>>, vector<1x128xf32>
    tpu.vector_store %arg11[%c1_264, %c0_265], %312 {strides = array<i32>} : memref<2x128xf32, #tpu.memory_space<vmem>>, vector<1x128xf32>,
    return
  }
}

</mosaic_0001>

<bundles_post_ra>
// kernel: discriminator_forward.1
= control target key start
LH: loop header
LB: loop body
LE: loop exit
PB: predicated region body
PF: predicated region fallthrough
CT: control target
= control target key end

     0   :  { %vm93_vm0 = vsmask.f32 7424  ;;  %vm39_vm1 = vcmask 261120   ;;  %vm314_vm2 = vsmask.f32 6400  ;;  %vm240_vm3 = vcmask 1046528   ;;  %s5555_s1 = inlined_call_operand.vmem [shape: bf16[7,32,32], index: 1, kind: input, shape index: {}]   ;;  %s5556_s0 = inlined_call_operand.vmem [shape: bf16[130,32], index: 0, kind: input, shape index: {}]   ;;  %s5557_s2 = inlined_call_operand.vmem [shape: f32[1,32], index: 2, kind: input, shape index: {}]   ;;  %s5558_s3 = inlined_call_operand.vmem [shape: f32[1,32], index: 3, kind: input, shape index: {}]   ;;  %s5559_s4 = inlined_call_operand.vmem [shape: f32[1,32], index: 4, kind: input, shape index: {}]   ;;  %s5560_s5 = inlined_call_operand.vmem [shape: bf16[7,128,64], index: 5, kind: input, shape index: {}]   ;;  %s5561_s6 = inlined_call_operand.vmem [shape: f32[1,64], index: 6, kind: input, shape index: {}]   ;;  %s5562_s9 = inlined_call_operand.vmem [shape: bf16[2,256,128], index: 9, kind: input, shape index: {}]   ;;  %s5563_s7 = inlined_call_operand.vmem [shape: f32[1,64], index: 7, kind: input, shape index: {}]   ;;  %s5564_s8 = inlined_call_operand.vmem [shape: f32[1,64], index: 8, kind: input, shape index: {}]   ;;  %s5565_s10 = inlined_call_operand.vmem [shape: f32[1,128], index: 10, kind: input, shape index: {}]   ;;  %s5566_s11 = inlined_call_operand.vmem [shape: f32[2,128], index: 11, kind: output, shape index: {}]  }
   0x1   :  { %v4027_v0 = vld [vmem:[%s5555_s1 + $0x18] sm:$0xff]  ;;  %v4269_v1 = vld [vmem:[%s5555_s1 + $0x8] sm:$0xff]  ;;  %v4274_v2 = vld [vmem:[%s5555_s1 + $0x10] sm:$0xff]  ;;  %vm414_vm4 = vcmask 1045504   ;;  %vm488_vm5 = vsmask.f32 5376 }
   0x2   :  { %v4279_v3 = vld [vmem:[%s5556_s0] sm:$0xff]   ;;  %v4284_v4 = vld [vmem:[%s5556_s0 + $0x8] sm:$0xff]  ;;  %155 = vmatpush.bf16.msra.mxu0 %v4027_v0  ;;  %204 = vmatpush.bf16.msra.mxu1 %v4269_v1  ;;  %v4297_v8 = vld [vmem:[%s5556_s0 + $0x18] sm:$0xff]   ;;  %vm612_vm6 = vcmask 1044480   ;;  %vm1206_vm7 = vsmask.f32 4352 }
   0x3   :  { %v4290_v5 = vld [vmem:[%s5555_s1] sm:$0xff]  ;;  %v95_v6 = vshrl.u32 %v4279_v3, 16  ;;  %v97_v7 = vshll.u32 %v4279_v3, 16  ;;  %v63_v9 = vld [vmem:[%s5556_s0 + $0x1c] sm:$0x3]  ;;  %4177 = vmatpush.bf16.msra.mxu2 %v4027_v0  ;;  %4179 = vmatpush.bf16.msra.mxu3 %v4269_v1  ;;  %v4304_v10 = vshll.u32 %v4284_v4, 16  ;;  %v87_v11 = vunpack.c.l.b16 %v4297_v8 }
   0x4   :  { %v88_v12 = vunpack.c.l.b16 %v63_v9  ;;  %v4029_v14 = vld [vmem:[%s5555_s1 + $0x28] sm:$0xff]  ;;  %v4313_v15 = vld [vmem:[%s5555_s1 + $0x38] sm:$0xff]  ;;  %v4171_v16 = vunpack.c.h.b16 %v4279_v3  ;;  %v227_v19 = vld [vmem:[%s5556_s0] sm:$0xe]  ;;  %v4359_v35 = vshrl.u32 %v4284_v4, 16  ;;  %v242_v49 = vrot.slane %v4284_v4, 1 }
   0x5   :  { %v99_v13 = vrot.slane %v97_v7, 1  ;;  %v104_v17 = vrot.slane %v4304_v10, 1  ;;  %v4033_v21 = vld [vmem:[%s5555_s1 + $0x48] sm:$0xff]  ;;  %v236_v22 = vunpack.c.l.b16 %v227_v19  ;;  %v4332_v25 = vld [vmem:[%s5555_s1 + $0x58] sm:$0xff]  ;;  %v4028_v27 = vld [vmem:[%s5555_s1 + $0x20] sm:$0xff]  ;;  %v324_v42 = vrot.slane %v4304_v10, 2 }
   0x6   :  { %v92_v18 = vpack.c.b16 %v88_v12, %v87_v11  ;;  %156 = vmatpush.bf16.msra.mxu0 %v4274_v2  ;;  %205 = vmatpush.bf16.msra.mxu1 %v4290_v5  ;;  %v4342_v28 = vld [vmem:[%s5555_s1 + $0x30] sm:$0xff]  ;;  %v4032_v36 = vld [vmem:[%s5555_s1 + $0x40] sm:$0xff]  ;;  %v323_v41 = vrot.slane %v4359_v35, 1  ;;  %v4041_v53 = vld [vmem:[%s5555_s1 + $0x68] sm:$0xff]  ;;  %vm708_vm8 = vcmask 256000   ;;  %s4201_s23 = smov 64  }
   0x7   :  { %v100_v20 = vor.u32 %v99_v13, %v95_v6  ;;  %4178 = vmatpush.bf16.msra.mxu2 %v4274_v2  ;;  %4180 = vmatpush.bf16.msra.mxu3 %v4290_v5  ;;  %v238_v29 = vpack.c.b16 %v4171_v16, %v236_v22  ;;  %v4353_v31 = vld [vmem:[%s5556_s0 + $0x10] sm:$0xff]  ;;  %v108_v43 = vor.u32 %v4359_v35, %v104_v17  ;;  %v401_v56 = vld [vmem:[%s5556_s0] sm:$0xc]  ;;  %v228_v57 = vld [vmem:[%s5556_s0 + $0x1c] sm:$0x7]  ;;  %vm1462_vm12 = vcmask 257024  }
   0x8   :  { %v118_v23 = vshll.u32 %v92_v18, 16  ;;  %v122_v24 = vshrl.u32 %v92_v18, 16  ;;  %v4367_v37 = vld [vmem:[%s5555_s1 + $0x50] sm:$0xff]  ;;  %v4370_v38 = vshll.u32 %v4353_v31, 16  ;;  %v325_v46 = vor.u32 %v324_v42, %v323_v41  ;;  %v4036_v41 = vld [vmem:[%s5556_s0] sm:$0xf0] }
   0x9   :  { %v105_v26 = vsel %vm93_vm0, %v100_v20, %v104_v17  ;;  %3228 = vmatmul.msk.bf16.vlgmr.msra.gmra.mxu1 %vm39_vm1, %v4279_v3  ;;  %v316_v33 = vshrl.u32 %v238_v29, 16  ;;  %v319_v34 = vshll.u32 %v238_v29, 16  ;;  %v241_v48 = vrot.slane %v238_v29, 1  ;;  %v4040_v3 = vld [vmem:[%s5555_s1 + $0x60] sm:$0xff]  ;;  %v4459_v42 = vld [vmem:[%s5556_s0 + $0x28] sm:$0xff]  ;;  %s4202_s24 = smov 32  }
   0xa   :  { %3216 = vmatmul.msk.bf16.vlgmr.msra.gmra.mxu0 %vm39_vm1, %v105_v26  ;;  %v120_v30 = vrot.slane %v118_v23, 1  ;;  %3231 = vmatmul.msk.bf16.vlgmr.msra.gmra.mxu3 %vm39_vm1, %v92_v18  ;;  %v112_v44 = vrot.slane %v4370_v38, 1  ;;  %v114_v52 = vshrl.u32 %v4353_v31, 16  ;;  %v328_v55 = vrot.slane %v4370_v38, 2 }
   0xb   :  { %278 = vmatpush.bf16.msrb.mxu2 %v4029_v14  ;;  %370 = vmatpush.bf16.msrb.mxu3 %v4313_v15  ;;  %v318_v39 = vrot.slane %v316_v33, 1  ;;  %v321_v40 = vrot.slane %v319_v34, 2  ;;  %v243_v51 = vsel %vm240_vm3, %v241_v48, %v242_v49  ;;  %v410_v59 = vunpack.c.l.b16 %v401_v56  ;;  %v756_v34 = vld [vmem:[%s5556_s0 + $0x20] sm:$0xe]  ;;  %v4038_v56 = vld [vmem:[%s5556_s0 + $0x10] sm:$0xff] }
   0xc   :  { %452 = vmatpush.bf16.msrb.mxu0 %v4033_v21  ;;  %v124_v32 = vor.u32 %v122_v24, %v120_v30  ;;  %544 = vmatpush.bf16.msrb.mxu1 %v4332_v25  ;;  %v113_v47 = vsel %vm93_vm0, %v108_v43, %v112_v44  ;;  %v327_v54 = vrot.slane %v114_v52, 1  ;;  %v116_v58 = vor.u32 %v114_v52, %v112_v44 }
   0xd   :  { %v322_v45 = vor.u32 %v321_v40, %v318_v39  ;;  %v237_v61 = vunpack.c.l.b16 %v228_v57  ;;  %v244_v63 = vrot.slane %v4353_v31, 1  ;;  %v416_v20 = vrot.slane %v4284_v4, 2  ;;  %v3302_v40 = vld [vmem:[%s5556_s0] sm:$0x8] }
   0xe   :  { %3219 = vmatmul.msk.bf16.vlgmr.msra.gmra.mxu2 %vm39_vm1, %v124_v32  ;;  %v329_v60 = vor.u32 %v328_v55, %v327_v54  ;;  %v121_v62 = vsel %vm93_vm0, %v116_v58, %v120_v30  ;;  %v418_v29 = vrot.slane %v4353_v31, 2  ;;  %v420_v44 = vrot.slane %v4297_v8, 2  ;;  %v4479_v55 = vld [vmem:[%s5556_s0 + $0x30] sm:$0xff] }
   0xf   :  { %279 = vmatpush.bf16.msrb.mxu2 %v4028_v27  ;;  %371 = vmatpush.bf16.msrb.mxu3 %v4342_v28  ;;  %v326_v50 = vsel %vm314_vm2, %v322_v45, %v325_v46  ;;  %v781_v57 = vrot.slane %v4479_v55, 1  ;;  %v616_v58 = vrot.slane %v4038_v56, 3  ;;  %vm1495_vm13 = vcmask 519424  }
  0x10   :  { %453 = vmatpush.bf16.msrb.mxu0 %v4032_v36  ;;  %545 = vmatpush.bf16.msrb.mxu1 %v4367_v37  ;;  %v419_v32 = vsel %vm414_vm4, %v416_v20, %v418_v29  ;;  %vm1528_vm14 = vcmask 781824   ;;  %vm1561_vm15 = vcmask 1044224  }
  0x13   :  { %803 = vmatpush.bf16.msra.mxu3 %v4027_v0  ;;  %652 = vmatpush.bf16.msra.mxu2 %v4041_v53  ;;  %v412_v0 = vpack.c.b16 %v4171_v16, %v410_v59  ;;  %v498_v16 = vrot.slane %v4304_v10, 3 }
  0x14   :  { %881 = vmatpush.bf16.msra.mxu0 %v4269_v1  ;;  %947 = vmatpush.bf16.msra.mxu1 %v4029_v14  ;;  %v330_v1 = vsel %vm314_vm2, %v325_v46, %v329_v60  ;;  %v497_v14 = vrot.slane %v4359_v35, 2  ;;  %v509_v35 = vshll.u32 %v4297_v8, 16  ;;  %v4037_v46 = vld [vmem:[%s5556_s0 + $0x8] sm:$0xff] }
  0x15   :  { %v490_v6 = vshrl.u32 %v412_v0, 16  ;;  %v493_v7 = vshll.u32 %v412_v0, 16  ;;  %v415_v19 = vrot.slane %v412_v0, 2  ;;  %v4500_v0 = vshll.u32 %v4459_v42, 16 }
  0x16   :  { %v499_v22 = vor.u32 %v498_v16, %v497_v14  ;;  %v511_v39 = vrot.slane %v509_v35, 3 }
  0x17   :  { %804 = vmatpush.bf16.msra.mxu3 %v4274_v2  ;;  %v239_v2 = vpack.c.b16 %v237_v61, %v87_v11  ;;  %v492_v11 = vrot.slane %v490_v6, 2  ;;  %v495_v13 = vrot.slane %v493_v7, 3  ;;  %653 = vmatpush.bf16.msra.mxu2 %v4040_v3  ;;  %v417_v24 = vsel %vm414_vm4, %v415_v19, %v416_v20  ;;  %v757_v61 = vld [vmem:[%s5556_s0 + $0x3c] sm:$0x7] }
  0x18   :  { %882 = vmatpush.bf16.msra.mxu0 %v4290_v5  ;;  %948 = vmatpush.bf16.msra.mxu1 %v4028_v27  ;;  %v245_v5 = vsel %vm240_vm3, %v242_v49, %v244_v63  ;;  %v779_v49 = vrot.slane %v4459_v42, 1  ;;  %v773_v7 = vunpack.c.l.b16 %v757_v61  ;;  %v913_v14 = vrot.slane %v4500_v0, 2 }
  0x19   :  { %3229 = vmatmul.msk.bf16.gmra.mxu1 %vm39_vm1, %v4284_v4  ;;  %v332_v9 = vshrl.u32 %v239_v2, 16  ;;  %v335_v12 = vshll.u32 %v239_v2, 16  ;;  %v246_v10 = vrot.slane %v239_v2, 1 }
  0x1a   :  { %3217 = vmatmul.msk.bf16.gmra.mxu0 %vm39_vm1, %v113_v47  ;;  %3260 = vmatmul.msk.bf16.vlgmr.msrb.gmra.mxu3 %vm39_vm1, %v326_v50  ;;  %v3303_v47 = vor.u32 %v4036_v41, %v3302_v40  ;;  %v421_v50 = vsel %vm414_vm4, %v418_v29, %v420_v44  ;;  %v782_v59 = vsel %vm240_vm3, %v779_v49, %v781_v57 }
  0x1b   :  { %1085 = vmatpush.bf16.msrb.mxu3 %v4033_v21  ;;  %v334_v17 = vrot.slane %v332_v9, 1  ;;  %v337_v18 = vrot.slane %v335_v12, 2  ;;  %v496_v21 = vor.u32 %v495_v13, %v492_v11  ;;  %v247_v4 = vsel %vm240_vm3, %v244_v63, %v246_v10 }
  0x1d   :  { %v338_v23 = vor.u32 %v337_v18, %v334_v17  ;;  %v500_v26 = vsel %vm488_vm5, %v496_v21, %v499_v22  ;;  %v842_v18 = vrot.slane %v4500_v0, 1  ;;  %v4039_v21 = vld [vmem:[%s5556_s0 + $0x18] sm:$0xff] }
  0x1e   :  { %3244 = vmatmul.msk.bf16.vlgmr.msrb.gmra.mxu2 %vm39_vm1, %v243_v51 }
  0x1f   :  { %1086 = vmatpush.bf16.msrb.mxu3 %v4032_v36  ;;  %1011 = vmatpush.bf16.msrb.mxu2 %v4313_v15  ;;  %v339_v27 = vsel %vm314_vm2, %v329_v60, %v338_v23  ;;  %v501_v15 = vrot.slane %v114_v52, 2  ;;  %v613_v52 = vrot.slane %v3303_v47, 3  ;;  %v4489_v60 = vld [vmem:[%s5556_s0 + $0x38] sm:$0xff]  }
  0x20   :  { %v772_v6 = vunpack.c.l.b16 %v4489_v60 }
  0x22   :  { %v777_v16 = vpack.c.b16 %v773_v7, %v772_v6 }
  0x23   :  { %1012 = vmatpush.bf16.msrb.mxu2 %v4342_v28  ;;  %v502_v28 = vrot.slane %v4370_v38, 3 }
  0x25   :  { %v503_v30 = vor.u32 %v502_v28, %v501_v15  ;;  %v4525_v15 = vshrl.u32 %v4479_v55, 16  ;;  %v583_v28 = vld [vmem:[%s5556_s0 + $0x20] sm:$0x1] }
  0x26   :  { %v606_v29 = vunpack.c.l.b16 %v583_v28 }
  0x27   :  { %v504_v33 = vsel %vm488_vm5, %v499_v22, %v503_v30  ;;  %v783_v22 = vrot.slane %v777_v16, 1 }
  0x29   :  { %3230 = vmatmul.msk.bf16.gmra.mxu1 %vm39_vm1, %v4353_v31  ;;  %v506_v31 = vshrl.u32 %v4297_v8, 16 }
  0x2a   :  { %3218 = vmatmul.msk.bf16.gmra.mxu0 %vm39_vm1, %v121_v62  ;;  %3261 = vmatmul.msk.bf16.gmra.mxu3 %vm39_vm1, %v330_v1  ;;  %v4503_v1 = vshrl.u32 %v4459_v42, 16 }
  0x2b   :  { %v508_v38 = vrot.slane %v506_v31, 2 }
  0x2c   :  { %v912_v13 = vrot.slane %v4503_v1, 1  ;;  %v846_v31 = vor.u32 %v4503_v1, %v842_v18 }
  0x2d   :  { %v512_v45 = vor.u32 %v511_v39, %v508_v38  ;;  %v755_v38 = vld [vmem:[%s5556_s0 + $0x3c] sm:$0x3] }
  0x2e   :  { %3245 = vmatmul.msk.bf16.gmra.mxu2 %vm39_vm1, %v245_v5  ;;  %v914_v20 = vor.u32 %v913_v14, %v912_v13  ;;  %v829_v41 = vunpack.c.l.b16 %v755_v38  ;;  %v4044_v38 = vld [vmem:[%s5556_s0 + $0x20] sm:$0xf0] }
  0x2f   :  { %v513_v51 = vsel %vm488_vm5, %v503_v30, %v512_v45  ;;  %v916_v30 = vrot.slane %v4525_v15, 1 }
  0x39   :  { %3292 = vmatmul.msk.bf16.vlgmr.msrb.gmra.mxu1 %vm39_vm1, %v500_v26  ;;  %v618_v26 = vrot.slane %v4039_v21, 3 }
  0x3a   :  { %3276 = vmatmul.msk.bf16.vlgmr.msrb.gmra.mxu0 %vm39_vm1, %v417_v24  ;;  %3262 = vmatmul.msk.bf16.gmra.mxu3 %vm39_vm1, %v339_v27 }
  0x3b   :  { %1175 = vmatpush.bf16.msrb.mxu0 %v4332_v25  ;;  %1269 = vmatpush.bf16.msrb.mxu1 %v4041_v53  ;;  %v4438_v25 = vld [vmem:[%s5556_s0 + $0x20] sm:$0xff]   ;;  %v614_v53 = vrot.slane %v4037_v46, 3  ;;  %v619_v27 = vsel %vm612_vm6, %v616_v58, %v618_v26 }
  0x3c   :  { %v4175_v36 = vunpack.c.h.b16 %v4438_v25  ;;  %v835_v63 = vshll.u32 %v4438_v25, 16  ;;  %v833_v9 = vshrl.u32 %v4438_v25, 16 }
  0x3d   :  { %v615_v8 = vsel %vm612_vm6, %v613_v52, %v614_v53  ;;  %v617_v62 = vsel %vm612_vm6, %v614_v53, %v616_v58  ;;  %v924_v52 = vshll.u32 %v777_v16, 16  ;;  %v987_v53 = vrot.slane %v4459_v42, 2 }
  0x3e   :  { %3246 = vmatmul.msk.bf16.gmra.mxu2 %vm39_vm1, %v247_v4  ;;  %v837_v12 = vrot.slane %v835_v63, 1  ;;  %v4522_v4 = vshll.u32 %v4479_v55, 16 }
  0x3f   :  { %1176 = vmatpush.bf16.msrb.mxu0 %v4367_v37  ;;  %1270 = vmatpush.bf16.msrb.mxu1 %v4040_v3  ;;  %v766_v37 = vunpack.c.l.b16 %v756_v34  ;;  %v611_v34 = vpack.c.b16 %v606_v29, %v606_v29  ;;  %v1054_v29 = vrot.slane %v4525_v15, 2 }
  0x40   :  { %v838_v17 = vor.u32 %v837_v12, %v833_v9  ;;  %v850_v35 = vrot.slane %v4522_v4, 1 }
  0x41   :  { %v774_v43 = vpack.c.b16 %v4175_v36, %v766_v37  ;;  %v620_v40 = vrot.slane %v611_v34, 3 }
  0x42   :  { %v854_v12 = vor.u32 %v4525_v15, %v850_v35 }
  0x43   :  { %v778_v48 = vrot.slane %v774_v43, 1  ;;  %v905_v2 = vshrl.u32 %v774_v43, 16  ;;  %v908_v5 = vshll.u32 %v774_v43, 16 }
  0x45   :  { %v780_v54 = vsel %vm240_vm3, %v778_v48, %v779_v49  ;;  %v907_v3 = vrot.slane %v905_v2, 1  ;;  %v910_v11 = vrot.slane %v908_v5, 2  ;;  %v621_v49 = vsel %vm612_vm6, %v618_v26, %v620_v40 }
  0x46   :  { %v1050_v5 = vrot.slane %v4503_v1, 2 }
  0x47   :  { %v911_v19 = vor.u32 %v910_v11, %v907_v3 }
  0x49   :  { %3293 = vmatmul.msk.bf16.gmra.mxu1 %vm39_vm1, %v504_v33  ;;  %v915_v24 = vsel %vm314_vm2, %v911_v19, %v914_v20  ;;  %v978_v33 = vld [vmem:[%s5556_s0 + $0x20] sm:$0xc] }
  0x4a   :  { %3277 = vmatmul.msk.bf16.gmra.mxu0 %vm39_vm1, %v419_v32  ;;  %3263 = vmatmul.msk.bf16.gmra.mxu3 %vm39_vm1, %v338_v23  ;;  %v843_v23 = vsel %vm93_vm0, %v838_v17, %v842_v18  ;;  %v917_v32 = vrot.slane %v4522_v4, 2  ;;  %v982_v39 = vunpack.c.l.b16 %v978_v33 }
  0x4c   :  { %v918_v37 = vor.u32 %v917_v32, %v916_v30  ;;  %v984_v47 = vpack.c.b16 %v4175_v36, %v982_v39  ;;  %v1055_v30 = vrot.slane %v4522_v4, 3  ;;  %v4589_v4 = vld [vmem:[%s5556_s0 + $0x28] sm:$0xff] }
  0x4e   :  { %3247 = vmatmul.msk.bf16.gmra.mxu2 %vm39_vm1, %v246_v10  ;;  %v784_v10 = vsel %vm240_vm3, %v781_v57, %v783_v22  ;;  %v919_v46 = vsel %vm314_vm2, %v914_v20, %v918_v37  ;;  %v1046_v56 = vshll.u32 %v984_v47, 16  ;;  %v986_v21 = vrot.slane %v984_v47, 2 }
  0x50   :  { %v1048_v42 = vrot.slane %v1046_v56, 3 }
  0x59   :  { %3294 = vmatmul.msk.bf16.gmra.mxu1 %vm39_vm1, %v513_v51  ;;  %v921_v51 = vshrl.u32 %v777_v16, 16 }
  0x5a   :  { %3278 = vmatmul.msk.bf16.gmra.mxu0 %vm39_vm1, %v421_v50  ;;  %3336 = vmatmul.msk.bf16.vlgmr.msra.gmra.mxu3 %vm39_vm1, %v780_v54  ;;  %v831_v50 = vpack.c.b16 %v829_v41, %v772_v6  ;;  %v1043_v54 = vshrl.u32 %v984_v47, 16  ;;  %v1051_v6 = vrot.slane %v4500_v0, 3 }
  0x5b   :  { %v923_v61 = vrot.slane %v921_v51, 1  ;;  %v1059_v51 = vshrl.u32 %v4489_v60, 16 }
  0x5c   :  { %v1045_v63 = vrot.slane %v1043_v54, 2  ;;  %v1052_v14 = vor.u32 %v1051_v6, %v1050_v5  ;;  %v860_v34 = vshrl.u32 %v831_v50, 16 }
  0x5e   :  { %3324 = vmatmul.msk.bf16.vlgmr.msra.gmra.mxu2 %vm39_vm1, %v615_v8  ;;  %v989_v8 = vrot.slane %v4479_v55, 2  ;;  %v1049_v13 = vor.u32 %v1048_v42, %v1045_v63 }
  0x60   :  { %v4554_v25 = vsel %vm414_vm4, %v987_v53, %v989_v8  ;;  %v1053_v0 = vsel %vm488_vm5, %v1049_v13, %v1052_v14 }
  0x69   :  { %3295 = vmatmul.msk.bf16.gmra.mxu1 %vm39_vm1, %v512_v45  ;;  %v851_v45 = vsel %vm93_vm0, %v846_v31, %v850_v35  ;;  %v1056_v35 = vor.u32 %v1055_v30, %v1054_v29 }
  0x6a   :  { %3279 = vmatmul.msk.bf16.gmra.mxu0 %vm39_vm1, %v420_v44  ;;  %3337 = vmatmul.msk.bf16.gmra.mxu3 %vm39_vm1, %v782_v59  ;;  %v856_v59 = vshll.u32 %v831_v50, 16  ;;  %v1219_v50 = vshll.u32 %v4589_v4, 16 }
  0x6c   :  { %v858_v3 = vrot.slane %v856_v59, 1  ;;  %v1221_v59 = vrot.slane %v1219_v50, 4 }
  0x6e   :  { %3325 = vmatmul.msk.bf16.gmra.mxu2 %vm39_vm1, %v617_v62  ;;  %v926_v62 = vrot.slane %v924_v52, 2  ;;  %v859_v19 = vsel %vm93_vm0, %v854_v12, %v858_v3  ;;  %v862_v40 = vor.u32 %v860_v34, %v858_v3  ;;  %v1062_v52 = vshll.u32 %v4489_v60, 16 }
  0x6f   :  { %vm1566_vm0 = vcmask 523264  }
  0x70   :  { %v927_v11 = vor.u32 %v926_v62, %v923_v61  ;;  %v1061_v62 = vrot.slane %v1059_v51, 2  ;;  %v1064_v63 = vrot.slane %v1062_v52, 3 }
  0x72   :  { %v928_v20 = vsel %vm314_vm2, %v918_v37, %v927_v11  ;;  %v3358_v37 = vld [vmem:[%s5556_s0 + $0x20] sm:$0x8] }
  0x79   :  { %3344 = vmatmul.msk.bf16.vlgmr.msra.gmra.mxu1 %vm39_vm1, %v915_v24  ;;  %v988_v24 = vsel %vm414_vm4, %v986_v21, %v987_v53 }
  0x7a   :  { %3340 = vmatmul.msk.bf16.vlgmr.msra.gmra.mxu0 %vm39_vm1, %v843_v23  ;;  %3338 = vmatmul.msk.bf16.gmra.mxu3 %vm39_vm1, %v784_v10 }
  0x7e   :  { %3326 = vmatmul.msk.bf16.gmra.mxu2 %vm39_vm1, %v619_v27 }
  0x86   :  { %v207_v44 = vpop.f32.mrf.mxu1 }
  0x87   :  { %v158_v43 = vpop.f32.mrf.mxu0 }
  0x88   :  { %v208_v48 = vadd.f32 %v207_v44, %v158_v43  ;;  %v3359_v43 = vor.u32 %v4044_v38, %v3358_v37 }
  0x89   :  { %3345 = vmatmul.msk.bf16.gmra.mxu1 %vm39_vm1, %v919_v46 }
  0x8a   :  { %3341 = vmatmul.msk.bf16.gmra.mxu0 %vm39_vm1, %v851_v45  ;;  %3339 = vmatmul.msk.bf16.gmra.mxu3 %vm39_vm1, %v783_v22  ;;  %v1057_v45 = vsel %vm488_vm5, %v1052_v14, %v1056_v35  ;;  %v1208_v47 = vshrl.u32 %v3359_v43, 16  ;;  %v1148_v6 = vrot.slane %v3359_v43, 3 }
  0x8d   :  { %v222_v36 = vpop.f32.mrf.mxu3 }
  0x8e   :  { %3327 = vmatmul.msk.bf16.gmra.mxu2 %vm39_vm1, %v621_v49  ;;  %v209_v58 = vpop.f32.mrf.mxu1  ;;  %v1216_v49 = vshrl.u32 %v4589_v4, 16 }
  0x8f   :  { %v160_v57 = vpop.f32.mrf.mxu0 }
  0x90   :  { %v4557_v2 = vadd.f32 %v209_v58, %v160_v57  ;;  %v1218_v58 = vrot.slane %v1216_v49, 3 }
  0x91   :  { %v173_v7 = vpop.f32.mrf.mxu2 }
  0x92   :  { %v4561_v9 = vadd.f32 %v222_v36, %v173_v7  ;;  %v1210_v36 = vrot.slane %v1208_v47, 3  ;;  %v1149_v7 = vrot.slane %v4589_v4, 3  ;;  %v1222_v3 = vor.u32 %v1221_v59, %v1218_v58 }
  0x95   :  { %v224_v16 = vpop.f32.mrf.mxu3 }
  0x96   :  { %v212_v18 = vpop.f32.mrf.mxu1 }
  0x97   :  { %v163_v17 = vpop.f32.mrf.mxu0 }
  0x98   :  { %v213_v1 = vadd.f32 %v212_v18, %v163_v17  ;;  %v1150_v17 = vsel %vm612_vm6, %v1148_v6, %v1149_v7 }
  0x99   :  { %v175_v22 = vpop.f32.mrf.mxu2  ;;  %3346 = vmatmul.msk.bf16.gmra.mxu1 %vm39_vm1, %v928_v20  ;;  %v4046_v20 = vld [vmem:[%s5556_s0 + $0x30] sm:$0xff] }
  0x9a   :  { %v4567_v23 = vadd.f32 %v224_v16, %v175_v22  ;;  %3342 = vmatmul.msk.bf16.gmra.mxu0 %vm39_vm1, %v859_v19  ;;  %3352 = vmatmul.msk.bf16.vlgmr.msrb.gmra.mxu3 %vm39_vm1, %v1053_v0  ;;  %v991_v19 = vrot.slane %v4489_v60, 2  ;;  %v1225_v60 = vshrl.u32 %v4046_v20, 16 }
  0x9c   :  { %v1227_v30 = vrot.slane %v1225_v60, 3 }
  0x9d   :  { %v373_v26 = vpop.f32.mrf.mxu3 }
  0x9e   :  { %3348 = vmatmul.msk.bf16.vlgmr.msrb.gmra.mxu2 %vm39_vm1, %v988_v24  ;;  %v214_v27 = vpop.f32.mrf.mxu1  ;;  %v992_v24 = vsel %vm414_vm4, %v989_v8, %v991_v19 }
  0x9f   :  { %v165_v10 = vpop.f32.mrf.mxu0 }
  0xa0   :  { %v4574_v28 = vadd.f32 %v214_v27, %v165_v10 }
  0xa1   :  { %v281_v32 = vpop.f32.mrf.mxu2 }
  0xa2   :  { %v301_v33 = vadd.f32 %v281_v32, %v208_v48  ;;  %v1211_v48 = vshll.u32 %v3359_v43, 16 }
  0xa4   :  { %v393_v31 = vadd.f32 %v373_v26, %v301_v33  ;;  %v1213_v57 = vrot.slane %v1211_v48, 4  ;;  %v1228_v26 = vshll.u32 %v4046_v20, 16 }
  0xa5   :  { %v4584_v39 = vpop.f32.mrf.mxu3 }
  0xa6   :  { %v217_v15 = vpop.f32.mrf.mxu1  ;;  %v1214_v12 = vor.u32 %v1213_v57, %v1210_v36  ;;  %v1230_v32 = vrot.slane %v1228_v26, 4 }
  0xa7   :  { %v168_v41 = vpop.f32.mrf.mxu0 }
  0xa8   :  { %v218_v44 = vadd.f32 %v217_v15, %v168_v41  ;;  %v1223_v18 = vsel %vm1206_vm7, %v1214_v12, %v1222_v3  ;;  %v4047_v15 = vld [vmem:[%s5556_s0 + $0x38] sm:$0xff] }
  0xa9   :  { %v4592_v46 = vpop.f32.mrf.mxu2  ;;  %3347 = vmatmul.msk.bf16.gmra.mxu1 %vm39_vm1, %v927_v11  ;;  %v1237_v47 = vshll.u32 %v4047_v15, 16  ;;  %v1153_v36 = vrot.slane %v4047_v15, 3 }
  0xaa   :  { %3343 = vmatmul.msk.bf16.gmra.mxu0 %vm39_vm1, %v862_v40  ;;  %3353 = vmatmul.msk.bf16.gmra.mxu3 %vm39_vm1, %v1057_v45 }
  0xab   :  { %v1239_v52 = vrot.slane %v1237_v47, 4 }
  0xad   :  { %v378_v53 = vpop.f32.mrf.mxu3 }
  0xae   :  { %3349 = vmatmul.msk.bf16.gmra.mxu2 %vm39_vm1, %v4554_v25  ;;  %v219_v56 = vpop.f32.mrf.mxu1  ;;  %v1065_v25 = vor.u32 %v1064_v63, %v1061_v62 }
  0xaf   :  { %v170_v54 = vpop.f32.mrf.mxu0 }
  0xb0   :  { %v4603_v61 = vadd.f32 %v219_v56, %v170_v54 }
  0xb1   :  { %v286_v42 = vpop.f32.mrf.mxu2 }
  0xb2   :  { %v303_v5 = vadd.f32 %v286_v42, %v213_v1  ;;  %v1066_v1 = vsel %vm488_vm5, %v1056_v35, %v1065_v25  ;;  %v1231_v35 = vor.u32 %v1230_v32, %v1227_v30  ;;  %vm2466_vm5 = vcmask 518144  }
  0xb4   :  { %v395_v11 = vadd.f32 %v378_v53, %v303_v5  ;;  %v1232_v41 = vsel %vm1206_vm7, %v1222_v3, %v1231_v35  ;;  %v1124_v53 = vld [vmem:[%s5556_s0 + $0x40] sm:$0x1] }
  0xb5   :  { %v4606_v13 = vpop.f32.mrf.mxu3  ;;  %v1142_v58 = vunpack.c.l.b16 %v1124_v53 }
  0xb6   :  { %v547_v16 = vpop.f32.mrf.mxu1 }
  0xb7   :  { %v455_v14 = vpop.f32.mrf.mxu0 }
  0xb8   :  { %v475_v21 = vadd.f32 %v455_v14, %v393_v31  ;;  %v1151_v31 = vrot.slane %v4046_v20, 3 }
  0xb9   :  { %v4615_v0 = vpop.f32.mrf.mxu2  ;;  %3376 = vmatmul.msk.bf16.vlgmr.msrb.gmra.mxu1 %vm39_vm1, %v1223_v18 }
  0xba   :  { %v4617_v22 = vadd.f32 %v547_v16, %v475_v21  ;;  %3372 = vmatmul.msk.bf16.vlgmr.msrb.gmra.mxu0 %vm39_vm1, %v1150_v17  ;;  %3354 = vmatmul.msk.bf16.gmra.mxu3 %vm39_vm1, %v1066_v1  ;;  %v1152_v40 = vsel %vm612_vm6, %v1149_v7, %v1151_v31  ;;  %v1154_v5 = vsel %vm612_vm6, %v1151_v31, %v1153_v36 }
  0xbb   :  { %v1147_v7 = vpack.c.b16 %v1142_v58, %v1142_v58 }
  0xbd   :  { %v383_v10 = vpop.f32.mrf.mxu3  ;;  %v1155_v1 = vrot.slane %v1147_v7, 3 }
  0xbe   :  { %3350 = vmatmul.msk.bf16.gmra.mxu2 %vm39_vm1, %v992_v24  ;;  %v4628_v29 = vpop.f32.mrf.mxu1 }
  0xbf   :  { %v4626_v27 = vpop.f32.mrf.mxu0  ;;  %v1156_v30 = vsel %vm612_vm6, %v1153_v36, %v1155_v1  ;;  %vm2475_vm6 = vcmask 1042944  }
  0xc1   :  { %v291_v33 = vpop.f32.mrf.mxu2 }
  0xc2   :  { %v305_v34 = vadd.f32 %v291_v33, %v218_v44  ;;  %v1234_v44 = vshrl.u32 %v4047_v15, 16  ;;  %v302_v33 = vadd.f32 %v4592_v46, %v4557_v2 }
  0xc4   :  { %v397_v55 = vadd.f32 %v383_v10, %v305_v34  ;;  %v1236_v51 = vrot.slane %v1234_v44, 3 }
  0xc5   :  { %v4630_v37 = vpop.f32.mrf.mxu3 }
  0xc6   :  { %v552_v38 = vpop.f32.mrf.mxu1  ;;  %v1240_v57 = vor.u32 %v1239_v52, %v1236_v51 }
  0xc7   :  { %v460_v8 = vpop.f32.mrf.mxu0 }
  0xc8   :  { %v477_v4 = vadd.f32 %v460_v8, %v395_v11  ;;  %v1241_v6 = vsel %vm1206_vm7, %v1231_v35, %v1240_v57 }
  0xc9   :  { %v4637_v43 = vpop.f32.mrf.mxu2  ;;  %3377 = vmatmul.msk.bf16.gmra.mxu1 %vm39_vm1, %v1232_v41 }
  0xca   :  { %v569_v45 = vadd.f32 %v552_v38, %v477_v4  ;;  %3373 = vmatmul.msk.bf16.gmra.mxu0 %vm39_vm1, %v1152_v40  ;;  %3355 = vmatmul.msk.bf16.gmra.mxu3 %vm39_vm1, %v1065_v25  ;;  %v1246_v25 = vshll.u32 %v1147_v7, 16 }
  0xcd   :  { %v388_v48 = vpop.f32.mrf.mxu3 }
  0xce   :  { %3351 = vmatmul.msk.bf16.gmra.mxu2 %vm39_vm1, %v991_v19  ;;  %v554_v50 = vpop.f32.mrf.mxu1  ;;  %v1248_v19 = vrot.slane %v1246_v25, 4 }
  0xcf   :  { %v462_v49 = vpop.f32.mrf.mxu0 }
  0xd1   :  { %v296_v54 = vpop.f32.mrf.mxu2 }
  0xd2   :  { %v307_v56 = vadd.f32 %v296_v54, %v4561_v9  ;;  %v1243_v9 = vshrl.u32 %v1147_v7, 16 }
  0xd4   :  { %v399_v59 = vadd.f32 %v388_v48, %v307_v56  ;;  %v1245_v18 = vrot.slane %v1243_v9, 3 }
  0xd5   :  { %v4647_v62 = vpop.f32.mrf.mxu3 }
  0xd6   :  { %v557_v42 = vpop.f32.mrf.mxu1  ;;  %v1249_v24 = vor.u32 %v1248_v19, %v1245_v18 }
  0xd7   :  { %v465_v63 = vpop.f32.mrf.mxu0 }
  0xd8   :  { %v479_v12 = vadd.f32 %v465_v63, %v397_v55  ;;  %v1250_v32 = vsel %vm1206_vm7, %v1240_v57, %v1249_v24  ;;  %v304_v55 = vadd.f32 %v4615_v0, %v4574_v28 }
  0xd9   :  { %v4651_v3 = vpop.f32.mrf.mxu2  ;;  %3378 = vmatmul.msk.bf16.gmra.mxu1 %vm39_vm1, %v1241_v6 }
  0xda   :  { %v4653_v11 = vadd.f32 %v557_v42, %v479_v12  ;;  %3374 = vmatmul.msk.bf16.gmra.mxu0 %vm39_vm1, %v1154_v5  ;;  %v396_v46 = vadd.f32 %v4606_v13, %v304_v55 }
  0xdc   :  { %v478_v44 = vadd.f32 %v462_v49, %v396_v46 }
  0xdd   :  { %v806_v14 = vpop.f32.mrf.mxu3 }
  0xde   :  { %v4659_v17 = vpop.f32.mrf.mxu1  ;;  %v570_v48 = vadd.f32 %v554_v50, %v478_v44  ;;  %v306_v50 = vadd.f32 %v4637_v43, %v4603_v61 }
  0xdf   :  { %v4657_v16 = vpop.f32.mrf.mxu0 }
  0xe0   :  { %v398_v7 = vadd.f32 %v4630_v37, %v306_v50 }
  0xe1   :  { %v655_v20 = vpop.f32.mrf.mxu2 }
  0xe2   :  { %v675_v21 = vadd.f32 %v655_v20, %v4617_v22  ;;  %v394_v22 = vadd.f32 %v4584_v39, %v302_v33  ;;  %v4685_v39 = vld [vmem:[%s5557_s2] ss:$0 sm:$0xff]  ;;  %v480_v1 = vadd.f32 %v4657_v16, %v398_v7  ;;  %s4200_s2 = smov 96  }
  0xe4   :  { %v476_v8 = vadd.f32 %v4626_v27, %v394_v22  ;;  %v4691_v13 = vadd.f32 %v4685_v39, %v675_v21  ;;  %v572_v16 = vadd.f32 %v4659_v17, %v480_v1 }
  0xe5   :  { %v4662_v60 = vpop.f32.mrf.mxu3 }
  0xe6   :  { %v562_v10 = vpop.f32.mrf.mxu1  ;;  %v568_v15 = vadd.f32 %v4628_v29, %v476_v8  ;;  %v718_v36 = vmul.f32 %v4691_v13, %v4691_v13  ;;  %v695_v5 = vsel %vm39_vm1, %v4691_v13, 0.0 }
  0xe7   :  { %v470_v26 = vpop.f32.mrf.mxu0 }
  0xe8   :  { %v481_v34 = vadd.f32 %v470_v26, %v399_v59  ;;  %v726_v25 = vsel %vm39_vm1, %v718_v36, 0.0 }
  0xe9   :  { %v657_v31 = vpop.f32.mrf.mxu2  ;;  %3379 = vmatmul.msk.bf16.gmra.mxu1 %vm39_vm1, %v1250_v32 }
  0xea   :  { %v4668_v35 = vadd.f32 %v562_v10, %v481_v34  ;;  %3375 = vmatmul.msk.bf16.gmra.mxu0 %vm39_vm1, %v1156_v30  ;;  %v676_v47 = vadd.f32 %v657_v31, %v568_v15 }
  0xec   :  { %v4688_v51 = vadd.f32 %v4685_v39, %v676_v47  ;;  %v308_v47 = vadd.f32 %v4651_v3, %v4567_v23 }
  0xed   :  { %v811_v38 = vpop.f32.mrf.mxu3 }
  0xee   :  { %v4678_v41 = vpop.f32.mrf.mxu1  ;;  %v719_v54 = vmul.f32 %v4688_v51, %v4688_v51  ;;  %v696_v57 = vsel %vm39_vm1, %v4688_v51, 0.0  ;;  %v400_v36 = vadd.f32 %v4647_v62, %v308_v47 }
  0xef   :  { %v4676_v40 = vpop.f32.mrf.mxu0  ;;  %v697_v12 = vadd.f32 %v696_v57, %v695_v5 }
  0xf0   :  { %v727_v6 = vsel %vm39_vm1, %v719_v54, 0.0  ;;  %v482_v57 = vadd.f32 %v4676_v40, %v400_v36 }
  0xf1   :  { %v660_v2 = vpop.f32.mrf.mxu2  ;;  %v728_v20 = vadd.f32 %v727_v6, %v726_v25 }
  0xf2   :  { %v677_v4 = vadd.f32 %v660_v2, %v569_v45  ;;  %v574_v62 = vadd.f32 %v4678_v41, %v482_v57  ;;  %v4199_v57 = vmov 0.0  }
  0xf3   :  { %54 = vst.msk [vmem:[#allocation2 + $0x70] sm:$0xff] %vm39_vm1, %v4199_v57 }
  0xf4   :  { %v4694_v29 = vadd.f32 %v4685_v39, %v677_v4  ;;  %55 = vst.msk [vmem:[#allocation2 + $0x78] sm:$0xff] %vm39_vm1, %v4199_v57 }
  0xf5   :  { %v813_v28 = vpop.f32.mrf.mxu3  ;;  %40 = vst.msk [vmem:[#allocation2] sm:$0xff] %vm39_vm1, %v4199_v57 }
  0xf6   :  { %v950_v27 = vpop.f32.mrf.mxu1  ;;  %v720_v58 = vmul.f32 %v4694_v29, %v4694_v29  ;;  %v698_v61 = vsel %vm39_vm1, %v4694_v29, 0.0  ;;  %41 = vst.msk [vmem:[#allocation2 + $0x8] sm:$0xff] %vm39_vm1, %v4199_v57 }
  0xf7   :  { %v884_v0 = vpop.f32.mrf.mxu0  ;;  %v699_v21 = vadd.f32 %v698_v61, %v697_v12  ;;  %42 = vst.msk [vmem:[#allocation2 + $0x10] sm:$0xff] %vm39_vm1, %v4199_v57 }
  0xf8   :  { %v885_v52 = vadd.f32 %v884_v0, %v806_v14  ;;  %v729_v14 = vsel %vm39_vm1, %v720_v58, 0.0  ;;  %43 = vst.msk [vmem:[#allocation2 + $0x18] sm:$0xff] %vm39_vm1, %v4199_v57 }
  0xf9   :  { %v662_v53 = vpop.f32.mrf.mxu2  ;;  %v730_v37 = vadd.f32 %v729_v14, %v728_v20  ;;  %44 = vst.msk [vmem:[#allocation2 + $0x20] sm:$0xff] %vm39_vm1, %v4199_v57 }
  0xfa   :  { %v678_v45 = vadd.f32 %v662_v53, %v570_v48  ;;  %v4696_v49 = vadd.f32 %v950_v27, %v885_v52  ;;  %45 = vst.msk [vmem:[#allocation2 + $0x28] sm:$0xff] %vm39_vm1, %v4199_v57 }
  0xfb   :  { %46 = vst.msk [vmem:[#allocation2 + $0x30] sm:$0xff] %vm39_vm1, %v4199_v57 }
  0xfc   :  { %v4701_v56 = vadd.f32 %v4685_v39, %v678_v45  ;;  %47 = vst.msk [vmem:[#allocation2 + $0x38] sm:$0xff] %vm39_vm1, %v4199_v57 }
  0xfd   :  { %v816_v59 = vpop.f32.mrf.mxu3  ;;  %48 = vst.msk [vmem:[#allocation2 + $0x40] sm:$0xff] %vm39_vm1, %v4199_v57 }
  0xfe   :  { %v4713_v42 = vpop.f32.mrf.mxu1  ;;  %v721_v43 = vmul.f32 %v4701_v56, %v4701_v56  ;;  %v700_v18 = vsel %vm39_vm1, %v4701_v56, 0.0  ;;  %49 = vst.msk [vmem:[#allocation2 + $0x48] sm:$0xff] %vm39_vm1, %v4199_v57 }
  0xff   :  { %v4711_v63 = vpop.f32.mrf.mxu0  ;;  %v701_v10 = vadd.f32 %v700_v18, %v699_v21  ;;  %50 = vst.msk [vmem:[#allocation2 + $0x50] sm:$0xff] %vm39_vm1, %v4199_v57 }
 0x100   :  { %v731_v24 = vsel %vm39_vm1, %v721_v43, 0.0  ;;  %51 = vst.msk [vmem:[#allocation2 + $0x58] sm:$0xff] %vm39_vm1, %v4199_v57 }
 0x101   :  { %v665_v9 = vpop.f32.mrf.mxu2  ;;  %v732_v34 = vadd.f32 %v731_v24, %v730_v37  ;;  %52 = vst.msk [vmem:[#allocation2 + $0x60] sm:$0xff] %vm39_vm1, %v4199_v57 }
 0x102   :  { %v679_v19 = vadd.f32 %v665_v9, %v4653_v11  ;;  %53 = vst.msk [vmem:[#allocation2 + $0x68] sm:$0xff] %vm39_vm1, %v4199_v57 }
 0x103   :  { %1567 = vst.msk [vmem:[#allocation3] sm:$0xff] %vm1566_vm0, %v4199_v57 }
 0x104   :  { %v4731_v26 = vadd.f32 %v4685_v39, %v679_v19  ;;  %1568 = vst.msk [vmem:[#allocation3 + $0x8] sm:$0xff] %vm1566_vm0, %v4199_v57 }
 0x105   :  { %v818_v33 = vpop.f32.mrf.mxu3  ;;  %1569 = vst.msk [vmem:[#allocation3 + $0x10] sm:$0xff] %vm1566_vm0, %v4199_v57 }
 0x106   :  { %v702_v30 = vsel %vm39_vm1, %v4731_v26, 0.0  ;;  %v722_v32 = vmul.f32 %v4731_v26, %v4731_v26  ;;  %v955_v22 = vpop.f32.mrf.mxu1 }
 0x107   :  { %v703_v11 = vadd.f32 %v702_v30, %v701_v10  ;;  %v889_v31 = vpop.f32.mrf.mxu0 }
 0x108   :  { %v733_v55 = vsel %vm39_vm1, %v722_v32, 0.0  ;;  %v890_v8 = vadd.f32 %v889_v31, %v811_v38 }
 0x109   :  { %v734_v2 = vadd.f32 %v733_v55, %v732_v34  ;;  %v667_v46 = vpop.f32.mrf.mxu2 }
 0x10a   :  { %v680_v15 = vadd.f32 %v667_v46, %v572_v16  ;;  %v4739_v4 = vadd.f32 %v955_v22, %v890_v8 }
 0x10c   :  { %v4742_v44 = vadd.f32 %v4685_v39, %v680_v15 }
 0x10d   :  { %v4751_v45 = vpop.f32.mrf.mxu3 }
 0x10e   :  { %v704_v0 = vsel %vm39_vm1, %v4742_v44, 0.0  ;;  %v723_v17 = vmul.f32 %v4742_v44, %v4742_v44  ;;  %v957_v38 = vpop.f32.mrf.mxu1 }
 0x10f   :  { %v705_v27 = vadd.f32 %v704_v0, %v703_v11  ;;  %v891_v48 = vpop.f32.mrf.mxu0 }
 0x110   :  { %v735_v52 = vsel %vm39_vm1, %v723_v17, 0.0  ;;  %v892_v53 = vadd.f32 %v891_v48, %v813_v28 }
 0x111   :  { %v736_v54 = vadd.f32 %v735_v52, %v734_v2  ;;  %v670_v50 = vpop.f32.mrf.mxu2 }
 0x112   :  { %v681_v23 = vadd.f32 %v670_v50, %v4668_v35  ;;  %v4755_v3 = vadd.f32 %v957_v38, %v892_v53  ;;  %v887_v53 = vadd.f32 %v4711_v63, %v4662_v60 }
 0x114   :  { %v4759_v58 = vadd.f32 %v4685_v39, %v681_v23  ;;  %v971_v36 = vadd.f32 %v4713_v42, %v887_v53 }
 0x115   :  { %v4767_v14 = vpop.f32.mrf.mxu3 }
 0x116   :  { %v706_v5 = vsel %vm39_vm1, %v4759_v58, 0.0  ;;  %v724_v28 = vmul.f32 %v4759_v58, %v4759_v58  ;;  %v960_v43 = vpop.f32.mrf.mxu1 }
 0x117   :  { %v707_v6 = vadd.f32 %v706_v5, %v705_v27  ;;  %v894_v61 = vpop.f32.mrf.mxu0 }
 0x118   :  { %v737_v35 = vsel %vm39_vm1, %v724_v28, 0.0  ;;  %v895_v7 = vadd.f32 %v894_v61, %v816_v59 }
 0x119   :  { %v738_v12 = vadd.f32 %v737_v35, %v736_v54  ;;  %v672_v9 = vpop.f32.mrf.mxu2 }
 0x11a   :  { %v682_v40 = vadd.f32 %v672_v9, %v574_v62  ;;  %v974_v25 = vadd.f32 %v960_v43, %v895_v7 }
 0x11c   :  { %v4770_v18 = vadd.f32 %v4685_v39, %v682_v40 }
 0x11d   :  { %v1088_v32 = vpop.f32.mrf.mxu3 }
 0x11e   :  { %v709_v19 = vsel %vm708_vm8, %v4770_v18, 0.0  ;;  %v725_v20 = vmul.f32 %v4770_v18, %v4770_v18  ;;  %v962_v59 = vpop.f32.mrf.mxu1 }
 0x11f   :  { %v4776_v41 = vadd.f32 %v709_v19, %v707_v6  ;;  %v896_v21 = vpop.f32.mrf.mxu0 }
 0x120   :  { %v739_v1 = vsel %vm708_vm8, %v725_v20, 0.0  ;;  %v897_v24 = vadd.f32 %v896_v21, %v818_v33 }
 0x121   :  { %v4779_v37 = vadd.f32 %v739_v1, %v738_v12  ;;  %v1014_v10 = vpop.f32.mrf.mxu2 }
 0x122   :  { %v975_v30 = vadd.f32 %v962_v59, %v897_v24  ;;  %v1034_v28 = vadd.f32 %v1014_v10, %v4696_v49 }
 0x124   :  { %v1108_v49 = vadd.f32 %v1088_v32, %v1034_v28 }
 0x125   :  { %v1090_v22 = vpop.f32.mrf.mxu3 }
 0x126   :  { %v965_v11 = vpop.f32.mrf.mxu1 }
 0x127   :  { %v899_v34 = vpop.f32.mrf.mxu0 }
 0x128   :  { %v900_v12 = vadd.f32 %v899_v34, %v4751_v45 }
 0x129   :  { %v1016_v31 = vpop.f32.mrf.mxu2 }
 0x12a   :  { %v1035_v5 = vadd.f32 %v1016_v31, %v971_v36  ;;  %v976_v45 = vadd.f32 %v965_v11, %v900_v12 }
 0x12c   :  { %v1109_v42 = vadd.f32 %v1090_v22, %v1035_v5 }
 0x12d   :  { %v1093_v15 = vpop.f32.mrf.mxu3 }
 0x12e   :  { %v4783_v55 = vpop.f32.mrf.mxu1 }
 0x12f   :  { %v4781_v16 = vpop.f32.mrf.mxu0 }
 0x131   :  { %v1019_v8 = vpop.f32.mrf.mxu2 }
 0x132   :  { %v1036_v60 = vadd.f32 %v1019_v8, %v4739_v4 }
 0x134   :  { %v1110_v4 = vadd.f32 %v1093_v15, %v1036_v60 }
 0x135   :  { %v1095_v17 = vpop.f32.mrf.mxu3 }
 0x136   :  { %v1272_v46 = vpop.f32.mrf.mxu1 }
 0x137   :  { %v1178_v2 = vpop.f32.mrf.mxu0 }
 0x138   :  { %v1198_v7 = vadd.f32 %v1178_v2, %v1108_v49 }
 0x139   :  { %v1021_v47 = vpop.f32.mrf.mxu2 }
 0x13a   :  { %v1037_v43 = vadd.f32 %v1021_v47, %v4755_v3  ;;  %v1292_v59 = vadd.f32 %v1272_v46, %v1198_v7  ;;  %v902_v46 = vadd.f32 %v4781_v16, %v4767_v14 }
 0x13c   :  { %v1111_v3 = vadd.f32 %v1095_v17, %v1037_v43  ;;  %v4830_v11 = vadd.f32 %v4685_v39, %v1292_v59 }
 0x13d   :  { %v1098_v52 = vpop.f32.mrf.mxu3 }
 0x13e   :  { %v1274_v33 = vpop.f32.mrf.mxu1  ;;  %v1330_v14 = vmul.f32 %v4830_v11, %v4830_v11 }
 0x13f   :  { %v1180_v0 = vpop.f32.mrf.mxu0 }
 0x140   :  { %v1199_v62 = vadd.f32 %v1180_v0, %v1109_v42 }
 0x141   :  { %v1024_v38 = vpop.f32.mrf.mxu2 }
 0x142   :  { %v1038_v35 = vadd.f32 %v1024_v38, %v974_v25  ;;  %v1293_v20 = vadd.f32 %v1274_v33, %v1199_v62  ;;  %v977_v38 = vadd.f32 %v4783_v55, %v902_v46 }
 0x144   :  { %v1112_v25 = vadd.f32 %v1098_v52, %v1038_v35  ;;  %v4823_v34 = vadd.f32 %v4685_v39, %v1293_v20  ;;  %v711_v20 = vrot.slane %v4776_v41, 4 }
 0x145   :  { %v1100_v63 = vpop.f32.mrf.mxu3 }
 0x146   :  { %v1277_v48 = vpop.f32.mrf.mxu1  ;;  %v1331_v0 = vmul.f32 %v4823_v34, %v4823_v34  ;;  %v1309_v53 = vsel %vm39_vm1, %v4823_v34, 0.0 }
 0x147   :  { %v1183_v27 = vpop.f32.mrf.mxu0 }
 0x148   :  { %v1200_v40 = vadd.f32 %v1183_v27, %v1110_v4  ;;  %v1339_v55 = vsel %vm39_vm1, %v1331_v0, 0.0 }
 0x149   :  { %v1026_v23 = vpop.f32.mrf.mxu2 }
 0x14a   :  { %v1039_v9 = vadd.f32 %v1026_v23, %v975_v30  ;;  %v1294_v10 = vadd.f32 %v1277_v48, %v1200_v40  ;;  %v1308_v23 = vsel %vm39_vm1, %v4830_v11, 0.0 }
 0x14c   :  { %v1113_v30 = vadd.f32 %v1100_v63, %v1039_v9  ;;  %v4833_v15 = vadd.f32 %v4685_v39, %v1294_v10 }
 0x14d   :  { %v1103_v31 = vpop.f32.mrf.mxu3 }
 0x14e   :  { %v1279_v50 = vpop.f32.mrf.mxu1  ;;  %v1311_v5 = vsel %vm39_vm1, %v4833_v15, 0.0 }
 0x14f   :  { %v1185_v54 = vpop.f32.mrf.mxu0 }
 0x150   :  { %v1201_v21 = vadd.f32 %v1185_v54, %v1111_v3  ;;  %v1332_v54 = vmul.f32 %v4833_v15, %v4833_v15 }
 0x151   :  { %v1029_v19 = vpop.f32.mrf.mxu2 }
 0x152   :  { %v1040_v22 = vadd.f32 %v1029_v19, %v976_v45  ;;  %v1295_v8 = vadd.f32 %v1279_v50, %v1201_v21  ;;  %v1341_v49 = vsel %vm39_vm1, %v1332_v54, 0.0 }
 0x154   :  { %v4838_v33 = vadd.f32 %v4685_v39, %v1295_v8  ;;  %v1114_v17 = vadd.f32 %v1103_v31, %v1040_v22 }
 0x155   :  { %v1105_v43 = vpop.f32.mrf.mxu3 }
 0x156   :  { %v1282_v61 = vpop.f32.mrf.mxu1  ;;  %v1333_v28 = vmul.f32 %v4838_v33, %v4838_v33  ;;  %v1313_v62 = vsel %vm39_vm1, %v4838_v33, 0.0 }
 0x157   :  { %v1188_v6 = vpop.f32.mrf.mxu0 }
 0x158   :  { %v1202_v32 = vadd.f32 %v1188_v6, %v1112_v25  ;;  %v1338_v6 = vsel %vm39_vm1, %v1330_v14, 0.0  ;;  %v1343_v3 = vsel %vm39_vm1, %v1333_v28, 0.0 }
 0x159   :  { %v1031_v27 = vpop.f32.mrf.mxu2  ;;  %v1340_v7 = vadd.f32 %v1339_v55, %v1338_v6 }
 0x15a   :  { %v1296_v47 = vadd.f32 %v1282_v61, %v1202_v32  ;;  %v1041_v60 = vadd.f32 %v1031_v27, %v977_v38  ;;  %v1310_v61 = vadd.f32 %v1309_v53, %v1308_v23 }
 0x15b   :  { %v1342_v25 = vadd.f32 %v1341_v49, %v1340_v7 }
 0x15c   :  { %v4848_v50 = vadd.f32 %v4685_v39, %v1296_v47  ;;  %v1312_v12 = vadd.f32 %v1311_v5, %v1310_v61  ;;  %v1115_v40 = vadd.f32 %v1105_v43, %v1041_v60  ;;  %v712_v47 = vadd.f32 %v711_v20, %v4776_v41 }
 0x15d   :  { %v1344_v32 = vadd.f32 %v1343_v3, %v1342_v25 }
 0x15e   :  { %v1284_v24 = vpop.f32.mrf.mxu1  ;;  %v1334_v4 = vmul.f32 %v4848_v50, %v4848_v50  ;;  %v1315_v9 = vsel %vm39_vm1, %v4848_v50, 0.0  ;;  %v1314_v21 = vadd.f32 %v1313_v62, %v1312_v12  ;;  %v713_v54 = vrot.slane %v712_v47, 2 }
 0x15f   :  { %v1190_v1 = vpop.f32.mrf.mxu0 }
 0x160   :  { %v1203_v2 = vadd.f32 %v1190_v1, %v1113_v30  ;;  %v1345_v1 = vsel %vm39_vm1, %v1334_v4, 0.0  ;;  %v741_v30 = vrot.slane %v4779_v37, 4  ;;  %v1316_v31 = vadd.f32 %v1315_v9, %v1314_v21 }
 0x161   :  { %v1346_v0 = vadd.f32 %v1345_v1, %v1344_v32  ;;  %v714_v60 = vadd.f32 %v713_v54, %v712_v47 }
 0x162   :  { %v1297_v48 = vadd.f32 %v1284_v24, %v1203_v2  ;;  %v742_v38 = vadd.f32 %v741_v30, %v4779_v37 }
 0x163   :  { %v715_v37 = vrot.slane %v714_v60, 1 }
 0x164   :  { %v4858_v63 = vadd.f32 %v4685_v39, %v1297_v48  ;;  %v743_v5 = vrot.slane %v742_v38, 2 }
 0x165   :  { %v716_v3 = vadd.f32 %v715_v37, %v714_v60 }
 0x166   :  { %v1287_v52 = vpop.f32.mrf.mxu1  ;;  %v1335_v19 = vmul.f32 %v4858_v63, %v4858_v63  ;;  %v1317_v24 = vsel %vm39_vm1, %v4858_v63, 0.0  ;;  %v744_v61 = vadd.f32 %v743_v5, %v742_v38 }
 0x167   :  { %v1193_v16 = vpop.f32.mrf.mxu0 }
 0x168   :  { %v1204_v36 = vadd.f32 %v1193_v16, %v1114_v17  ;;  %v1347_v8 = vsel %vm39_vm1, %v1335_v19, 0.0  ;;  %v1318_v17 = vadd.f32 %v1317_v24, %v1316_v31  ;;  %v745_v4 = vrot.slane %v744_v61, 1 }
 0x169   :  { %v1348_v14 = vadd.f32 %v1347_v8, %v1346_v0 }
 0x16a   :  { %v1298_v42 = vadd.f32 %v1287_v52, %v1204_v36  ;;  %v746_v19 = vadd.f32 %v745_v4, %v744_v61 }
 0x16c   :  { %v4867_v35 = vadd.f32 %v4685_v39, %v1298_v42 }
 0x16e   :  { %v1336_v45 = vmul.f32 %v4867_v35, %v4867_v35  ;;  %v1289_v22 = vpop.f32.mrf.mxu1  ;;  %v1319_v2 = vsel %vm39_vm1, %v4867_v35, 0.0 }
 0x16f   :  { %v1195_v59 = vpop.f32.mrf.mxu0  ;;  %v1320_v16 = vadd.f32 %v1319_v2, %v1318_v17 }
 0x170   :  { %v1205_v10 = vadd.f32 %v1195_v59, %v1115_v40  ;;  %v1349_v27 = vsel %vm39_vm1, %v1336_v45, 0.0 }
 0x171   :  { %v1350_v36 = vadd.f32 %v1349_v27, %v1348_v14  ;;  %v1378_v27 = vld [vmem:[%s5559_s4] sm:$0x1] }
 0x172   :  { %v1299_v46 = vadd.f32 %v1289_v22, %v1205_v10 }
 0x174   :  { %v1307_v48 = vadd.f32 %v4685_v39, %v1299_v46  ;;  %v1365_v46 = vld [vmem:[%s5558_s3] sm:$0x1] }
 0x176   :  { %v1321_v52 = vsel %vm708_vm8, %v1307_v48, 0.0  ;;  %v1337_v53 = vmul.f32 %v1307_v48, %v1307_v48 }
 0x177   :  { %v1322_v23 = vadd.f32 %v1321_v52, %v1320_v16 }
 0x178   :  { %v1351_v55 = vsel %vm708_vm8, %v1337_v53, 0.0 }
 0x179   :  { %v1323_v41 = vrot.slane %v1322_v23, 4  ;;  %v1352_v28 = vadd.f32 %v1351_v55, %v1350_v36 }
 0x17b   :  { %v1324_v42 = vadd.f32 %v1323_v41, %v1322_v23  ;;  %v1353_v6 = vrot.slane %v1352_v28, 4 }
 0x17d   :  { %v1325_v39 = vrot.slane %v1324_v42, 2  ;;  %v1354_v43 = vadd.f32 %v1353_v6, %v1352_v28 }
 0x17f   :  { %v1326_v49 = vadd.f32 %v1325_v39, %v1324_v42  ;;  %v1355_v62 = vrot.slane %v1354_v43, 2 }
 0x181   :  { %v1327_v7 = vrot.slane %v1326_v49, 1  ;;  %v1356_v12 = vadd.f32 %v1355_v62, %v1354_v43 }
 0x183   :  { %v1328_v9 = vadd.f32 %v1327_v7, %v1326_v49  ;;  %v1357_v40 = vrot.slane %v1356_v12, 1 }
 0x185   :  { %v1329_v20 = vadd.f32 %v1328_v9, %v716_v3  ;;  %v1358_v25 = vadd.f32 %v1357_v40, %v1356_v12 }
 0x187   :  { %v1359_v21 = vadd.f32 %v1358_v25, %v746_v19  ;;  %v1360_v59 = vmul.f32 0.008474576, %v1329_v20 }
 0x189   :  { %v1361_v1 = vmul.f32 0.008474576, %v1359_v21  ;;  %v1362_v24 = vmul.f32 %v1360_v59, %v1360_v59 }
 0x18b   :  { %v1363_v45 = vsub.f32 %v1361_v1, %v1362_v24 }
 0x18d   :  { %v1364_v10 = vmax.f32 %v1363_v45, 0.0 }
 0x18f   :  { %v1366_v30 = vadd.f32 1e-05, %v1364_v10  ;;  %v4934_v10 = vld [vmem:[%s5560_s5 + $0x78] sm:$0xff] }
 0x190   :  { %1667 = vmatpush.bf16.msra.mxu2 %v4934_v10 }
 0x191   :  { %4187 = vrsqrt.f32 %v1366_v30  ;;  %vm1373_vm10 = vweird.f32 %v1366_v30 }
 0x197   :  { %v4188_v32 = vpop.eup %4187 }
 0x198   :  { %v1368_v31 = vmul.f32 %v4188_v32, %v1366_v30  ;;  %vm1374_vm9 = vweird.f32 %v4188_v32  ;;  %v4939_v30 = vld [vmem:[%s5560_s5 + $0x178] sm:$0xff] }
 0x199   :  { %vm1375_vm11 = vmor %vm1373_vm10, %vm1374_vm9  ;;  %2093 = vmatpush.bf16.msra.mxu1 %v4939_v30 }
 0x19a   :  { %v1369_v22 = vmul.f32 %v4188_v32, %v1368_v31  ;;  %v4947_v31 = vld [vmem:[%s5560_s5 + $0x30] sm:$0xff] }
 0x19c   :  { %v1370_v8 = vmul.f32 0.5, %v1369_v22  ;;  %v4952_v22 = vld [vmem:[%s5560_s5 + $0x130] sm:$0xff] }
 0x19e   :  { %v1371_v2 = vsub.f32 1.5, %v1370_v8 }
 0x1a0   :  { %v1372_v47 = vmul.f32 %v4188_v32, %v1371_v2  ;;  %v4960_v2 = vld [vmem:[%s5560_s5 + $0x70] sm:$0xff] }
 0x1a1   :  { %1668 = vmatpush.bf16.msra.mxu2 %v4960_v2 }
 0x1a2   :  { %v1376_v0 = vsel %vm1375_vm11, %v4188_v32, %v1372_v47 }
 0x1a3   :  { %v1377_v17 = vmul.f32 %v1376_v0, %v1365_v46 }
 0x1a5   :  { %v1379_v38 = vmul.f32 %v1377_v17, %v1360_v59  ;;  %v1382_v14 = vperm.slane %v1377_v17, 0 }
 0x1a7   :  { %v1380_v16 = vsub.f32 %v1378_v27, %v1379_v38  ;;  %v1425_v52 = vmul.f32 %v1382_v14, %v4867_v35  ;;  %v1426_v53 = vmul.f32 %v1382_v14, %v1307_v48  ;;  %v1384_v54 = vmul.f32 %v1382_v14, %v4691_v13 }
 0x1a8   :  { %v1385_v36 = vmul.f32 %v1382_v14, %v4688_v51  ;;  %v1387_v23 = vmul.f32 %v1382_v14, %v4701_v56  ;;  %v1388_v55 = vmul.f32 %v1382_v14, %v4731_v26  ;;  %v1389_v41 = vmul.f32 %v1382_v14, %v4742_v44 }
 0x1a9   :  { %v1393_v5 = vperm.slane %v1380_v16, 0  ;;  %v1390_v28 = vmul.f32 %v1382_v14, %v4759_v58  ;;  %v1391_v60 = vmul.f32 %v1382_v14, %v4770_v18  ;;  %v1386_v42 = vmul.f32 %v1382_v14, %v4694_v29  ;;  %v4966_v16 = vld [vmem:[%s5560_s5 + $0x170] sm:$0xff] }
 0x1aa   :  { %v1419_v35 = vmul.f32 %v1382_v14, %v4830_v11  ;;  %v1420_v48 = vmul.f32 %v1382_v14, %v4823_v34  ;;  %v1421_v58 = vmul.f32 %v1382_v14, %v4833_v15  ;;  %v1422_v11 = vmul.f32 %v1382_v14, %v4838_v33  ;;  %2094 = vmatpush.bf16.msra.mxu1 %v4966_v16 }
 0x1ab   :  { %v1433_v13 = vadd.f32 %v1425_v52, %v1393_v5  ;;  %v1434_v6 = vadd.f32 %v1426_v53, %v1393_v5  ;;  %v1395_v51 = vadd.f32 %v1393_v5, %v1384_v54  ;;  %v1396_v61 = vadd.f32 %v1393_v5, %v1385_v36  ;;  %v4974_v53 = vld [vmem:[%s5560_s5 + $0x28] sm:$0xff] }
 0x1ac   :  { %v1397_v56 = vadd.f32 %v1393_v5, %v1386_v42  ;;  %v1398_v39 = vadd.f32 %v1393_v5, %v1387_v23  ;;  %v1399_v26 = vadd.f32 %v1393_v5, %v1388_v55  ;;  %v1400_v43 = vadd.f32 %v1393_v5, %v1389_v41  ;;  %v4979_v54 = vld [vmem:[%s5560_s5 + $0x128] sm:$0xff] }
 0x1ad   :  { %v1441_v37 = vmax.f32 %v1433_v13, 0.0  ;;  %v1442_v44 = vmax.f32 %v1434_v6, 0.0  ;;  %v1403_v49 = vmax.f32 %v1395_v51, 0.0  ;;  %v1404_v18 = vmax.f32 %v1396_v61, 0.0 }
 0x1ae   :  { %v1401_v62 = vadd.f32 %v1393_v5, %v1390_v28  ;;  %v1402_v29 = vadd.f32 %v1393_v5, %v1391_v60  ;;  %v1405_v34 = vmax.f32 %v1397_v56, 0.0  ;;  %v1427_v4 = vadd.f32 %v1419_v35, %v1393_v5 }
 0x1af   :  { %1449 = vst.msk [vmem:[#allocation2 + $0x71] sm:$0xff] %vm39_vm1, %v1441_v37  ;;  %v1428_v7 = vadd.f32 %v1420_v48, %v1393_v5  ;;  %v1406_v12 = vmax.f32 %v1398_v39, 0.0  ;;  %v1429_v3 = vadd.f32 %v1421_v58, %v1393_v5  ;;  %v1430_v9 = vadd.f32 %v1422_v11, %v1393_v5  ;;  %v4052_v11 = vld [vmem:[%s5560_s5 + $0x20] sm:$0xff] }
 0x1b0   :  { %1450 = vst.msk [vmem:[#allocation2 + $0x79] sm:$0x7] %vm708_vm8, %v1442_v44  ;;  %v1407_v40 = vmax.f32 %v1399_v26, 0.0  ;;  %v1423_v15 = vmul.f32 %v1382_v14, %v4848_v50  ;;  %v1424_v19 = vmul.f32 %v1382_v14, %v4858_v63  ;;  %v1408_v33 = vmax.f32 %v1400_v43, 0.0  ;;  %v4923_v50 = vld [vmem:[%s5560_s5 + $0x38] sm:$0xff] }
 0x1b1   :  { %1411 = vst.msk [vmem:[#allocation2 + $0x1] sm:$0xff] %vm39_vm1, %v1403_v49  ;;  %v1409_v20 = vmax.f32 %v1401_v62, 0.0  ;;  %v1410_v59 = vmax.f32 %v1402_v29, 0.0  ;;  %v1435_v1 = vmax.f32 %v1427_v4, 0.0  ;;  %v1436_v24 = vmax.f32 %v1428_v7, 0.0  ;;  %v4928_v63 = vld [vmem:[%s5560_s5 + $0x138] sm:$0xff]  ;;  %1733 = vmatpush.bf16.msra.mxu3 %v4923_v50 }
 0x1b2   :  { %1412 = vst.msk [vmem:[#allocation2 + $0x9] sm:$0xff] %vm39_vm1, %v1404_v18  ;;  %v1431_v25 = vadd.f32 %v1423_v15, %v1393_v5  ;;  %v1432_v21 = vadd.f32 %v1424_v19, %v1393_v5  ;;  %v1437_v45 = vmax.f32 %v1429_v3, 0.0  ;;  %v1438_v32 = vmax.f32 %v1430_v9, 0.0  ;;  %1999 = vmatpush.bf16.msra.mxu0 %v4928_v63  ;;  %v5014_v4 = vld [vmem:[%s5560_s5 + $0x120] sm:$0xff]  ;;  %v5019_v7 = vld [vmem:[%s5560_s5 + $0x168] sm:$0xff]  ;;  %v5035_v9 = vld [vmem:[%s5560_s5 + $0x118] sm:$0xff] }
 0x1b3   :  { %1413 = vst.msk [vmem:[#allocation2 + $0x11] sm:$0xff] %vm39_vm1, %v1405_v34  ;;  %v5009_v34 = vld [vmem:[%s5560_s5 + $0x68] sm:$0xff]  ;;  %v5028_v3 = vld [vmem:[%s5560_s5 + $0x60] sm:$0xff]  ;;  %2095 = vmatpush.bf16.msra.mxu1 %v5019_v7  ;;  %v4050_v15 = vld [vmem:[%s5560_s5 + $0x10] sm:$0xff] }
 0x1b4   :  { %1414 = vst.msk [vmem:[#allocation2 + $0x19] sm:$0xff] %vm39_vm1, %v1406_v12  ;;  %v1439_v8 = vmax.f32 %v1431_v25, 0.0  ;;  %v1440_v14 = vmax.f32 %v1432_v21, 0.0  ;;  %1669 = vmatpush.bf16.msra.mxu2 %v5009_v34  ;;  %v4051_v12 = vld [vmem:[%s5560_s5 + $0x18] sm:$0xff]  ;;  %v4049_v25 = vld [vmem:[%s5560_s5 + $0x8] sm:$0xff]  ;;  %v5070_v21 = vld [vmem:[%s5560_s5 + $0x50] sm:$0xff] }
 0x1b5   :  { %1415 = vst.msk [vmem:[#allocation2 + $0x21] sm:$0xff] %vm39_vm1, %v1407_v40  ;;  %1734 = vmatpush.bf16.msra.mxu3 %v4947_v31  ;;  %v5040_v40 = vld [vmem:[%s5560_s5 + $0x160] sm:$0xff]  ;;  %v5051_v19 = vld [vmem:[%s5560_s5 + $0x58] sm:$0xff] }
 0x1b6   :  { %1416 = vst.msk [vmem:[#allocation2 + $0x29] sm:$0xff] %vm39_vm1, %v1408_v33  ;;  %2000 = vmatpush.bf16.msra.mxu0 %v4952_v22  ;;  %v5056_v33 = vld [vmem:[%s5560_s5 + $0x110] sm:$0xff] }
 0x1b7   :  { %1417 = vst.msk [vmem:[#allocation2 + $0x31] sm:$0xff] %vm39_vm1, %v1409_v20  ;;  %2096 = vmatpush.bf16.msra.mxu1 %v5040_v40  ;;  %v5061_v20 = vld [vmem:[%s5560_s5 + $0x158] sm:$0xff] }
 0x1b8   :  { %1418 = vst.msk [vmem:[#allocation2 + $0x39] sm:$0x7] %vm708_vm8, %v1410_v59  ;;  %1670 = vmatpush.bf16.msra.mxu2 %v5028_v3  ;;  %v5077_v59 = vld [vmem:[%s5560_s5 + $0x108] sm:$0xff] }
 0x1b9   :  { %1443 = vst.msk [vmem:[#allocation2 + $0x41] sm:$0xff] %vm39_vm1, %v1435_v1  ;;  %1735 = vmatpush.bf16.msra.mxu3 %v4974_v53  ;;  %v5082_v1 = vld [vmem:[%s5560_s5 + $0x150] sm:$0xff] }
 0x1ba   :  { %1444 = vst.msk [vmem:[#allocation2 + $0x49] sm:$0xff] %vm39_vm1, %v1436_v24  ;;  %2001 = vmatpush.bf16.msra.mxu0 %v4979_v54  ;;  %v4048_v24 = vld [vmem:[%s5560_s5] sm:$0xff] }
 0x1bb   :  { %v1534_v46 = vld [vmem:[#allocation2 + $0x3] ss:$4 sm:$0xff]  ;;  %v1501_v47 = vld [vmem:[#allocation2 + $0x2] ss:$4 sm:$0xff]  ;;  %v1468_v0 = vld [vmem:[#allocation2 + $0x1] ss:$4 sm:$0xff]  ;;  %2097 = vmatpush.bf16.msra.mxu1 %v5061_v20 }
 0x1bc   :  { %v1541_v17 = vpack.c.bf16 %v1534_v46, %v1534_v46  ;;  %v1508_v27 = vpack.c.bf16 %v1501_v47, %v1501_v47  ;;  %v1475_v38 = vpack.c.bf16 %v1468_v0, %v1468_v0  ;;  %1445 = vst.msk [vmem:[#allocation2 + $0x51] sm:$0xff] %vm39_vm1, %v1437_v45  ;;  %v1451_v52 = vld [vmem:[#allocation2] ss:$4 sm:$0xff]  ;;  %1671 = vmatpush.bf16.msra.mxu2 %v5051_v19 }
 0x1bd   :  { %1446 = vst.msk [vmem:[#allocation2 + $0x59] sm:$0xff] %vm39_vm1, %v1438_v32  ;;  %v1458_v36 = vpack.c.bf16 %v1451_v52, %v1451_v52  ;;  %1736 = vmatpush.bf16.msra.mxu3 %v4052_v11  ;;  %v5093_v45 = vld [vmem:[%s5560_s5 + $0xf8] sm:$0xff]  ;;  %v5098_v32 = vld [vmem:[%s5560_s5 + $0x48] sm:$0xff]  ;;  %v5114_v47 = vld [vmem:[%s5560_s5 + $0x40] sm:$0xff] }
 0x1be   :  { %1549 = vrot.lane.b32.xlu2 %v1541_v17, %s4200_s2  ;;  %1516 = vrot.lane.b32.xlu1 %v1508_v27, %s4201_s23  ;;  %1447 = vst.msk [vmem:[#allocation2 + $0x61] sm:$0xff] %vm39_vm1, %v1439_v8  ;;  %v1453_v23 = vld [vmem:[#allocation2 + $0x20] ss:$4 sm:$0xff] }
 0x1bf   :  { %1483 = vrot.lane.b32.xlu0 %v1475_v38, %s4202_s24  ;;  %v1459_v55 = vpack.c.bf16 %v1453_v23, %v1453_v23  ;;  %1448 = vst.msk [vmem:[#allocation2 + $0x69] sm:$0xff] %vm39_vm1, %v1440_v14  ;;  %v1536_v5 = vld [vmem:[#allocation2 + $0x23] ss:$4 sm:$0xff]  ;;  %v1503_v41 = vld [vmem:[#allocation2 + $0x22] ss:$4 sm:$0xff]  ;;  %2002 = vmatpush.bf16.msra.mxu0 %v5014_v4  ;;  %vm2203_vm1 = vcmask 517120  }
 0x1c0   :  { %1463 = vst.msk [vmem:[#allocation4] sm:$0xf] %vm1462_vm12, %v1458_v36  ;;  %v1470_v28 = vld [vmem:[#allocation2 + $0x21] ss:$4 sm:$0xff]  ;;  %v1542_v60 = vpack.c.bf16 %v1536_v5, %v1536_v5  ;;  %v1509_v42 = vpack.c.bf16 %v1503_v41, %v1503_v41  ;;  %1672 = vmatpush.bf16.msra.mxu2 %v5070_v21  ;;  %2098 = vmatpush.bf16.msra.mxu1 %v5082_v1 }
 0x1c1   :  { %1464 = vst.msk [vmem:[#allocation4 + $0x4] sm:$0xf] %vm1462_vm12, %v1459_v55  ;;  %v1476_v35 = vpack.c.bf16 %v1470_v28, %v1470_v28  ;;  %1737 = vmatpush.bf16.msra.mxu3 %v4051_v12  ;;  %v5103_v8 = vld [vmem:[%s5560_s5 + $0x100] sm:$0xff]  ;;  %v5108_v46 = vld [vmem:[%s5560_s5 + $0x148] sm:$0xff]  ;;  %v5121_v0 = vld [vmem:[%s5560_s5 + $0xf0] sm:$0xff] }
 0x1c2   :  { %v4071_v17 = vld [vmem:[%s5560_s5 + $0xb8] sm:$0xff]  ;;  %v5131_v27 = vld [vmem:[%s5560_s5 + $0x140] sm:$0xff]  ;;  %v5140_v38 = vld [vmem:[%s5560_s5 + $0xe8] sm:$0xff] }
 0x1c3   :  { %2003 = vmatpush.bf16.msra.mxu0 %v5035_v9  ;;  %v5150_v14 = vld [vmem:[%s5560_s5 + $0xe0] sm:$0xff]  ;;  %v5159_v52 = vld [vmem:[%s5560_s5 + $0xd8] sm:$0xff]  ;;  %v5168_v36 = vld [vmem:[%s5560_s5 + $0xd0] sm:$0xff] }
 0x1c4   :  { %v1455_v48 = vld [vmem:[#allocation2 + $0x40] ss:$4 sm:$0xff]  ;;  %v1505_v51 = vld [vmem:[#allocation2 + $0x42] ss:$4 sm:$0xff]  ;;  %v1472_v39 = vld [vmem:[#allocation2 + $0x41] ss:$4 sm:$0xff]  ;;  %1673 = vmatpush.bf16.msra.mxu2 %v5098_v32  ;;  %2099 = vmatpush.bf16.msra.mxu1 %v5108_v46 }
 0x1c5   :  { %v1460_v13 = vpack.c.bf16 %v1455_v48, %v1455_v48  ;;  %v1510_v26 = vpack.c.bf16 %v1505_v51, %v1505_v51  ;;  %v1477_v37 = vpack.c.bf16 %v1472_v39, %v1472_v39  ;;  %v1538_v49 = vld [vmem:[#allocation2 + $0x43] ss:$4 sm:$0xff]  ;;  %1738 = vmatpush.bf16.msra.mxu3 %v4050_v15 }
 0x1c6   :  { %1551 = vrot.lane.b32.xlu2 %v1542_v60, %s4200_s2  ;;  %1518 = vrot.lane.b32.xlu1 %v1509_v42, %s4201_s23  ;;  %v1457_v6 = vld [vmem:[#allocation2 + $0x60] ss:$4 sm:$0xff]  ;;  %v1474_v61 = vld [vmem:[#allocation2 + $0x61] ss:$4 sm:$0xff]  ;;  %v1540_v44 = vld [vmem:[#allocation2 + $0x63] ss:$4 sm:$0xff]  ;;  %v1543_v62 = vpack.c.bf16 %v1538_v49, %v1538_v49 }
 0x1c7   :  { %1485 = vrot.lane.b32.xlu0 %v1476_v35, %s4202_s24  ;;  %1465 = vst.msk [vmem:[#allocation4 + $0x8] sm:$0xf] %vm1462_vm12, %v1460_v13  ;;  %v1461_v56 = vpack.c.bf16 %v1457_v6, %v1457_v6  ;;  %v1478_v43 = vpack.c.bf16 %v1474_v61, %v1474_v61  ;;  %v1507_v58 = vld [vmem:[#allocation2 + $0x62] ss:$4 sm:$0xff]  ;;  %v1544_v18 = vpack.c.bf16 %v1540_v44, %v1540_v44 }
 0x1c8   :  { %v1511_v29 = vpack.c.bf16 %v1507_v58, %v1507_v58  ;;  %2004 = vmatpush.bf16.msra.mxu0 %v5056_v33  ;;  %1674 = vmatpush.bf16.msra.mxu2 %v5114_v47  ;;  %v4067_v23 = vld [vmem:[%s5560_s5 + $0x98] sm:$0xff]  ;;  %v5177_v55 = vld [vmem:[%s5560_s5 + $0xc8] sm:$0xff]  ;;  %v4066_v5 = vld [vmem:[%s5560_s5 + $0x90] sm:$0xff] }
 0x1c9   :  { %1466 = vst.msk [vmem:[#allocation4 + $0xc] sm:$0xf] %vm1462_vm12, %v1461_v56  ;;  %1739 = vmatpush.bf16.msra.mxu3 %v4049_v25  ;;  %2100 = vmatpush.bf16.msra.mxu1 %v5131_v27  ;;  %v5186_v41 = vld [vmem:[%s5560_s5 + $0xc0] sm:$0xff]  ;;  %v4065_v28 = vld [vmem:[%s5560_s5 + $0x88] sm:$0xff] }
 0x1ca   :  { %v4064_v42 = vld [vmem:[%s5560_s5 + $0x80] sm:$0xff] }
 0x1cc   :  { %2005 = vmatpush.bf16.msra.mxu0 %v5077_v59  ;;  %1818 = vmatpush.bf16.msrb.mxu2 %v4071_v17 }
 0x1cd   :  { %1740 = vmatpush.bf16.msra.mxu3 %v4048_v24  ;;  %2279 = vmatpush.bf16.msrb.mxu1 %v4071_v17 }
 0x1ce   :  { %1520 = vrot.lane.b32.xlu2 %v1510_v26, %s4201_s23  ;;  %1489 = vrot.lane.b32.xlu1 %v1478_v43, %s4202_s24 }
 0x1cf   :  { %1487 = vrot.lane.b32.xlu0 %v1477_v37, %s4202_s24 }
 0x1d0   :  { %2006 = vmatpush.bf16.msra.mxu0 %v5103_v8 }
 0x1d1   :  { %1912 = vmatpush.bf16.msrb.mxu3 %v5093_v45 }
 0x1d4   :  { %2259 = vmatpush.bf16.msrb.mxu0 %v4923_v50  ;;  %v4070_v50 = vld [vmem:[%s5560_s5 + $0xb0] sm:$0xff] }
 0x1d5   :  { %1913 = vmatpush.bf16.msrb.mxu3 %v5121_v0  ;;  %1819 = vmatpush.bf16.msrb.mxu2 %v4070_v50 }
 0x1d6   :  { %1555 = vrot.lane.b32.xlu2 %v1544_v18, %s4200_s2  ;;  %1553 = vrot.lane.b32.xlu1 %v1543_v62, %s4200_s2 }
 0x1d7   :  { %1522 = vrot.lane.b32.xlu0 %v1511_v29, %s4201_s23  ;;  %2280 = vmatpush.bf16.msrb.mxu1 %v4070_v50 }
 0x1d8   :  { %2260 = vmatpush.bf16.msrb.mxu0 %v4947_v31  ;;  %v4069_v31 = vld [vmem:[%s5560_s5 + $0xa8] sm:$0xff] }
 0x1d9   :  { %1914 = vmatpush.bf16.msrb.mxu3 %v5140_v38  ;;  %1820 = vmatpush.bf16.msrb.mxu2 %v4069_v31 }
 0x1db   :  { %2281 = vmatpush.bf16.msrb.mxu1 %v4069_v31 }
 0x1dc   :  { %2261 = vmatpush.bf16.msrb.mxu0 %v4974_v53  ;;  %v4068_v53 = vld [vmem:[%s5560_s5 + $0xa0] sm:$0xff] }
 0x1dd   :  { %1915 = vmatpush.bf16.msrb.mxu3 %v5150_v14  ;;  %1821 = vmatpush.bf16.msrb.mxu2 %v4068_v53 }
 0x1df   :  { %2282 = vmatpush.bf16.msrb.mxu1 %v4068_v53 }
 0x1e0   :  { %2262 = vmatpush.bf16.msrb.mxu0 %v4052_v11 }
 0x1e1   :  { %1916 = vmatpush.bf16.msrb.mxu3 %v5159_v52  ;;  %1822 = vmatpush.bf16.msrb.mxu2 %v4067_v23 }
 0x1e3   :  { %2283 = vmatpush.bf16.msrb.mxu1 %v4067_v23 }
 0x1e4   :  { %2263 = vmatpush.bf16.msrb.mxu0 %v4051_v12 }
 0x1e5   :  { %1917 = vmatpush.bf16.msrb.mxu3 %v5168_v36  ;;  %1823 = vmatpush.bf16.msrb.mxu2 %v4066_v5 }
 0x1e7   :  { %2284 = vmatpush.bf16.msrb.mxu1 %v4066_v5 }
 0x1e8   :  { %2264 = vmatpush.bf16.msrb.mxu0 %v4050_v15 }
 0x1e9   :  { %1918 = vmatpush.bf16.msrb.mxu3 %v5177_v55  ;;  %1824 = vmatpush.bf16.msrb.mxu2 %v4065_v28 }
 0x1eb   :  { %2285 = vmatpush.bf16.msrb.mxu1 %v4065_v28 }
 0x1ec   :  { %2265 = vmatpush.bf16.msrb.mxu0 %v4049_v25 }
 0x1ed   :  { %1919 = vmatpush.bf16.msrb.mxu3 %v5186_v41  ;;  %1825 = vmatpush.bf16.msrb.mxu2 %v4064_v42 }
 0x1ef   :  { %2286 = vmatpush.bf16.msrb.mxu1 %v4064_v42 }
 0x1f0   :  { %2266 = vmatpush.bf16.msrb.mxu0 %v4048_v24 }
 0x218   :  { %v1550_v60 = vpop.permute.xlu2 %1549 }
 0x220   :  { %v1552_v13 = vpop.permute.xlu2 %1551 }
 0x228   :  { %v1521_v61 = vpop.permute.xlu2 %1520 }
 0x230   :  { %v1517_v35 = vpop.permute.xlu1 %1516 }
 0x231   :  { %v1484_v48 = vpop.permute.xlu0 %1483 }
 0x232   :  { %1496 = vst.msk [vmem:[#allocation4] sm:$0xf] %vm1495_vm13, %v1484_v48 }
 0x233   :  { %1529 = vst.msk [vmem:[#allocation4] sm:$0xf] %vm1528_vm14, %v1517_v35  ;;  %v1556_v35 = vpop.permute.xlu2 %1555 }
 0x234   :  { %1562 = vst.msk [vmem:[#allocation4] sm:$0xf] %vm1561_vm15, %v1550_v60 }
 0x238   :  { %v1519_v6 = vpop.permute.xlu1 %1518 }
 0x239   :  { %v1486_v51 = vpop.permute.xlu0 %1485 }
 0x23a   :  { %1497 = vst.msk [vmem:[#allocation4 + $0x4] sm:$0xf] %vm1495_vm13, %v1486_v51 }
 0x23b   :  { %1530 = vst.msk [vmem:[#allocation4 + $0x4] sm:$0xf] %vm1528_vm14, %v1519_v6  ;;  %v1928_v26 = vld [vmem:[#allocation4] sm:$0xc] }
 0x23c   :  { %1563 = vst.msk [vmem:[#allocation4 + $0x4] sm:$0xf] %vm1561_vm15, %v1552_v13  ;;  %v1947_v18 = vunpack.c.l.b16 %v1928_v26  ;;  %v1747_v24 = vld [vmem:[#allocation4] sm:$0xe]  ;;  %v4102_v26 = vld [vmem:[%s5560_s5 + $0x1b0] sm:$0xff] }
 0x23d   :  { %v1766_v42 = vunpack.c.l.b16 %v1747_v24 }
 0x240   :  { %v1490_v56 = vpop.permute.xlu1 %1489 }
 0x241   :  { %1499 = vst.msk [vmem:[#allocation4 + $0xc] sm:$0xf] %vm1495_vm13, %v1490_v56  ;;  %v1488_v39 = vpop.permute.xlu0 %1487 }
 0x242   :  { %1498 = vst.msk [vmem:[#allocation4 + $0x8] sm:$0xf] %vm1495_vm13, %v1488_v39 }
 0x243   :  { %1531 = vst.msk [vmem:[#allocation4 + $0x8] sm:$0xf] %vm1528_vm14, %v1521_v61  ;;  %v5204_v43 = vld [vmem:[#allocation4] sm:$0xff]  }
 0x244   :  { %v1571_v37 = vld [vmem:[#allocation4 + $0x4] sm:$0x1]  ;;  %v1608_v44 = vunpack.c.l.b16 %v5204_v43  ;;  %v2034_v29 = vunpack.c.h.b16 %v5204_v43 }
 0x245   :  { %v1682_v49 = vunpack.c.l.b16 %v1571_v37  ;;  %v1834_v58 = vld [vmem:[#allocation4 + $0x4] sm:$0x7] }
 0x246   :  { %v5207_v62 = vld [vmem:[#allocation4 + $0x4] sm:$0x3]  ;;  %v1853_v11 = vunpack.c.l.b16 %v1834_v58  ;;  %v2035_v25 = vpack.c.b16 %v2034_v29, %v1947_v18 }
 0x247   :  { %v1609_v12 = vunpack.c.l.b16 %v5207_v62  ;;  %v1683_v15 = vpack.c.b16 %v1682_v49, %v1608_v44 }
 0x248   :  { %v1948_v17 = vpack.c.b16 %v1853_v11, %v1947_v18  ;;  %v1554_v31 = vpop.permute.xlu1 %1553  ;;  %v2037_v53 = vshrl.u32 %v2035_v25, 16  ;;  %v2040_v23 = vshll.u32 %v2035_v25, 16  ;;  %v1854_v61 = vpack.c.b16 %v1853_v11, %v1766_v42  ;;  %v4101_v18 = vld [vmem:[%s5560_s5 + $0x1a8] sm:$0xff] }
 0x249   :  { %v1610_v50 = vpack.c.b16 %v1609_v12, %v1608_v44  ;;  %1741 = vmatmul.bf16.vlgmr.msra.gmra.mxu3 %v1683_v15  ;;  %1564 = vst.msk [vmem:[#allocation4 + $0x8] sm:$0xf] %vm1561_vm15, %v1554_v31  ;;  %v1523_v5 = vpop.permute.xlu0 %1522  ;;  %v4100_v31 = vld [vmem:[%s5560_s5 + $0x1a0] sm:$0xff] }
 0x24a   :  { %2241 = vmatpush.bf16.msra.mxu3 %v4934_v10  ;;  %v1949_v28 = vrot.slane %v1948_v17, 2  ;;  %1532 = vst.msk [vmem:[#allocation4 + $0xc] sm:$0xf] %vm1528_vm14, %v1523_v5  ;;  %v2039_v48 = vrot.slane %v2037_v53, 2  ;;  %v2042_v13 = vrot.slane %v2040_v23, 3  ;;  %v4103_v10 = vld [vmem:[%s5560_s5 + $0x1b8] sm:$0xff] }
 0x24b   :  { %v1614_v60 = vshll.u32 %v1610_v50, 16  ;;  %1565 = vst.msk [vmem:[#allocation4 + $0xc] sm:$0xf] %vm1561_vm15, %v1556_v35  ;;  %v1612_v6 = vshrl.u32 %v1610_v50, 16  ;;  %v1856_v37 = vshrl.u32 %v1854_v61, 16  ;;  %v1859_v44 = vshll.u32 %v1854_v61, 16 }
 0x24c   :  { %2007 = vmatmul.bf16.vlgmr.msra.gmra.mxu0 %v1949_v28  ;;  %v2043_v56 = vor.u32 %v2042_v13, %v2039_v48 }
 0x24d   :  { %v1616_v51 = vrot.slane %v1614_v60, 1  ;;  %2359 = vmatpush.bf16.msra.mxu0 %v4939_v30  ;;  %v1858_v11 = vrot.slane %v1856_v37, 1  ;;  %v1861_v15 = vrot.slane %v1859_v44, 2 }
 0x24e   :  { %2242 = vmatpush.bf16.msra.mxu3 %v4960_v2  ;;  %2101 = vmatmul.bf16.vlgmr.msra.gmra.mxu1 %v2043_v56 }
 0x24f   :  { %v1617_v39 = vor.u32 %v1616_v51, %v1612_v6  ;;  %2381 = vmatpush.bf16.msra.mxu1 %v4103_v10  ;;  %v1862_v50 = vor.u32 %v1861_v15, %v1858_v11  ;;  %v2109_v6 = vld [vmem:[#allocation4] sm:$0x8] }
 0x250   :  { %v5229_v49 = vld [vmem:[#allocation4 + $0x8] sm:$0xe]  ;;  %v2128_v56 = vunpack.c.l.b16 %v2109_v6 }
 0x251   :  { %1675 = vmatmul.bf16.vlgmr.msra.gmra.mxu2 %v1617_v39  ;;  %2360 = vmatpush.bf16.msra.mxu0 %v4966_v16  ;;  %v2275_v16 = vunpack.c.l.b16 %v5229_v49  ;;  %v5240_v17 = vld [vmem:[#allocation4 + $0x8] sm:$0xc] }
 0x252   :  { %2180 = vmatpush.bf16.msra.mxu2 %v4103_v10  ;;  %2243 = vmatpush.bf16.msra.mxu3 %v5009_v34  ;;  %v5231_v30 = vld [vmem:[#allocation4 + $0x8] sm:$0xff]   ;;  %v2326_v23 = vunpack.c.l.b16 %v5240_v17 }
 0x253   :  { %v2226_v2 = vld [vmem:[#allocation4 + $0xc] sm:$0x1]  ;;  %2382 = vmatpush.bf16.msra.mxu1 %v4102_v26  ;;  %v2230_v34 = vunpack.c.l.b16 %v5231_v30  ;;  %v2348_v5 = vunpack.c.h.b16 %v5231_v30  ;;  %v2375_v13 = vld [vmem:[#allocation4 + $0x8] sm:$0x8] }
 0x254   :  { %v2227_v58 = vld [vmem:[#allocation4 + $0xc] sm:$0x3]  ;;  %v2256_v24 = vunpack.c.l.b16 %v2226_v2 }
 0x255   :  { %2361 = vmatpush.bf16.msra.mxu0 %v5019_v7  ;;  %v2231_v25 = vunpack.c.l.b16 %v2227_v58  ;;  %v2349_v62 = vpack.c.b16 %v2348_v5, %v2326_v23  ;;  %v4096_v39 = vld [vmem:[%s5560_s5 + $0x180] sm:$0xff] }
 0x256   :  { %2181 = vmatpush.bf16.msra.mxu2 %v4102_v26  ;;  %2244 = vmatpush.bf16.msra.mxu3 %v5028_v3  ;;  %v2257_v53 = vpack.c.b16 %v2256_v24, %v2230_v34  ;;  %v1767_v3 = vpack.c.b16 %v1609_v12, %v1766_v42  ;;  %v2129_v26 = vpack.c.b16 %v2034_v29, %v2128_v56 }
 0x257   :  { %2383 = vmatpush.bf16.msra.mxu1 %v4101_v18  ;;  %v2276_v7 = vpack.c.b16 %v2231_v25, %v2275_v16  ;;  %v2232_v28 = vpack.c.b16 %v2231_v25, %v2230_v34  ;;  %v2351_v42 = vshrl.u32 %v2349_v62, 16 }
 0x258   :  { %v1768_v35 = vrot.slane %v1767_v3, 1 }
 0x259   :  { %2362 = vmatpush.bf16.msra.mxu0 %v5040_v40  ;;  %1920 = vmatmul.bf16.vlgmr.msrb.gmra.mxu3 %v1862_v50  ;;  %v4099_v40 = vld [vmem:[%s5560_s5 + $0x198] sm:$0xff]  ;;  %v2277_v60 = vrot.slane %v2276_v7, 1  ;;  %v2236_v12 = vshll.u32 %v2232_v28, 16  ;;  %v2234_v51 = vshrl.u32 %v2232_v28, 16  ;;  %v2353_v10 = vrot.slane %v2351_v42, 2 }
 0x25a   :  { %2182 = vmatpush.bf16.msra.mxu2 %v4101_v18  ;;  %2245 = vmatpush.bf16.msra.mxu3 %v5051_v19  ;;  %v4098_v19 = vld [vmem:[%s5560_s5 + $0x190] sm:$0xff] }
 0x25b   :  { %2384 = vmatpush.bf16.msra.mxu1 %v4100_v31  ;;  %v2238_v48 = vrot.slane %v2236_v12, 1 }
 0x25c   :  { %2267 = vmatmul.bf16.vlgmr.msrb.gmra.mxu0 %v2257_v53 }
 0x25d   :  { %2363 = vmatpush.bf16.msra.mxu0 %v5061_v20  ;;  %v2354_v20 = vshll.u32 %v2349_v62, 16  ;;  %v4186_v62 = vld [vmem:[%s5561_s6] ss:$0 sm:$0xff] }
 0x25e   :  { %2183 = vmatpush.bf16.msra.mxu2 %v4100_v31  ;;  %2246 = vmatpush.bf16.msra.mxu3 %v5070_v21  ;;  %v4097_v21 = vld [vmem:[%s5560_s5 + $0x188] sm:$0xff] }
 0x25f   :  { %2287 = vmatmul.bf16.vlgmr.msrb.gmra.mxu1 %v2277_v60  ;;  %v2356_v61 = vrot.slane %v2354_v20, 3 }
 0x260   :  { %2385 = vmatpush.bf16.msra.mxu1 %v4099_v40 }
 0x261   :  { %1826 = vmatmul.bf16.vlgmr.msrb.gmra.mxu2 %v1768_v35  ;;  %2364 = vmatpush.bf16.msra.mxu0 %v5082_v1  ;;  %v2377_v1 = vunpack.c.l.b16 %v2375_v13 }
 0x262   :  { %2184 = vmatpush.bf16.msra.mxu2 %v4099_v40  ;;  %2247 = vmatpush.bf16.msra.mxu3 %v5098_v32  ;;  %v2239_v32 = vor.u32 %v2238_v48, %v2234_v51 }
 0x263   :  { %v2378_v37 = vpack.c.b16 %v2348_v5, %v2377_v1 }
 0x264   :  { %2386 = vmatpush.bf16.msra.mxu1 %v4098_v19 }
 0x265   :  { %2365 = vmatpush.bf16.msra.mxu0 %v5108_v46  ;;  %v2357_v46 = vor.u32 %v2356_v61, %v2353_v10 }
 0x266   :  { %2185 = vmatpush.bf16.msra.mxu2 %v4098_v19  ;;  %2248 = vmatpush.bf16.msra.mxu3 %v5114_v47  ;;  %v2379_v47 = vrot.slane %v2378_v37, 3 }
 0x268   :  { %2387 = vmatpush.bf16.msra.mxu1 %v4097_v21 }
 0x269   :  { %2366 = vmatpush.bf16.msra.mxu0 %v5131_v27  ;;  %2249 = vmatmul.bf16.vlgmr.msra.gmra.mxu3 %v2239_v32 }
 0x26a   :  { %2330 = vmatpush.bf16.msrb.mxu3 %v4928_v63  ;;  %2186 = vmatpush.bf16.msra.mxu2 %v4097_v21  ;;  %v2130_v63 = vrot.slane %v2129_v26, 3 }
 0x26c   :  { %2367 = vmatmul.bf16.vlgmr.msra.gmra.mxu0 %v2357_v46  ;;  %2388 = vmatpush.bf16.msra.mxu1 %v4096_v39 }
 0x26e   :  { %2331 = vmatpush.bf16.msrb.mxu3 %v4952_v22  ;;  %2187 = vmatpush.bf16.msra.mxu2 %v4096_v39  ;;  %v2295_v22 = vld [vmem:[#allocation4 + $0xc] sm:$0x7] }
 0x26f   :  { %2389 = vmatmul.bf16.vlgmr.msra.gmra.mxu1 %v2379_v47  ;;  %v2297_v27 = vunpack.c.l.b16 %v2295_v22 }
 0x271   :  { %2188 = vmatmul.bf16.vlgmr.msra.gmra.mxu2 %v2130_v63 }
 0x272   :  { %2308 = vmatpush.bf16.msrb.mxu2 %v5093_v45  ;;  %2332 = vmatpush.bf16.msrb.mxu3 %v4979_v54  ;;  %v2298_v54 = vpack.c.b16 %v2297_v27, %v2275_v16 }
 0x274   :  { %v2300_v45 = vshrl.u32 %v2298_v54, 16 }
 0x276   :  { %2309 = vmatpush.bf16.msrb.mxu2 %v5121_v0  ;;  %2333 = vmatpush.bf16.msrb.mxu3 %v5014_v4  ;;  %v2327_v4 = vpack.c.b16 %v2297_v27, %v2326_v23 }
 0x278   :  { %v2328_v0 = vrot.slane %v2327_v4, 2 }
 0x27a   :  { %2310 = vmatpush.bf16.msrb.mxu2 %v5140_v38  ;;  %2334 = vmatpush.bf16.msrb.mxu3 %v5035_v9  ;;  %v2303_v9 = vshll.u32 %v2298_v54, 16 }
 0x27c   :  { %v2305_v38 = vrot.slane %v2303_v9, 2 }
 0x27e   :  { %2311 = vmatpush.bf16.msrb.mxu2 %v5150_v14  ;;  %2335 = vmatpush.bf16.msrb.mxu3 %v5056_v33  ;;  %v2302_v33 = vrot.slane %v2300_v45, 1 }
 0x280   :  { %v2306_v14 = vor.u32 %v2305_v38, %v2302_v33 }
 0x282   :  { %2312 = vmatpush.bf16.msrb.mxu2 %v5159_v52  ;;  %2336 = vmatpush.bf16.msrb.mxu3 %v5077_v59 }
 0x286   :  { %2313 = vmatpush.bf16.msrb.mxu2 %v5168_v36  ;;  %2337 = vmatpush.bf16.msrb.mxu3 %v5103_v8 }
 0x289   :  { %2338 = vmatmul.bf16.vlgmr.msrb.gmra.mxu3 %v2328_v0 }
 0x28a   :  { %2314 = vmatpush.bf16.msrb.mxu2 %v5177_v55 }
 0x28e   :  { %2315 = vmatpush.bf16.msrb.mxu2 %v5186_v41 }
 0x291   :  { %2316 = vmatmul.bf16.vlgmr.msrb.gmra.mxu2 %v2306_v14 }
 0x2c9   :  { %v2008_v55 = vpop.f32.mrf.mxu0 }
 0x2cb   :  { %v2102_v41 = vpop.f32.mrf.mxu1 }
 0x2cc   :  { %v1742_v59 = vpop.f32.mrf.mxu3 }
 0x2d1   :  { %v2010_v44 = vpop.f32.mrf.mxu0 }
 0x2d3   :  { %v2104_v2 = vpop.f32.mrf.mxu1 }
 0x2d4   :  { %v1676_v8 = vpop.f32.mrf.mxu2  ;;  %v1744_v52 = vpop.f32.mrf.mxu3 }
 0x2d5   :  { %v1743_v18 = vadd.f32 %v1742_v59, %v1676_v8 }
 0x2d9   :  { %v2268_v11 = vpop.f32.mrf.mxu0 }
 0x2dc   :  { %v1678_v36 = vpop.f32.mrf.mxu2  ;;  %v1921_v43 = vpop.f32.mrf.mxu3 }
 0x2dd   :  { %v1745_v58 = vadd.f32 %v1744_v52, %v1678_v36  ;;  %v2288_v57 = vpop.f32.mrf.mxu1 }
 0x2e1   :  { %v2270_v31 = vpop.f32.mrf.mxu0 }
 0x2e4   :  { %v1827_v29 = vpop.f32.mrf.mxu2  ;;  %v1923_v49 = vpop.f32.mrf.mxu3 }
 0x2e5   :  { %v1832_v34 = vadd.f32 %v1827_v29, %v1743_v18  ;;  %v2290_v5 = vpop.f32.mrf.mxu1 }
 0x2e7   :  { %v1926_v17 = vadd.f32 %v1921_v43, %v1832_v34 }
 0x2e9   :  { %v2013_v7 = vadd.f32 %v2008_v55, %v1926_v17  ;;  %v2368_v13 = vpop.f32.mrf.mxu0 }
 0x2eb   :  { %v2107_v28 = vadd.f32 %v2102_v41, %v2013_v7 }
 0x2ec   :  { %v1829_v30 = vpop.f32.mrf.mxu2  ;;  %v2250_v25 = vpop.f32.mrf.mxu3 }
 0x2ed   :  { %v1833_v15 = vadd.f32 %v1829_v30, %v1745_v58  ;;  %v2269_v40 = vadd.f32 %v2268_v11, %v2250_v25  ;;  %v2390_v61 = vpop.f32.mrf.mxu1 }
 0x2ef   :  { %v1927_v24 = vadd.f32 %v1923_v49, %v1833_v15  ;;  %v2293_v12 = vadd.f32 %v2288_v57, %v2269_v40 }
 0x2f1   :  { %v2014_v50 = vadd.f32 %v2010_v44, %v1927_v24  ;;  %v2370_v9 = vpop.f32.mrf.mxu0 }
 0x2f3   :  { %v2108_v23 = vadd.f32 %v2104_v2, %v2014_v50 }
 0x2f4   :  { %v2189_v16 = vpop.f32.mrf.mxu2  ;;  %v2252_v53 = vpop.f32.mrf.mxu3 }
 0x2f5   :  { %v2194_v35 = vadd.f32 %v2189_v16, %v2107_v28  ;;  %v2271_v6 = vadd.f32 %v2270_v31, %v2252_v53  ;;  %v2392_v14 = vpop.f32.mrf.mxu1 }
 0x2f7   :  { %v5307_v21 = vadd.f32 %v4186_v62, %v2194_v35  ;;  %v2294_v26 = vadd.f32 %v2290_v5, %v2271_v6 }
 0x2f9   :  { %v2213_v1 = vmul.f32 %v5307_v21, %v5307_v21  ;;  %v2202_v39 = vsel %vm1566_vm0, %v5307_v21, 0.0 }
 0x2fb   :  { %v2215_v47 = vsel %vm1566_vm0, %v2213_v1, 0.0 }
 0x2fc   :  { %v2191_v3 = vpop.f32.mrf.mxu2 }
 0x2fd   :  { %v2195_v60 = vadd.f32 %v2191_v3, %v2108_v23 }
 0x2ff   :  { %v5305_v19 = vadd.f32 %v4186_v62, %v2195_v60 }
 0x301   :  { %v2214_v51 = vmul.f32 %v5305_v19, %v5305_v19  ;;  %v2204_v32 = vsel %vm2203_vm1, %v5305_v19, 0.0 }
 0x302   :  { %v2205_v37 = vadd.f32 %v2204_v32, %v2202_v39  ;;  %v4119_v39 = vld [vmem:[%s5562_s9 + $0x78] sm:$0xff] }
 0x303   :  { %v2216_v46 = vsel %vm2203_vm1, %v2214_v51, 0.0  ;;  %2801 = vmatpush.bf16.msrb.mxu1 %v4119_v39 }
 0x304   :  { %v2217_v54 = vadd.f32 %v2216_v46, %v2215_v47  ;;  %v2206_v0 = vrot.slane %v2205_v37, 4  ;;  %v4127_v46 = vld [vmem:[%s5562_s9 + $0xb8] sm:$0xff]  ;;  %v4118_v47 = vld [vmem:[%s5562_s9 + $0x70] sm:$0xff] }
 0x305   :  { %2664 = vmatpush.bf16.msra.mxu2 %v4127_v46  ;;  %v4142_v46 = vld [vmem:[%s5562_s9 + $0x30] sm:$0xff] }
 0x306   :  { %v2218_v59 = vrot.slane %v2217_v54, 4  ;;  %v2207_v52 = vadd.f32 %v2206_v0, %v2205_v37  ;;  %v4117_v0 = vld [vmem:[%s5562_s9 + $0x68] sm:$0xff] }
 0x307   :  { %2802 = vmatpush.bf16.msrb.mxu1 %v4118_v47  ;;  %v4141_v47 = vld [vmem:[%s5562_s9 + $0x28] sm:$0xff] }
 0x308   :  { %v2219_v43 = vadd.f32 %v2218_v59, %v2217_v54  ;;  %v2208_v49 = vrot.slane %v2207_v52, 2  ;;  %v2426_v54 = vld [vmem:[%s5563_s7] sm:$0x1] }
 0x309   :  { %v2439_v59 = vld [vmem:[%s5564_s8] sm:$0x1] }
 0x30a   :  { %v2220_v18 = vrot.slane %v2219_v43, 2  ;;  %v2209_v25 = vadd.f32 %v2208_v49, %v2207_v52 }
 0x30b   :  { %2803 = vmatpush.bf16.msrb.mxu1 %v4117_v0  ;;  %v4164_v0 = vld [vmem:[%s5562_s9 + $0xe0] sm:$0xff] }
 0x30c   :  { %v2339_v42 = vpop.f32.mrf.mxu3  ;;  %v2221_v57 = vadd.f32 %v2220_v18, %v2219_v43  ;;  %v2210_v50 = vrot.slane %v2209_v25, 1  ;;  %v4108_v43 = vld [vmem:[%s5562_s9 + $0x20] sm:$0xff] }
 0x30e   :  { %v2222_v53 = vrot.slane %v2221_v57, 1  ;;  %v2211_v5 = vadd.f32 %v2210_v50, %v2209_v25 }
 0x310   :  { %v2223_v60 = vadd.f32 %v2222_v53, %v2221_v57  ;;  %v4122_v53 = vld [vmem:[%s5562_s9 + $0x90] sm:$0xff] }
 0x314   :  { %v2317_v20 = vpop.f32.mrf.mxu2  ;;  %v2341_v4 = vpop.f32.mrf.mxu3 }
 0x315   :  { %v2322_v48 = vadd.f32 %v2317_v20, %v2293_v12 }
 0x317   :  { %v2344_v10 = vadd.f32 %v2339_v42, %v2322_v48 }
 0x319   :  { %v2373_v56 = vadd.f32 %v2368_v13, %v2344_v10 }
 0x31b   :  { %v2395_v22 = vadd.f32 %v2390_v61, %v2373_v56  ;;  %v4111_v56 = vld [vmem:[%s5562_s9 + $0x38] sm:$0xff] }
 0x31c   :  { %v2319_v63 = vpop.f32.mrf.mxu2  ;;  %2788 = vmatpush.bf16.msrb.mxu0 %v4111_v56  ;;  %v4167_v56 = vld [vmem:[%s5562_s9 + $0xf8] sm:$0xff] }
 0x31d   :  { %v2323_v27 = vadd.f32 %v2319_v63, %v2294_v26  ;;  %v5319_v33 = vadd.f32 %v4186_v62, %v2395_v22  ;;  %v4135_v26 = vld [vmem:[%s5562_s9 + $0xf8] sm:$0xff]  ;;  %v4110_v63 = vld [vmem:[%s5562_s9 + $0x30] sm:$0xff] }
 0x31e   :  { %2677 = vmatpush.bf16.msra.mxu3 %v4135_v26  ;;  %v4126_v22 = vld [vmem:[%s5562_s9 + $0xb0] sm:$0xff] }
 0x31f   :  { %v2345_v45 = vadd.f32 %v2341_v4, %v2323_v27  ;;  %v2409_v36 = vmul.f32 %v5319_v33, %v5319_v33  ;;  %v2399_v29 = vsel %vm1566_vm0, %v5319_v33, 0.0  ;;  %v4134_v27 = vld [vmem:[%s5562_s9 + $0xf0] sm:$0xff]  ;;  %2665 = vmatpush.bf16.msra.mxu2 %v4126_v22  ;;  %v4149_v22 = vld [vmem:[%s5562_s9 + $0x68] sm:$0xff] }
 0x320   :  { %2789 = vmatpush.bf16.msrb.mxu0 %v4110_v63  ;;  %v4150_v26 = vld [vmem:[%s5562_s9 + $0x70] sm:$0xff] }
 0x321   :  { %v2374_v38 = vadd.f32 %v2370_v9, %v2345_v45  ;;  %v2411_v2 = vsel %vm1566_vm0, %v2409_v36, 0.0  ;;  %v4109_v9 = vld [vmem:[%s5562_s9 + $0x28] sm:$0xff]  ;;  %v4166_v63 = vld [vmem:[%s5562_s9 + $0xf0] sm:$0xff] }
 0x322   :  { %2678 = vmatpush.bf16.msra.mxu3 %v4134_v27  ;;  %v4157_v27 = vld [vmem:[%s5562_s9 + $0xa8] sm:$0xff] }
 0x323   :  { %v2396_v8 = vadd.f32 %v2392_v14, %v2374_v38  ;;  %v4125_v14 = vld [vmem:[%s5562_s9 + $0xa8] sm:$0xff] }
 0x324   :  { %2790 = vmatpush.bf16.msrb.mxu0 %v4109_v9  ;;  %2666 = vmatpush.bf16.msra.mxu2 %v4125_v14  ;;  %v4156_v9 = vld [vmem:[%s5562_s9 + $0xa0] sm:$0xff]  ;;  %v4147_v14 = vld [vmem:[%s5562_s9 + $0x58] sm:$0xff] }
 0x325   :  { %v5323_v55 = vadd.f32 %v4186_v62, %v2396_v8  ;;  %v4133_v8 = vld [vmem:[%s5562_s9 + $0xe8] sm:$0xff] }
 0x326   :  { %2679 = vmatpush.bf16.msra.mxu3 %v4133_v8  ;;  %v4163_v8 = vld [vmem:[%s5562_s9 + $0xd8] sm:$0xff] }
 0x327   :  { %v2400_v41 = vsel %vm2203_vm1, %v5323_v55, 0.0  ;;  %v2410_v44 = vmul.f32 %v5323_v55, %v5323_v55 }
 0x328   :  { %v2401_v30 = vadd.f32 %v2400_v41, %v2399_v29  ;;  %v4116_v29 = vld [vmem:[%s5562_s9 + $0x60] sm:$0xff]  ;;  %2791 = vmatpush.bf16.msrb.mxu0 %v4108_v43  ;;  %v4154_v43 = vld [vmem:[%s5562_s9 + $0x90] sm:$0xff] }
 0x329   :  { %v2412_v58 = vsel %vm2203_vm1, %v2410_v44, 0.0  ;;  %v4124_v44 = vld [vmem:[%s5562_s9 + $0xa0] sm:$0xff]  ;;  %2804 = vmatpush.bf16.msrb.mxu1 %v4116_v29  ;;  %v4162_v29 = vld [vmem:[%s5562_s9 + $0xd0] sm:$0xff] }
 0x32a   :  { %v2402_v11 = vrot.slane %v2401_v30, 4  ;;  %v2413_v15 = vadd.f32 %v2412_v58, %v2411_v2  ;;  %2667 = vmatpush.bf16.msra.mxu2 %v4124_v44  ;;  %v4145_v44 = vld [vmem:[%s5562_s9 + $0x48] sm:$0xff] }
 0x32c   :  { %v2403_v16 = vadd.f32 %v2402_v11, %v2401_v30  ;;  %v2414_v34 = vrot.slane %v2413_v15, 4  ;;  %v4132_v30 = vld [vmem:[%s5562_s9 + $0xe0] sm:$0xff] }
 0x32d   :  { %2680 = vmatpush.bf16.msra.mxu3 %v4132_v30  ;;  %v4161_v30 = vld [vmem:[%s5562_s9 + $0xc8] sm:$0xff] }
 0x32e   :  { %v2404_v24 = vrot.slane %v2403_v16, 2  ;;  %v2415_v17 = vadd.f32 %v2414_v34, %v2413_v15  ;;  %v4107_v15 = vld [vmem:[%s5562_s9 + $0x18] sm:$0xff] }
 0x32f   :  { %2792 = vmatpush.bf16.msrb.mxu0 %v4107_v15 }
 0x330   :  { %v2405_v31 = vadd.f32 %v2404_v24, %v2403_v16  ;;  %v2416_v7 = vrot.slane %v2415_v17, 2 }
 0x332   :  { %v2406_v3 = vrot.slane %v2405_v31, 1  ;;  %v2417_v23 = vadd.f32 %v2416_v7, %v2415_v17  ;;  %v4114_v7 = vld [vmem:[%s5562_s9 + $0x50] sm:$0xff] }
 0x334   :  { %v2407_v40 = vadd.f32 %v2406_v3, %v2405_v31  ;;  %v2418_v28 = vrot.slane %v2417_v23, 1  ;;  %v4106_v31 = vld [vmem:[%s5562_s9 + $0x10] sm:$0xff] }
 0x335   :  { %v4130_v3 = vld [vmem:[%s5562_s9 + $0xd0] sm:$0xff]  ;;  %2793 = vmatpush.bf16.msrb.mxu0 %v4106_v31 }
 0x336   :  { %v2408_v35 = vadd.f32 %v2407_v40, %v2211_v5  ;;  %v2419_v62 = vadd.f32 %v2418_v28, %v2417_v23  ;;  %v4105_v23 = vld [vmem:[%s5562_s9 + $0x8] sm:$0xff] }
 0x337   :  { %v4113_v5 = vld [vmem:[%s5562_s9 + $0x48] sm:$0xff] }
 0x338   :  { %v2420_v12 = vadd.f32 %v2419_v62, %v2223_v60  ;;  %v2421_v42 = vmul.f32 0.05, %v2408_v35  ;;  %v4121_v40 = vld [vmem:[%s5562_s9 + $0x88] sm:$0xff]  ;;  %v4104_v60 = vld [vmem:[%s5562_s9] sm:$0xff]  ;;  %v4143_v62 = vld [vmem:[%s5562_s9 + $0x38] sm:$0xff] }
 0x339   :  { %v4129_v28 = vld [vmem:[%s5562_s9 + $0xc8] sm:$0xff]  ;;  %2794 = vmatpush.bf16.msrb.mxu0 %v4105_v23  ;;  %v4112_v35 = vld [vmem:[%s5562_s9 + $0x40] sm:$0xff] }
 0x33a   :  { %v2422_v20 = vmul.f32 0.05, %v2420_v12  ;;  %v2423_v48 = vmul.f32 %v2421_v42, %v2421_v42  ;;  %v4151_v12 = vld [vmem:[%s5562_s9 + $0x78] sm:$0xff] }
 0x33c   :  { %v2424_v13 = vsub.f32 %v2422_v20, %v2423_v48  ;;  %v4128_v20 = vld [vmem:[%s5562_s9 + $0xc0] sm:$0xff] }
 0x33d   :  { %2795 = vmatpush.bf16.msrb.mxu0 %v4104_v60 }
 0x33e   :  { %v2425_v6 = vmax.f32 %v2424_v13, 0.0 }
 0x340   :  { %v2427_v51 = vadd.f32 1e-05, %v2425_v6 }
 0x341   :  { %3144 = vmatpush.bf16.msra.mxu0 %v4143_v62 }
 0x342   :  { %4189 = vrsqrt.f32 %v2427_v51  ;;  %vm2434_vm3 = vweird.f32 %v2427_v51 }
 0x345   :  { %3145 = vmatpush.bf16.msra.mxu0 %v4142_v46 }
 0x348   :  { %v4190_v10 = vpop.eup %4189 }
 0x349   :  { %v2429_v61 = vmul.f32 %v4190_v10, %v2427_v51  ;;  %vm2435_vm2 = vweird.f32 %v4190_v10  ;;  %3146 = vmatpush.bf16.msra.mxu0 %v4141_v47 }
 0x34a   :  { %vm2436_vm4 = vmor %vm2434_vm3, %vm2435_vm2 }
 0x34b   :  { %v2430_v1 = vmul.f32 %v4190_v10, %v2429_v61 }
 0x34d   :  { %v2431_v32 = vmul.f32 0.5, %v2430_v1 }
 0x34f   :  { %v2432_v37 = vsub.f32 1.5, %v2431_v32  ;;  %v4159_v32 = vld [vmem:[%s5562_s9 + $0xb8] sm:$0xff] }
 0x351   :  { %v2433_v4 = vmul.f32 %v4190_v10, %v2432_v37  ;;  %v4158_v37 = vld [vmem:[%s5562_s9 + $0xb0] sm:$0xff] }
 0x353   :  { %v2437_v45 = vsel %vm2436_vm4, %v4190_v10, %v2433_v4  ;;  %v4140_v4 = vld [vmem:[%s5562_s9 + $0x20] sm:$0xff] }
 0x354   :  { %v2438_v38 = vmul.f32 %v2437_v45, %v2426_v54  ;;  %v4165_v54 = vld [vmem:[%s5562_s9 + $0xe8] sm:$0xff]  ;;  %v4148_v45 = vld [vmem:[%s5562_s9 + $0x60] sm:$0xff]  ;;  %3147 = vmatpush.bf16.msra.mxu0 %v4140_v4 }
 0x356   :  { %v2440_v52 = vmul.f32 %v2438_v38, %v2421_v42  ;;  %v2443_v36 = vperm.slane %v2438_v38, 0  ;;  %v4120_v42 = vld [vmem:[%s5562_s9 + $0x80] sm:$0xff]  ;;  %v4139_v38 = vld [vmem:[%s5562_s9 + $0x18] sm:$0xff] }
 0x358   :  { %v2441_v41 = vsub.f32 %v2439_v59, %v2440_v52  ;;  %v2445_v49 = vmul.f32 %v2443_v36, %v5307_v21  ;;  %v2446_v2 = vmul.f32 %v2443_v36, %v5305_v19  ;;  %v2456_v18 = vmul.f32 %v2443_v36, %v5319_v33  ;;  %v4115_v21 = vld [vmem:[%s5562_s9 + $0x58] sm:$0xff]  ;;  %3148 = vmatpush.bf16.msra.mxu0 %v4139_v38  ;;  %v4138_v52 = vld [vmem:[%s5562_s9 + $0x10] sm:$0xff] }
 0x359   :  { %v2457_v11 = vmul.f32 %v2443_v36, %v5323_v55  ;;  %v4123_v19 = vld [vmem:[%s5562_s9 + $0x98] sm:$0xff]  ;;  %2805 = vmatpush.bf16.msrb.mxu1 %v4115_v21  ;;  %v4146_v36 = vld [vmem:[%s5562_s9 + $0x50] sm:$0xff] }
 0x35a   :  { %v2448_v58 = vperm.slane %v2441_v41, 0  ;;  %v4131_v33 = vld [vmem:[%s5562_s9 + $0xd8] sm:$0xff]  ;;  %2668 = vmatpush.bf16.msra.mxu2 %v4123_v19  ;;  %v4137_v41 = vld [vmem:[%s5562_s9 + $0x8] sm:$0xff] }
 0x35b   :  { %2681 = vmatpush.bf16.msra.mxu3 %v4131_v33  ;;  %v4155_v59 = vld [vmem:[%s5562_s9 + $0x98] sm:$0xff] }
 0x35c   :  { %v2450_v25 = vadd.f32 %v2448_v58, %v2445_v49  ;;  %v2451_v16 = vadd.f32 %v2448_v58, %v2446_v2  ;;  %v2458_v34 = vadd.f32 %v2456_v18, %v2448_v58  ;;  %v2459_v57 = vadd.f32 %v2457_v11, %v2448_v58  ;;  %3149 = vmatpush.bf16.msra.mxu0 %v4138_v52  ;;  %v4153_v49 = vld [vmem:[%s5562_s9 + $0x88] sm:$0xff]  ;;  %v4136_v2 = vld [vmem:[%s5562_s9] sm:$0xff] }
 0x35d   :  { %2806 = vmatpush.bf16.msrb.mxu1 %v4114_v7  ;;  %v4144_v58 = vld [vmem:[%s5562_s9 + $0x40] sm:$0xff] }
 0x35e   :  { %v2452_v55 = vmax.f32 %v2450_v25, 0.0  ;;  %v2453_v24 = vmax.f32 %v2451_v16, 0.0  ;;  %v2460_v17 = vmax.f32 %v2458_v34, 0.0  ;;  %v2461_v50 = vmax.f32 %v2459_v57, 0.0  ;;  %2669 = vmatpush.bf16.msra.mxu2 %v4122_v53  ;;  %v4152_v18 = vld [vmem:[%s5562_s9 + $0x80] sm:$0xff] }
 0x35f   :  { %2682 = vmatpush.bf16.msra.mxu3 %v4130_v3  ;;  %v4160_v11 = vld [vmem:[%s5562_s9 + $0xc0] sm:$0xff] }
 0x360   :  { %2454 = vst.msk [vmem:[#allocation3] sm:$0xff] %vm1566_vm0, %v2452_v55  ;;  %3150 = vmatpush.bf16.msra.mxu0 %v4137_v41 }
 0x361   :  { %2455 = vst.msk [vmem:[#allocation3 + $0x8] sm:$0x3] %vm2203_vm1, %v2453_v24  ;;  %2807 = vmatpush.bf16.msrb.mxu1 %v4113_v5 }
 0x362   :  { %2462 = vst.msk [vmem:[#allocation3 + $0xc] sm:$0xff] %vm1566_vm0, %v2460_v17  ;;  %2670 = vmatpush.bf16.msra.mxu2 %v4121_v40 }
 0x363   :  { %2463 = vst.msk [vmem:[#allocation3 + $0x14] sm:$0x3] %vm2203_vm1, %v2461_v50  ;;  %2683 = vmatpush.bf16.msra.mxu3 %v4129_v28 }
 0x364   :  { %3151 = vmatpush.bf16.msra.mxu0 %v4136_v2 }
 0x365   :  { %2808 = vmatpush.bf16.msrb.mxu1 %v4112_v35 }
 0x366   :  { %2671 = vmatpush.bf16.msra.mxu2 %v4120_v42 }
 0x367   :  { %2684 = vmatpush.bf16.msra.mxu3 %v4128_v20 }
 0x369   :  { %v2482_v48 = vld [vmem:[#allocation3 + $0x3] ss:$4 sm:$0x3f]  ;;  %v2478_v13 = vld [vmem:[#allocation3 + $0x2] ss:$4 sm:$0x3f]  ;;  %3157 = vmatpush.bf16.msra.mxu1 %v4151_v12 }
 0x36a   :  { %v2483_v6 = vpack.c.bf16 %v2482_v48, %v2482_v48  ;;  %v2469_v51 = vld [vmem:[#allocation3 + $0x1] ss:$4 sm:$0x3f]  ;;  %v2479_v10 = vpack.c.bf16 %v2478_v13, %v2478_v13  ;;  %v2464_v61 = vld [vmem:[#allocation3] ss:$4 sm:$0x3f]  ;;  %3007 = vmatpush.bf16.msrb.mxu2 %v4159_v32 }
 0x36b   :  { %v2470_v1 = vpack.c.bf16 %v2469_v51, %v2469_v51  ;;  %v2465_v39 = vpack.c.bf16 %v2464_v61, %v2464_v61  ;;  %3020 = vmatpush.bf16.msrb.mxu3 %v4167_v56  ;;  %v2814_v32 = vld [vmem:[%s5565_s10] sm:$0x1] }
 0x36c   :  { %2485 = vrot.lane.b32.xlu1 %v2483_v6, %s4201_s23  ;;  %2480 = vst.msk [vmem:[#allocation5 + $0x4] sm:$0x7] %vm2466_vm5, %v2479_v10 }
 0x36d   :  { %2472 = vrot.lane.b32.xlu0 %v2470_v1, %s4201_s23  ;;  %2467 = vst.msk [vmem:[#allocation5] sm:$0x7] %vm2466_vm5, %v2465_v39  ;;  %3158 = vmatpush.bf16.msra.mxu1 %v4150_v26 }
 0x36e   :  { %3008 = vmatpush.bf16.msrb.mxu2 %v4158_v37 }
 0x36f   :  { %3021 = vmatpush.bf16.msrb.mxu3 %v4166_v63 }
 0x371   :  { %3159 = vmatpush.bf16.msra.mxu1 %v4149_v22 }
 0x372   :  { %3009 = vmatpush.bf16.msrb.mxu2 %v4157_v27 }
 0x373   :  { %3022 = vmatpush.bf16.msrb.mxu3 %v4165_v54 }
 0x375   :  { %3160 = vmatpush.bf16.msra.mxu1 %v4148_v45 }
 0x376   :  { %3010 = vmatpush.bf16.msrb.mxu2 %v4156_v9 }
 0x377   :  { %3023 = vmatpush.bf16.msrb.mxu3 %v4164_v0 }
 0x379   :  { %3161 = vmatpush.bf16.msra.mxu1 %v4147_v14  ;;  %v3170_v14 = vld [vmem:[%s5565_s10] sm:$0x1] }
 0x37a   :  { %3011 = vmatpush.bf16.msrb.mxu2 %v4155_v59 }
 0x37b   :  { %3024 = vmatpush.bf16.msrb.mxu3 %v4163_v8 }
 0x37d   :  { %3162 = vmatpush.bf16.msra.mxu1 %v4146_v36 }
 0x37e   :  { %3012 = vmatpush.bf16.msrb.mxu2 %v4154_v43 }
 0x37f   :  { %3025 = vmatpush.bf16.msrb.mxu3 %v4162_v29 }
 0x381   :  { %3163 = vmatpush.bf16.msra.mxu1 %v4145_v44 }
 0x382   :  { %3013 = vmatpush.bf16.msrb.mxu2 %v4153_v49 }
 0x383   :  { %3026 = vmatpush.bf16.msrb.mxu3 %v4161_v30 }
 0x385   :  { %3164 = vmatpush.bf16.msra.mxu1 %v4144_v58 }
 0x386   :  { %3014 = vmatpush.bf16.msrb.mxu2 %v4152_v18 }
 0x387   :  { %3027 = vmatpush.bf16.msrb.mxu3 %v4160_v11 }
 0x3de   :  { %v2486_v15 = vpop.permute.xlu1 %2485 }
 0x3df   :  { %2488 = vst.msk [vmem:[#allocation5 + $0x4] sm:$0x7] %vm2475_vm6, %v2486_v15  ;;  %v2473_v21 = vpop.permute.xlu0 %2472 }
 0x3e0   :  { %2476 = vst.msk [vmem:[#allocation5] sm:$0x7] %vm2475_vm6, %v2473_v21 }
 0x3e7   :  { %v2489_v25 = vld [vmem:[#allocation5] sm:$0x11]  ;;  %v2836_v33 = vld [vmem:[#allocation5] sm:$0x22]  ;;  %v2869_v31 = vld [vmem:[#allocation5] sm:$0x44] }
 0x3e8   :  { %v2556_v16 = vunpack.c.l.b16 %v2489_v25  ;;  %v2557_v34 = vunpack.c.h.b16 %v2489_v25  ;;  %v3034_v17 = vunpack.c.l.b16 %v2836_v33  ;;  %v3035_v50 = vunpack.c.h.b16 %v2836_v33 }
 0x3e9   :  { %v2903_v3 = vunpack.c.l.b16 %v2869_v31  ;;  %v2904_v23 = vunpack.c.h.b16 %v2869_v31 }
 0x3ea   :  { %v2558_v57 = vpack.c.b16 %v2556_v16, %v2556_v16  ;;  %v2559_v19 = vpack.c.b16 %v2557_v34, %v2557_v34  ;;  %v3036_v7 = vpack.c.b16 %v3034_v17, %v3034_v17  ;;  %v3037_v53 = vpack.c.b16 %v3035_v50, %v3035_v50 }
 0x3eb   :  { %v2905_v28 = vpack.c.b16 %v2903_v3, %v2903_v3  ;;  %v2906_v60 = vpack.c.b16 %v2904_v23, %v2904_v23 }
 0x3ec   :  { %2796 = vmatmul.bf16.vlgmr.msrb.gmra.mxu0 %v2558_v57  ;;  %2809 = vmatmul.bf16.vlgmr.msrb.gmra.mxu1 %v2559_v19  ;;  %v2561_v55 = vshrl.u32 %v2558_v57, 16  ;;  %v2564_v24 = vshrl.u32 %v2559_v19, 16  ;;  %v3039_v5 = vshrl.u32 %v3036_v7, 16  ;;  %v3043_v40 = vshrl.u32 %v3037_v53, 16 }
 0x3ed   :  { %v2907_v12 = vrot.slane %v2905_v28, 2  ;;  %v2908_v42 = vrot.slane %v2906_v60, 2 }
 0x3ee   :  { %2672 = vmatmul.bf16.vlgmr.msra.gmra.mxu2 %v2561_v55  ;;  %2685 = vmatmul.bf16.vlgmr.msra.gmra.mxu3 %v2564_v24  ;;  %v3041_v35 = vrot.slane %v3039_v5, 1  ;;  %v3045_v62 = vrot.slane %v3043_v40, 1 }
 0x3fc   :  { %3152 = vmatmul.bf16.vlgmr.msra.gmra.mxu0 %v3041_v35  ;;  %3165 = vmatmul.bf16.vlgmr.msra.gmra.mxu1 %v3045_v62 }
 0x3fe   :  { %3015 = vmatmul.bf16.vlgmr.msrb.gmra.mxu2 %v2907_v12  ;;  %3028 = vmatmul.bf16.vlgmr.msrb.gmra.mxu3 %v2908_v42 }
 0x469   :  { %v2797_v20 = vpop.f32.mrf.mxu0  ;;  %v2810_v48 = vpop.f32.mrf.mxu1 }
 0x471   :  { %v2673_v13 = vpop.f32.mrf.mxu2  ;;  %v2686_v6 = vpop.f32.mrf.mxu3 }
 0x472   :  { %v2687_v51 = vadd.f32 %v2686_v6, %v2673_v13  ;;  %v2799_v10 = vpop.f32.mrf.mxu0  ;;  %v2812_v61 = vpop.f32.mrf.mxu1 }
 0x474   :  { %v2798_v1 = vadd.f32 %v2797_v20, %v2687_v51 }
 0x476   :  { %v2811_v56 = vadd.f32 %v2810_v48, %v2798_v1 }
 0x478   :  { %v2815_v39 = vadd.f32 %v2814_v32, %v2811_v56 }
 0x479   :  { %v2675_v46 = vpop.f32.mrf.mxu2  ;;  %v2688_v26 = vpop.f32.mrf.mxu3 }
 0x47a   :  { %v3860_v37 = vmul.f32 -1.442695, %v2815_v39  ;;  %v3153_v63 = vpop.f32.mrf.mxu0  ;;  %v3166_v47 = vpop.f32.mrf.mxu1 }
 0x47c   :  { %4191 = vpow2.f32 %v3860_v37 }
 0x481   :  { %v3016_v22 = vpop.f32.mrf.mxu2  ;;  %v3029_v27 = vpop.f32.mrf.mxu3 }
 0x482   :  { %v4192_v54 = vpop.eup %4191  ;;  %v3030_v4 = vadd.f32 %v3029_v27, %v3016_v22  ;;  %v3155_v45 = vpop.f32.mrf.mxu0 }
 0x483   :  { %v3168_v9 = vpop.f32.mrf.mxu1  ;;  %v2819_v0 = vadd.f32 1.0, %v4192_v54 }
 0x484   :  { %v3154_v38 = vadd.f32 %v3153_v63, %v3030_v4 }
 0x485   :  { %4193 = vrcp.f32 %v2819_v0  ;;  %v2831_v49 = vand.u32 2147483648, %v2819_v0  ;;  %v2829_v2 = vand.u32 2147483647, %v2819_v0  ;;  %vm2825_vm8 = vweird.f32 %v2819_v0 }
 0x486   :  { %v3167_v59 = vadd.f32 %v3166_v47, %v3154_v38 }
 0x487   :  { %v2832_v11 = vor.u32 1.1754944e-38, %v2831_v49  ;;  %vm2830_vm10 = vcmp.eq.f32.partialorder %v2829_v2, 8.507059e+37 }
 0x488   :  { %v3171_v8 = vadd.f32 %v3170_v14, %v3167_v59 }
 0x489   :  { %v3018_v52 = vpop.f32.mrf.mxu2  ;;  %v3031_v36 = vpop.f32.mrf.mxu3 }
 0x48a   :  { %v4021_v43 = vmul.f32 -1.442695, %v3171_v8 }
 0x48b   :  { %v4194_v29 = vpop.eup %4193 }
 0x48c   :  { %v2821_v41 = vmul.f32 %v4194_v29, %v2819_v0  ;;  %4195 = vpow2.f32 %v4021_v43  ;;  %vm2826_vm7 = vweird.f32 %v4194_v29 }
 0x48d   :  { %vm2827_vm9 = vmor %vm2825_vm8, %vm2826_vm7 }
 0x48e   :  { %v2822_v44 = vsub.f32 1.0, %v2821_v41 }
 0x490   :  { %v2823_v30 = vmul.f32 %v4194_v29, %v2822_v44 }
 0x492   :  { %v4196_v58 = vpop.eup %4195  ;;  %v2824_v18 = vadd.f32 %v4194_v29, %v2823_v30 }
 0x493   :  { %v3175_v15 = vadd.f32 1.0, %v4196_v58 }
 0x494   :  { %v2828_v21 = vsel %vm2827_vm9, %v4194_v29, %v2824_v18 }
 0x495   :  { %v2833_v25 = vsel %vm2830_vm10, %v2832_v11, %v2828_v21  ;;  %4197 = vrcp.f32 %v3175_v15  ;;  %v3187_v19 = vand.u32 2147483648, %v3175_v15  ;;  %v3185_v55 = vand.u32 2147483647, %v3175_v15 }
 0x496   :  { %2835 = vst [vmem:[%s5566_s11] sm:$0x1] %v2833_v25  ;;  %vm3181_vm12 = vweird.f32 %v3175_v15 }
 0x497   :  { %v3188_v17 = vor.u32 1.1754944e-38, %v3187_v19  ;;  %vm3186_vm14 = vcmp.eq.f32.partialorder %v3185_v55, 8.507059e+37 }
 0x49b   :  { %v4198_v16 = vpop.eup %4197 }
 0x49c   :  { %v3177_v34 = vmul.f32 %v4198_v16, %v3175_v15  ;;  %vm3182_vm11 = vweird.f32 %v4198_v16 }
 0x49d   :  { %vm3183_vm13 = vmor %vm3181_vm12, %vm3182_vm11 }
 0x49e   :  { %v3178_v57 = vsub.f32 1.0, %v3177_v34 }
 0x4a0   :  { %v3179_v33 = vmul.f32 %v4198_v16, %v3178_v57 }
 0x4a2   :  { %v3180_v24 = vadd.f32 %v4198_v16, %v3179_v33 }
 0x4a4   :  { %v3184_v50 = vsel %vm3183_vm13, %v4198_v16, %v3180_v24 }
 0x4a5   :  { %v3189_v31 = vsel %vm3186_vm14, %v3188_v17, %v3184_v50 }
 0x4a6   :  { %3191 = vst [vmem:[%s5566_s11 + $0x1] sm:$0x1] %v3189_v31 }

</bundles_post_ra>
